<compile_context>
chip_gen: v7x
topology: tpu7x:2x2x1
jax: 0.10.0
libtpu: 0.0.40
codegen_flags: <defaults>
</compile_context>

<pallas_src>
from functools import partial

import jax
import jax.numpy as jnp
import numpy as np
from jax.experimental import pallas as pl
from jax.experimental.pallas import tpu as pltpu


def _instance_norm(y, scale, shift, eps):
    # y: (HW, C) f32.  One-pass biased variance (== torch.var * (n-1)/n).
    n = y.shape[0]
    inv_n = 1.0 / n
    mean = jnp.sum(y, axis=0, keepdims=True) * inv_n
    ex2 = jnp.sum(y * y, axis=0, keepdims=True) * inv_n
    var = jnp.maximum(ex2 - mean * mean, 0.0)
    return (y - mean) * jax.lax.rsqrt(var + eps) * scale + shift


def _conv_same(xp_bf16, w_ref, b_ref, H, W, K):
    # xp_bf16: (H+K-1, W+K-1, C) bf16 (reflect-padded input, channels on lanes)
    # w_ref:   (K*K*C, Co) bf16, tap-major (dy, dx, ci) ordering
    # b_ref:   (1, Co) f32
    C = xp_bf16.shape[-1]
    taps = [xp_bf16[dy:dy + H, dx:dx + W, :]
            for dy in range(K) for dx in range(K)]
    patches = jnp.concatenate(taps, axis=-1).reshape(H * W, K * K * C)
    y = jnp.dot(patches, w_ref[...], preferred_element_type=jnp.float32)
    # Bias is mathematically cancelled by the following instance norm, but it
    # is one cheap VPU add so we keep it for bit-level fidelity to the module.
    return y + b_ref[...]                                   # (HW, Co) f32


def resnet_block_kernel(xp_ref, w1_ref, b1_ref, s1_ref, sh1_ref,
                        w2_ref, b2_ref, s2_ref, sh2_ref,
                        o_ref, yp_ref, *, H, W, K, padding, eps):
    p = padding
    C = o_ref.shape[-1]

    xp_f32 = xp_ref[0]                                      # (Hp, Wp, C) f32
    xp_bf = xp_f32.astype(jnp.bfloat16)

    # ---- conv1 -> instance norm -> relu ----
    y = _conv_same(xp_bf, w1_ref, b1_ref, H, W, K)          # (HW, C) f32
    y = _instance_norm(y, s1_ref[...], sh1_ref[...], eps)
    y = jnp.maximum(y, 0.0)

    # ---- reflect-pad y into VMEM scratch (static slice stores, no concats) ----
    y_img = y.reshape(H, W, C).astype(jnp.bfloat16)
    yp_ref[p:p + H, p:p + W, :] = y_img
    for i in range(p):                                      # top / bottom rows
        yp_ref[p - 1 - i:p - i, p:p + W, :] = y_img[1 + i:2 + i, :, :]
        yp_ref[p + H + i:p + H + i + 1, p:p + W, :] = \
            y_img[H - 2 - i:H - 1 - i, :, :]
    for j in range(p):                                      # left / right cols
        yp_ref[:, p - 1 - j:p - j, :] = yp_ref[:, p + 1 + j:p + 2 + j, :]
        yp_ref[:, p + W + j:p + W + j + 1, :] = \
            yp_ref[:, p + W - 2 - j:p + W - 1 - j, :]

    # ---- conv2 -> instance norm ----
    z = _conv_same(yp_ref[...], w2_ref, b2_ref, H, W, K)    # (HW, C) f32
    z = _instance_norm(z, s2_ref[...], sh2_ref[...], eps)

    # ---- residual add (f32) ----
    res = xp_f32[p:p + H, p:p + W, :].reshape(H * W, C)
    o_ref[0] = (res + z).astype(o_ref.dtype)


def resnet_block(x, params, *, kernel=3, stride=1, padding=1, eps=1e-9):
    assert stride == 1, "resnet_block in CartoonGAN uses stride 1"
    assert kernel == 2 * padding + 1, "'same' conv requires kernel == 2*pad+1"
    N, C, H, W = x.shape
    p = padding
    Hp, Wp = H + 2 * p, W + 2 * p
    w1, b1, s1, sh1, w2, b2, s2, sh2 = params

    # Wrapper-side layout plumbing (cheap XLA ops, done once):
    x_nhwc = jnp.transpose(x, (0, 2, 3, 1))
    xp = jnp.pad(x_nhwc, ((0, 0), (p, p), (p, p), (0, 0)), mode="reflect")

    def prep_w(w):   # (Co, Ci, K, K) -> (K*K*Ci, Co), bf16 for the MXU
        return (jnp.transpose(w, (2, 3, 1, 0))
                .reshape(kernel * kernel * C, C).astype(jnp.bfloat16))

    def prep_v(v):   # (C,) / (C,1) -> (1, C) f32 (broadcasts along HW)
        return v.reshape(1, C).astype(jnp.float32)

    args = (xp,
            prep_w(w1), prep_v(b1), prep_v(s1), prep_v(sh1),
            prep_w(w2), prep_v(b2), prep_v(s2), prep_v(sh2))

    def const_spec(shape):
        nd = len(shape)
        return pl.BlockSpec(shape, lambda n, _nd=nd: (0,) * _nd)

    kern = partial(resnet_block_kernel, H=H, W=W, K=kernel, padding=p, eps=eps)

    out_flat = pl.pallas_call(
        kern,
        out_shape=jax.ShapeDtypeStruct((N, H * W, C), x.dtype),
        grid=(N,),
        in_specs=[
            pl.BlockSpec((1, Hp, Wp, C), lambda n: (n, 0, 0, 0)),
            const_spec((kernel * kernel * C, C)),
            const_spec((1, C)), const_spec((1, C)), const_spec((1, C)),
            const_spec((kernel * kernel * C, C)),
            const_spec((1, C)), const_spec((1, C)), const_spec((1, C)),
        ],
        out_specs=pl.BlockSpec((1, H * W, C), lambda n: (n, 0, 0)),
        scratch_shapes=[pltpu.VMEM((Hp, Wp, C), jnp.bfloat16)],
        compiler_params=pltpu.CompilerParams(
            dimension_semantics=("parallel",)),
    )(*args)

    return jnp.transpose(out_flat.reshape(N, H, W, C), (0, 3, 1, 2))


def reference(x, params, padding, eps):
    # Pure-JAX f32 reference matching the PyTorch forward pass.
    w1, b1, s1, sh1, w2, b2, s2, sh2 = params

    def conv(x, w, b):
        xp = jnp.pad(x, ((0, 0), (0, 0), (padding, padding), (padding, padding)),
                     mode="reflect")
        y = jax.lax.conv_general_dilated(
            xp, w, (1, 1), "VALID",
            dimension_numbers=("NCHW", "OIHW", "NCHW"),
            precision=jax.lax.Precision.HIGHEST)
        return y + b.reshape(1, -1, 1, 1)

    def inorm(x, scale, shift):
        mean = jnp.mean(x, axis=(2, 3), keepdims=True)
        var = jnp.mean((x - mean) ** 2, axis=(2, 3), keepdims=True)
        return ((x - mean) / jnp.sqrt(var + eps) * scale.reshape(1, -1, 1, 1)
                + shift.reshape(1, -1, 1, 1))

    y = jax.nn.relu(inorm(conv(x, w1, b1), s1, sh1))
    z = inorm(conv(y, w2, b2), s2, sh2)
    return x + z


if __name__ == "__main__":
    # Small shapes consistent with resnet_block(channel, 3, 1, 1); C chosen
    # lane-aligned (128) to exercise the production-style channels-on-lanes
    # layout (CartoonGAN uses C=256).
    N, C, H, W = 2, 128, 16, 16
    K, STRIDE, PAD, EPS = 3, 1, 1, 1e-9

    key = jax.random.PRNGKey(0)
    kx, kw1, kb1, ks1, kw2, kb2, ks2 = jax.random.split(key, 7)

    x = jax.random.normal(kx, (N, C, H, W), jnp.float32)

    # Deterministic synthetic parameters (shapes from the module __init__).
    w1 = 0.1 * jax.random.normal(kw1, (C, C, K, K), jnp.float32)
    b1 = 0.1 * jax.random.normal(kb1, (C,), jnp.float32)
    s1 = jax.random.uniform(ks1, (C,), jnp.float32)          # scale.uniform_()
    sh1 = jnp.zeros((C,), jnp.float32)                       # shift.zero_()
    w2 = 0.1 * jax.random.normal(kw2, (C, C, K, K), jnp.float32)
    b2 = 0.1 * jax.random.normal(kb2, (C,), jnp.float32)
    s2 = jax.random.uniform(ks2, (C,), jnp.float32)
    sh2 = jnp.zeros((C,), jnp.float32)

    params = (w1, b1, s1, sh1, w2, b2, s2, sh2)

    out = resnet_block(x, params, kernel=K, stride=STRIDE, padding=PAD, eps=EPS)
    out = jax.block_until_ready(out)

    ref = jax.block_until_ready(reference(x, params, PAD, EPS))
    # Kernel feeds the MXU bf16 operands (f32 accumulate), so compare against
    # the f32 reference with a bf16-appropriate tolerance.
    np.testing.assert_allclose(np.asarray(out), np.asarray(ref),
                               atol=3e-2, rtol=3e-2)

    print("KERNEL_OK")
</pallas_src>

<mosaic_0001>
module attributes {stable_mosaic.version = 11 : i64} {
  func.func @resnet_block_kernel(%arg0: i32, %arg1: memref<1x18x18x128xf32, #tpu.memory_space<vmem>>, %arg2: memref<1152x128xbf16, #tpu.memory_space<vmem>>, %arg3: memref<1x128xf32, #tpu.memory_space<vmem>>, %arg4: memref<1x128xf32, #tpu.memory_space<vmem>>, %arg5: memref<1x128xf32, #tpu.memory_space<vmem>>, %arg6: memref<1152x128xbf16, #tpu.memory_space<vmem>>, %arg7: memref<1x128xf32, #tpu.memory_space<vmem>>, %arg8: memref<1x128xf32, #tpu.memory_space<vmem>>, %arg9: memref<1x128xf32, #tpu.memory_space<vmem>>, %arg10: memref<1x256x128xf32, #tpu.memory_space<vmem>>, %arg11: memref<18x18x128xbf16, #tpu.memory_space<vmem>>) attributes {dimension_semantics = [#tpu.dimension_semantics<parallel>], iteration_bounds = array<i64: 2>, scalar_prefetch = 0 : i64, scratch_operands = 1 : i64, tpu.core_type = #tpu.core_type<tc>, window_params = [{transform_indices = @transform_0, window_bounds = array<i64: 1, 18, 18, 128>}, {pipeline_mode = #tpu.pipeline_mode<synchronous>, transform_indices = @transform_1, window_bounds = array<i64: 1152, 128>}, {pipeline_mode = #tpu.pipeline_mode<synchronous>, transform_indices = @transform_2, window_bounds = array<i64: 1, 128>}, {pipeline_mode = #tpu.pipeline_mode<synchronous>, transform_indices = @transform_3, window_bounds = array<i64: 1, 128>}, {pipeline_mode = #tpu.pipeline_mode<synchronous>, transform_indices = @transform_4, window_bounds = array<i64: 1, 128>}, {pipeline_mode = #tpu.pipeline_mode<synchronous>, transform_indices = @transform_5, window_bounds = array<i64: 1152, 128>}, {pipeline_mode = #tpu.pipeline_mode<synchronous>, transform_indices = @transform_6, window_bounds = array<i64: 1, 128>}, {pipeline_mode = #tpu.pipeline_mode<synchronous>, transform_indices = @transform_7, window_bounds = array<i64: 1, 128>}, {pipeline_mode = #tpu.pipeline_mode<synchronous>, transform_indices = @transform_8, window_bounds = array<i64: 1, 128>}, {transform_indices = @transform_9, window_bounds = array<i64: 1, 256, 128>}]} {
    %c0 = arith.constant 0 : index
    %c0_0 = arith.constant 0 : index
    %c0_1 = arith.constant 0 : index
    %c0_2 = arith.constant 0 : index
    %0 = vector.load %arg1[%c0, %c0_0, %c0_1, %c0_2] : memref<1x18x18x128xf32, #tpu.memory_space<vmem>>, vector<1x18x18x128xf32>
    %1 = vector.shape_cast %0 : vector<1x18x18x128xf32> to vector<18x18x128xf32>
    %2 = arith.truncf %1 : vector<18x18x128xf32> to vector<18x18x128xbf16>
    %3 = vector.extract_strided_slice %2 {offsets = [0, 0, 0], sizes = [16, 16, 128], strides = [1, 1, 1]} : vector<18x18x128xbf16> to vector<16x16x128xbf16>
    %4 = vector.extract_strided_slice %2 {offsets = [0, 1, 0], sizes = [16, 16, 128], strides = [1, 1, 1]} : vector<18x18x128xbf16> to vector<16x16x128xbf16>
    %5 = vector.extract_strided_slice %2 {offsets = [0, 2, 0], sizes = [16, 16, 128], strides = [1, 1, 1]} : vector<18x18x128xbf16> to vector<16x16x128xbf16>
    %6 = vector.extract_strided_slice %2 {offsets = [1, 0, 0], sizes = [16, 16, 128], strides = [1, 1, 1]} : vector<18x18x128xbf16> to vector<16x16x128xbf16>
    %7 = vector.extract_strided_slice %2 {offsets = [1, 1, 0], sizes = [16, 16, 128], strides = [1, 1, 1]} : vector<18x18x128xbf16> to vector<16x16x128xbf16>
    %8 = vector.extract_strided_slice %2 {offsets = [1, 2, 0], sizes = [16, 16, 128], strides = [1, 1, 1]} : vector<18x18x128xbf16> to vector<16x16x128xbf16>
    %9 = vector.extract_strided_slice %2 {offsets = [2, 0, 0], sizes = [16, 16, 128], strides = [1, 1, 1]} : vector<18x18x128xbf16> to vector<16x16x128xbf16>
    %10 = vector.extract_strided_slice %2 {offsets = [2, 1, 0], sizes = [16, 16, 128], strides = [1, 1, 1]} : vector<18x18x128xbf16> to vector<16x16x128xbf16>
    %11 = vector.extract_strided_slice %2 {offsets = [2, 2, 0], sizes = [16, 16, 128], strides = [1, 1, 1]} : vector<18x18x128xbf16> to vector<16x16x128xbf16>
    %12 = tpu.concatenate %3, %4, %5, %6, %7, %8, %9, %10, %11 in 2 : vector<16x16x128xbf16>, vector<16x16x128xbf16>, vector<16x16x128xbf16>, vector<16x16x128xbf16>, vector<16x16x128xbf16>, vector<16x16x128xbf16>, vector<16x16x128xbf16>, vector<16x16x128xbf16>, vector<16x16x128xbf16> -> vector<16x16x1152xbf16>
    %13 = vector.shape_cast %12 : vector<16x16x1152xbf16> to vector<256x1152xbf16>
    %c0_3 = arith.constant 0 : index
    %c0_4 = arith.constant 0 : index
    %14 = vector.load %arg2[%c0_3, %c0_4] : memref<1152x128xbf16, #tpu.memory_space<vmem>>, vector<1152x128xbf16>
    %cst = arith.constant dense<0.000000e+00> : vector<256x128xf32>
    %15 = tpu.matmul %13, %14, %cst {dimension_numbers = #tpu.dot_dimension_numbers<[1], [0], [0], [1], [0, 0, 1, 1], [], []>} : vector<256x1152xbf16>, vector<1152x128xbf16>, vector<256x128xf32> -> vector<256x128xf32>
    %c0_5 = arith.constant 0 : index
    %c0_6 = arith.constant 0 : index
    %16 = vector.load %arg3[%c0_5, %c0_6] : memref<1x128xf32, #tpu.memory_space<vmem>>, vector<1x128xf32>
    %17 = vector.broadcast %16 : vector<1x128xf32> to vector<256x128xf32>
    %18 = arith.addf %15, %17 : vector<256x128xf32>
    %c0_7 = arith.constant 0 : index
    %c0_8 = arith.constant 0 : index
    %19 = vector.load %arg4[%c0_7, %c0_8] : memref<1x128xf32, #tpu.memory_space<vmem>>, vector<1x128xf32>
    %c0_9 = arith.constant 0 : index
    %c0_10 = arith.constant 0 : index
    %20 = vector.load %arg5[%c0_9, %c0_10] : memref<1x128xf32, #tpu.memory_space<vmem>>, vector<1x128xf32>
    %cst_11 = arith.constant dense<0.000000e+00> : vector<128xf32>
    %21 = vector.multi_reduction <add>, %18, %cst_11 [0] : vector<256x128xf32> to vector<128xf32>
    %22 = vector.shape_cast %21 : vector<128xf32> to vector<1x128xf32>
    %cst_12 = arith.constant 3.906250e-03 : f32
    %23 = vector.broadcast %cst_12 : f32 to vector<1x128xf32>
    %24 = arith.mulf %22, %23 : vector<1x128xf32>
    %25 = arith.mulf %18, %18 : vector<256x128xf32>
    %cst_13 = arith.constant dense<0.000000e+00> : vector<128xf32>
    %26 = vector.multi_reduction <add>, %25, %cst_13 [0] : vector<256x128xf32> to vector<128xf32>
    %27 = vector.shape_cast %26 : vector<128xf32> to vector<1x128xf32>
    %cst_14 = arith.constant 3.906250e-03 : f32
    %28 = vector.broadcast %cst_14 : f32 to vector<1x128xf32>
    %29 = arith.mulf %27, %28 : vector<1x128xf32>
    %30 = arith.mulf %24, %24 : vector<1x128xf32>
    %31 = arith.subf %29, %30 : vector<1x128xf32>
    %cst_15 = arith.constant 0.000000e+00 : f32
    %32 = vector.broadcast %cst_15 : f32 to vector<1x128xf32>
    %33 = arith.maximumf %31, %32 : vector<1x128xf32>
    %34 = vector.broadcast %24 : vector<1x128xf32> to vector<256x128xf32>
    %35 = arith.subf %18, %34 : vector<256x128xf32>
    %cst_16 = arith.constant 9.99999971E-10 : f32
    %36 = vector.broadcast %cst_16 : f32 to vector<1x128xf32>
    %37 = arith.addf %33, %36 : vector<1x128xf32>
    %38 = math.rsqrt %37 : vector<1x128xf32>
    %39 = vector.broadcast %38 : vector<1x128xf32> to vector<256x128xf32>
    %40 = arith.mulf %35, %39 : vector<256x128xf32>
    %41 = vector.broadcast %19 : vector<1x128xf32> to vector<256x128xf32>
    %42 = arith.mulf %40, %41 : vector<256x128xf32>
    %43 = vector.broadcast %20 : vector<1x128xf32> to vector<256x128xf32>
    %44 = arith.addf %42, %43 : vector<256x128xf32>
    %cst_17 = arith.constant 0.000000e+00 : f32
    %45 = vector.broadcast %cst_17 : f32 to vector<256x128xf32>
    %46 = arith.maximumf %44, %45 : vector<256x128xf32>
    %47 = vector.shape_cast %46 : vector<256x128xf32> to vector<16x16x128xf32>
    %48 = arith.truncf %47 : vector<16x16x128xf32> to vector<16x16x128xbf16>
    %c1 = arith.constant 1 : index
    %c1_18 = arith.constant 1 : index
    %c0_19 = arith.constant 0 : index
    %49 = vector.load %arg11[%c1, %c1_18, %c0_19] : memref<18x18x128xbf16, #tpu.memory_space<vmem>>, vector<16x16x128xbf16>
    tpu.vector_store %arg11[%c1, %c1_18, %c0_19], %48 {strides = array<i32>} : memref<18x18x128xbf16, #tpu.memory_space<vmem>>, vector<16x16x128xbf16>,
    %50 = vector.extract_strided_slice %48 {offsets = [1, 0, 0], sizes = [1, 16, 128], strides = [1, 1, 1]} : vector<16x16x128xbf16> to vector<1x16x128xbf16>
    %c0_20 = arith.constant 0 : index
    %c1_21 = arith.constant 1 : index
    %c0_22 = arith.constant 0 : index
    %51 = vector.load %arg11[%c0_20, %c1_21, %c0_22] : memref<18x18x128xbf16, #tpu.memory_space<vmem>>, vector<1x16x128xbf16>
    tpu.vector_store %arg11[%c0_20, %c1_21, %c0_22], %50 {strides = array<i32>} : memref<18x18x128xbf16, #tpu.memory_space<vmem>>, vector<1x16x128xbf16>,
    %52 = vector.extract_strided_slice %48 {offsets = [14, 0, 0], sizes = [1, 16, 128], strides = [1, 1, 1]} : vector<16x16x128xbf16> to vector<1x16x128xbf16>
    %c17 = arith.constant 17 : index
    %c1_23 = arith.constant 1 : index
    %c0_24 = arith.constant 0 : index
    %53 = vector.load %arg11[%c17, %c1_23, %c0_24] : memref<18x18x128xbf16, #tpu.memory_space<vmem>>, vector<1x16x128xbf16>
    tpu.vector_store %arg11[%c17, %c1_23, %c0_24], %52 {strides = array<i32>} : memref<18x18x128xbf16, #tpu.memory_space<vmem>>, vector<1x16x128xbf16>,
    %c0_25 = arith.constant 0 : index
    %c2 = arith.constant 2 : index
    %c0_26 = arith.constant 0 : index
    %54 = vector.load %arg11[%c0_25, %c2, %c0_26] : memref<18x18x128xbf16, #tpu.memory_space<vmem>>, vector<18x1x128xbf16>
    %c0_27 = arith.constant 0 : index
    %c0_28 = arith.constant 0 : index
    %c0_29 = arith.constant 0 : index
    %55 = vector.load %arg11[%c0_27, %c0_28, %c0_29] : memref<18x18x128xbf16, #tpu.memory_space<vmem>>, vector<18x1x128xbf16>
    tpu.vector_store %arg11[%c0_27, %c0_28, %c0_29], %54 {strides = array<i32>} : memref<18x18x128xbf16, #tpu.memory_space<vmem>>, vector<18x1x128xbf16>,
    %c0_30 = arith.constant 0 : index
    %c15 = arith.constant 15 : index
    %c0_31 = arith.constant 0 : index
    %56 = vector.load %arg11[%c0_30, %c15, %c0_31] : memref<18x18x128xbf16, #tpu.memory_space<vmem>>, vector<18x1x128xbf16>
    %c0_32 = arith.constant 0 : index
    %c17_33 = arith.constant 17 : index
    %c0_34 = arith.constant 0 : index
    %57 = vector.load %arg11[%c0_32, %c17_33, %c0_34] : memref<18x18x128xbf16, #tpu.memory_space<vmem>>, vector<18x1x128xbf16>
    tpu.vector_store %arg11[%c0_32, %c17_33, %c0_34], %56 {strides = array<i32>} : memref<18x18x128xbf16, #tpu.memory_space<vmem>>, vector<18x1x128xbf16>,
    %c0_35 = arith.constant 0 : index
    %c0_36 = arith.constant 0 : index
    %c0_37 = arith.constant 0 : index
    %58 = vector.load %arg11[%c0_35, %c0_36, %c0_37] : memref<18x18x128xbf16, #tpu.memory_space<vmem>>, vector<18x18x128xbf16>
    %59 = vector.extract_strided_slice %58 {offsets = [0, 0, 0], sizes = [16, 16, 128], strides = [1, 1, 1]} : vector<18x18x128xbf16> to vector<16x16x128xbf16>
    %60 = vector.extract_strided_slice %58 {offsets = [0, 1, 0], sizes = [16, 16, 128], strides = [1, 1, 1]} : vector<18x18x128xbf16> to vector<16x16x128xbf16>
    %61 = vector.extract_strided_slice %58 {offsets = [0, 2, 0], sizes = [16, 16, 128], strides = [1, 1, 1]} : vector<18x18x128xbf16> to vector<16x16x128xbf16>
    %62 = vector.extract_strided_slice %58 {offsets = [1, 0, 0], sizes = [16, 16, 128], strides = [1, 1, 1]} : vector<18x18x128xbf16> to vector<16x16x128xbf16>
    %63 = vector.extract_strided_slice %58 {offsets = [1, 1, 0], sizes = [16, 16, 128], strides = [1, 1, 1]} : vector<18x18x128xbf16> to vector<16x16x128xbf16>
    %64 = vector.extract_strided_slice %58 {offsets = [1, 2, 0], sizes = [16, 16, 128], strides = [1, 1, 1]} : vector<18x18x128xbf16> to vector<16x16x128xbf16>
    %65 = vector.extract_strided_slice %58 {offsets = [2, 0, 0], sizes = [16, 16, 128], strides = [1, 1, 1]} : vector<18x18x128xbf16> to vector<16x16x128xbf16>
    %66 = vector.extract_strided_slice %58 {offsets = [2, 1, 0], sizes = [16, 16, 128], strides = [1, 1, 1]} : vector<18x18x128xbf16> to vector<16x16x128xbf16>
    %67 = vector.extract_strided_slice %58 {offsets = [2, 2, 0], sizes = [16, 16, 128], strides = [1, 1, 1]} : vector<18x18x128xbf16> to vector<16x16x128xbf16>
    %68 = tpu.concatenate %59, %60, %61, %62, %63, %64, %65, %66, %67 in 2 : vector<16x16x128xbf16>, vector<16x16x128xbf16>, vector<16x16x128xbf16>, vector<16x16x128xbf16>, vector<16x16x128xbf16>, vector<16x16x128xbf16>, vector<16x16x128xbf16>, vector<16x16x128xbf16>, vector<16x16x128xbf16> -> vector<16x16x1152xbf16>
    %69 = vector.shape_cast %68 : vector<16x16x1152xbf16> to vector<256x1152xbf16>
    %c0_38 = arith.constant 0 : index
    %c0_39 = arith.constant 0 : index
    %70 = vector.load %arg6[%c0_38, %c0_39] : memref<1152x128xbf16, #tpu.memory_space<vmem>>, vector<1152x128xbf16>
    %cst_40 = arith.constant dense<0.000000e+00> : vector<256x128xf32>
    %71 = tpu.matmul %69, %70, %cst_40 {dimension_numbers = #tpu.dot_dimension_numbers<[1], [0], [0], [1], [0, 0, 1, 1], [], []>} : vector<256x1152xbf16>, vector<1152x128xbf16>, vector<256x128xf32> -> vector<256x128xf32>
    %c0_41 = arith.constant 0 : index
    %c0_42 = arith.constant 0 : index
    %72 = vector.load %arg7[%c0_41, %c0_42] : memref<1x128xf32, #tpu.memory_space<vmem>>, vector<1x128xf32>
    %73 = vector.broadcast %72 : vector<1x128xf32> to vector<256x128xf32>
    %74 = arith.addf %71, %73 : vector<256x128xf32>
    %c0_43 = arith.constant 0 : index
    %c0_44 = arith.constant 0 : index
    %75 = vector.load %arg8[%c0_43, %c0_44] : memref<1x128xf32, #tpu.memory_space<vmem>>, vector<1x128xf32>
    %c0_45 = arith.constant 0 : index
    %c0_46 = arith.constant 0 : index
    %76 = vector.load %arg9[%c0_45, %c0_46] : memref<1x128xf32, #tpu.memory_space<vmem>>, vector<1x128xf32>
    %cst_47 = arith.constant dense<0.000000e+00> : vector<128xf32>
    %77 = vector.multi_reduction <add>, %74, %cst_47 [0] : vector<256x128xf32> to vector<128xf32>
    %78 = vector.shape_cast %77 : vector<128xf32> to vector<1x128xf32>
    %cst_48 = arith.constant 3.906250e-03 : f32
    %79 = vector.broadcast %cst_48 : f32 to vector<1x128xf32>
    %80 = arith.mulf %78, %79 : vector<1x128xf32>
    %81 = arith.mulf %74, %74 : vector<256x128xf32>
    %cst_49 = arith.constant dense<0.000000e+00> : vector<128xf32>
    %82 = vector.multi_reduction <add>, %81, %cst_49 [0] : vector<256x128xf32> to vector<128xf32>
    %83 = vector.shape_cast %82 : vector<128xf32> to vector<1x128xf32>
    %cst_50 = arith.constant 3.906250e-03 : f32
    %84 = vector.broadcast %cst_50 : f32 to vector<1x128xf32>
    %85 = arith.mulf %83, %84 : vector<1x128xf32>
    %86 = arith.mulf %80, %80 : vector<1x128xf32>
    %87 = arith.subf %85, %86 : vector<1x128xf32>
    %cst_51 = arith.constant 0.000000e+00 : f32
    %88 = vector.broadcast %cst_51 : f32 to vector<1x128xf32>
    %89 = arith.maximumf %87, %88 : vector<1x128xf32>
    %90 = vector.broadcast %80 : vector<1x128xf32> to vector<256x128xf32>
    %91 = arith.subf %74, %90 : vector<256x128xf32>
    %cst_52 = arith.constant 9.99999971E-10 : f32
    %92 = vector.broadcast %cst_52 : f32 to vector<1x128xf32>
    %93 = arith.addf %89, %92 : vector<1x128xf32>
    %94 = math.rsqrt %93 : vector<1x128xf32>
    %95 = vector.broadcast %94 : vector<1x128xf32> to vector<256x128xf32>
    %96 = arith.mulf %91, %95 : vector<256x128xf32>
    %97 = vector.broadcast %75 : vector<1x128xf32> to vector<256x128xf32>
    %98 = arith.mulf %96, %97 : vector<256x128xf32>
    %99 = vector.broadcast %76 : vector<1x128xf32> to vector<256x128xf32>
    %100 = arith.addf %98, %99 : vector<256x128xf32>
    %101 = vector.extract_strided_slice %1 {offsets = [1, 1, 0], sizes = [16, 16, 128], strides = [1, 1, 1]} : vector<18x18x128xf32> to vector<16x16x128xf32>
    %102 = vector.shape_cast %101 : vector<16x16x128xf32> to vector<256x128xf32>
    %103 = arith.addf %102, %100 : vector<256x128xf32>
    %c0_53 = arith.constant 0 : index
    %c0_54 = arith.constant 0 : index
    %c0_55 = arith.constant 0 : index
    %104 = vector.load %arg10[%c0_53, %c0_54, %c0_55] : memref<1x256x128xf32, #tpu.memory_space<vmem>>, vector<1x256x128xf32>
    %105 = vector.shape_cast %104 : vector<1x256x128xf32> to vector<256x128xf32>
    %106 = vector.shape_cast %103 : vector<256x128xf32> to vector<1x256x128xf32>
    tpu.vector_store %arg10[%c0_53, %c0_54, %c0_55], %106 {strides = array<i32>} : memref<1x256x128xf32, #tpu.memory_space<vmem>>, vector<1x256x128xf32>,
    return
  }
  func.func @transform_0(%arg0: i32) -> (i32, i32, i32, i32) {
    %c0_i32 = arith.constant 0 : i32
    %c0_i32_0 = arith.constant 0 : i32
    %c0_i32_1 = arith.constant 0 : i32
    %c0_i32_2 = arith.constant 0 : i32
    return %arg0, %c0_i32, %c0_i32_0, %c0_i32_1 : i32, i32, i32, i32
  }
  func.func @transform_1(%arg0: i32) -> (i32, i32) {
    %c0_i32 = arith.constant 0 : i32
    %c0_i32_0 = arith.constant 0 : i32
    %c0_i32_1 = arith.constant 0 : i32
    return %c0_i32, %c0_i32_0 : i32, i32
  }
  func.func @transform_2(%arg0: i32) -> (i32, i32) {
    %c0_i32 = arith.constant 0 : i32
    %c0_i32_0 = arith.constant 0 : i32
    %c0_i32_1 = arith.constant 0 : i32
    return %c0_i32, %c0_i32_0 : i32, i32
  }
  func.func @transform_3(%arg0: i32) -> (i32, i32) {
    %c0_i32 = arith.constant 0 : i32
    %c0_i32_0 = arith.constant 0 : i32
    %c0_i32_1 = arith.constant 0 : i32
    return %c0_i32, %c0_i32_0 : i32, i32
  }
  func.func @transform_4(%arg0: i32) -> (i32, i32) {
    %c0_i32 = arith.constant 0 : i32
    %c0_i32_0 = arith.constant 0 : i32
    %c0_i32_1 = arith.constant 0 : i32
    return %c0_i32, %c0_i32_0 : i32, i32
  }
  func.func @transform_5(%arg0: i32) -> (i32, i32) {
    %c0_i32 = arith.constant 0 : i32
    %c0_i32_0 = arith.constant 0 : i32
    %c0_i32_1 = arith.constant 0 : i32
    return %c0_i32, %c0_i32_0 : i32, i32
  }
  func.func @transform_6(%arg0: i32) -> (i32, i32) {
    %c0_i32 = arith.constant 0 : i32
    %c0_i32_0 = arith.constant 0 : i32
    %c0_i32_1 = arith.constant 0 : i32
    return %c0_i32, %c0_i32_0 : i32, i32
  }
  func.func @transform_7(%arg0: i32) -> (i32, i32) {
    %c0_i32 = arith.constant 0 : i32
    %c0_i32_0 = arith.constant 0 : i32
    %c0_i32_1 = arith.constant 0 : i32
    return %c0_i32, %c0_i32_0 : i32, i32
  }
  func.func @transform_8(%arg0: i32) -> (i32, i32) {
    %c0_i32 = arith.constant 0 : i32
    %c0_i32_0 = arith.constant 0 : i32
    %c0_i32_1 = arith.constant 0 : i32
    return %c0_i32, %c0_i32_0 : i32, i32
  }
  func.func @transform_9(%arg0: i32) -> (i32, i32, i32) {
    %c0_i32 = arith.constant 0 : i32
    %c0_i32_0 = arith.constant 0 : i32
    %c0_i32_1 = arith.constant 0 : i32
    return %arg0, %c0_i32, %c0_i32_0 : i32, i32, i32
  }
}

</mosaic_0001>

<bundles_post_ra>
// kernel: tpu_custom_call.1
= control target key start
LH: loop header
LB: loop body
LE: loop exit
PB: predicated region body
PF: predicated region fallthrough
CT: control target
= control target key end

     0   :  { %14 = vsyncpa [#allocation4], 0  ;;  %s10931_s0 = inlined_call_operand.vmem [shape: f32[2,18,18,128], index: 0, kind: input, shape index: {}]   ;;  %s10932_s1 = inlined_call_operand.vmem [shape: bf16[1152,128], index: 1, kind: input, shape index: {}]   ;;  %s10933_s2 = inlined_call_operand.vmem [shape: f32[1,128], index: 2, kind: input, shape index: {}]   ;;  %s10934_s3 = inlined_call_operand.vmem [shape: f32[1,128], index: 3, kind: input, shape index: {}]   ;;  %s10935_s4 = inlined_call_operand.vmem [shape: f32[1,128], index: 4, kind: input, shape index: {}]   ;;  %s10936_s5 = inlined_call_operand.vmem [shape: bf16[1152,128], index: 5, kind: input, shape index: {}]   ;;  %s10937_s6 = inlined_call_operand.vmem [shape: f32[1,128], index: 6, kind: input, shape index: {}]   ;;  %s10938_s7 = inlined_call_operand.vmem [shape: f32[1,128], index: 7, kind: input, shape index: {}]   ;;  %s10939_s8 = inlined_call_operand.vmem [shape: f32[1,128], index: 8, kind: input, shape index: {}]   ;;  %s10940_s9 = inlined_call_operand.hbm [shape: f32[2,256,128], index: 9, kind: output, shape index: {}]  }
   0x1   :  { %16 = vsyncpa [#allocation4 + $0x1], 0  ;;  %s7477_s30 = smov 0   ;;  %s7479_s10 = smov 0  }
   0x2   :  { %s7481_s11 = smov 0   ;;  %s7483_s12 = smov 0  }
   0x3 LB: > { %s7498_s13 = sadd.s32 4294967295, %s7422_s12   ;;  %s5748_s14 = sadd.s32 4294967294, %s7422_s12   ;;  %s7422_s12 = sphi %s7483_s12, %s11074_s12   ;;  %s7418_s11 = sphi %s7481_s11, %s11073_s11   ;;  %s7414_s10 = sphi %s7479_s10, %s11072_s10   ;;  %s7410_s30 = sphi %s7477_s30, %s11071_s30  }
   0x4   : > { %s7502_s15 = sadd.s32 1, %s7422_s12   ;;  %s223_s16 = sadd.s32 1, %s7418_s11 }
   0x5   : > { %s220_s17 = ssub.s32 %s7422_s12, %s7502_s15  ;;  %p233_p0 = scmp.ne.s32.totalorder %s7418_s11, %s7414_s10 }
   0x6   : > { %p221_p1 = scmp.eq.s32.totalorder %s220_s17, 0  ;;  %p234_p2 = scmp.eq.s32.totalorder %s7498_s13, 1 }
   0x7   : > { %p239_p3 = scmp.ne.s32.totalorder %s7414_s10, %s7410_s30  ;;  %p240_p4 = scmp.eq.s32.totalorder %s5748_s14, 1 }
   0x8   : > { %s7513_s18 = scalar_select %p221_p1, %s7418_s11, %s223_s16  }
   0x9   : > { %p7515_p5 = por %p234_p2, %p233_p0  ;;  %p7519_p6 = por %p240_p4, %p239_p3 }
   0xa   : > { %p5751_p7 = scmp.ge.s32.totalorder %s7422_s12, 1  ;;  %p290_p8 = scmp.lt.s32.totalorder %s7422_s12, 3 }
   0xc   : > { %p291_p9 = pnand %p5751_p7, %p290_p8 }
   0xe   : > { %294 = sbr.rel (%p291_p9) target bundleno = 1404 (0x57c), region = 56 }
  0x15   : > { %v7128_v0 = vld [vmem:[%s10932_s1 + $0x40] sm:$0xff]   ;;  %v7132_v4 = vld [vmem:[%s10932_s1 + $0x48] sm:$0xff]   ;;  %v7136_v8 = vld [vmem:[%s10932_s1 + $0x50] sm:$0xff]   ;;  %p326_p10 = scmp.lt.s32.totalorder %s7498_s13, 1  ;;  %vm663_vm0 = vcmask 1046528   ;;  %vm2868_vm2 = vcmask 1040384  }
  0x16   : > { %v7129_v1 = vld [vmem:[%s10932_s1] sm:$0xff]   ;;  %6046 = vmatprep.subr.bf16.mxu0 %v7128_v0  ;;  %v7133_v5 = vld [vmem:[%s10932_s1 + $0x8] sm:$0xff]   ;;  %v7137_v9 = vld [vmem:[%s10932_s1 + $0x10] sm:$0xff]   ;;  %vm422_vm1 = vsmask.f32 7424  ;;  %vm2861_vm9 = vcmask 1043456  }
  0x17   : > { %v7130_v2 = vld [vmem:[%s10932_s1 + $0xc0] sm:$0xff]   ;;  %6047 = vmatpush3.bf16.msra.mxu0 %v7129_v1  ;;  %v7134_v6 = vld [vmem:[%s10932_s1 + $0xc8] sm:$0xff]   ;;  %v7138_v10 = vld [vmem:[%s10932_s1 + $0xd0] sm:$0xff]   ;;  %s327_s27 = scalar_select %p326_p10, %s7498_s13, 1  ;;  %vm2537_vm3 = vsmask.f32 256 }
  0x18   : > { %v7131_v3 = vld [vmem:[%s10932_s1 + $0x80] sm:$0xff]   ;;  %6158 = vmatprep.subr.bf16.mxu1 %v7130_v2  ;;  %6048 = vmatprep.subr.bf16.mxu0 %v7132_v4  ;;  %v7135_v7 = vld [vmem:[%s10932_s1 + $0x88] sm:$0xff]   ;;  %v7139_v11 = vld [vmem:[%s10932_s1 + $0x90] sm:$0xff]   ;;  %vm2538_vm4 = vsmask.f32 4368  ;;  %s6045_s28 = sshll.u32 %s7498_s13, 12 }
  0x19   : > { %6159 = vmatpush3.bf16.msra.mxu1 %v7131_v3  ;;  %v7140_v12 = vld [vmem:[%s10932_s1 + $0x58] sm:$0xff]   ;;  %v7144_v16 = vld [vmem:[%s10932_s1 + $0x60] sm:$0xff]   ;;  %v7148_v20 = vld [vmem:[%s10932_s1 + $0x68] sm:$0xff]   ;;  %s7086_s24 = smul.u32 432, %s327_s27  ;;  %vm2862_vm7 = vsmask.f32 7938  ;;  %s10868_s14 = scalar_lea.hbm %s10940_s9, %s6045_s28 }
  0x1a   : > { %6160 = vmatprep.subr.bf16.mxu1 %v7134_v6  ;;  %v7141_v13 = vld [vmem:[%s10932_s1 + $0x18] sm:$0xff]   ;;  %v7145_v17 = vld [vmem:[%s10932_s1 + $0x20] sm:$0xff]   ;;  %v7149_v21 = vld [vmem:[%s10932_s1 + $0x28] sm:$0xff]   ;;  %s7424_s21 = smov [#allocation3]  }
  0x1b   : > { %6049 = vmatpush3.bf16.msra.mxu0 %v7133_v5  ;;  %v7142_v14 = vld [vmem:[%s10932_s1 + $0xd8] sm:$0xff]   ;;  %v7146_v18 = vld [vmem:[%s10932_s1 + $0xe0] sm:$0xff]   ;;  %v7150_v22 = vld [vmem:[%s10932_s1 + $0xe8] sm:$0xff]   ;;  %s7617_s23 = scalar_lea.vmem %s10931_s0, %s7086_s24  ;;  %s7364_s27 = sshll.u32 %s7424_s21, 4  ;;  %s7365_s27 = int_to_ptr.vmem [resolvable:$false] %s7364_s27 }
  0x1c   : > { %6050 = vmatprep.subr.bf16.mxu0 %v7136_v8  ;;  %v7143_v15 = vld [vmem:[%s10932_s1 + $0x98] sm:$0xff]   ;;  %v7147_v19 = vld [vmem:[%s10932_s1 + $0xa0] sm:$0xff]   ;;  %v7151_v23 = vld [vmem:[%s10932_s1 + $0xa8] sm:$0xff]   ;;  %s7366_s22 = scalar_lea.vmem %s7365_s27, 8192 }
  0x1d   : > { %6161 = vmatpush3.bf16.msra.mxu1 %v7135_v7  ;;  %v7152_v24 = vld [vmem:[%s10932_s1 + $0x70] sm:$0xff]   ;;  %v7156_v28 = vld [vmem:[%s10932_s1 + $0x78] sm:$0xff]   ;;  %v332_v31 = vld [vmem:[%s7617_s23] sm:$0xff] }
  0x1e   : > { %6162 = vmatprep.subr.bf16.mxu1 %v7138_v10  ;;  %v7153_v25 = vld [vmem:[%s10932_s1 + $0x30] sm:$0xff]   ;;  %v7157_v29 = vld [vmem:[%s10932_s1 + $0x38] sm:$0xff]   ;;  %v333_v32 = vld [vmem:[%s7617_s23 + $0x8] sm:$0xff] }
  0x1f   : > { %6051 = vmatpush3.bf16.msra.mxu0 %v7137_v9  ;;  %v7154_v26 = vld [vmem:[%s10932_s1 + $0xf0] sm:$0xff]   ;;  %v7158_v30 = vld [vmem:[%s10932_s1 + $0xf8] sm:$0xff]   ;;  %v386_v34 = vpack.c.bf16 %v333_v32, %v332_v31  ;;  %v7160_v37 = vld [vmem:[%s10932_s1 + $0x140] sm:$0xff]  }
  0x20   : > { %6052 = vmatprep.subr.bf16.mxu0 %v7140_v12  ;;  %v7155_v27 = vld [vmem:[%s10932_s1 + $0xb0] sm:$0xff]   ;;  %v7159_v36 = vld [vmem:[%s10932_s1 + $0xb8] sm:$0xff]   ;;  %v336_v42 = vld [vmem:[%s7617_s23 + $0x20] sm:$0xff] }
  0x21   : > { %6163 = vmatpush3.bf16.msra.mxu1 %v7139_v11  ;;  %v334_v33 = vld [vmem:[%s7617_s23 + $0x10] sm:$0x3]  ;;  %v424_v38 = vshrl.u32 %v386_v34, 16  ;;  %v426_v39 = vshll.u32 %v386_v34, 16  ;;  %v335_v41 = vld [vmem:[%s7617_s23 + $0x18] sm:$0xff]  ;;  %v664_v46 = vrot.slane %v386_v34, 1  ;;  %vm8904_vm5 = vmand %vm2868_vm2, %vm2537_vm3 }
  0x22   : > { %6164 = vmatprep.subr.bf16.mxu1 %v7142_v14  ;;  %v387_v35 = vpack.c.bf16 %v334_v33, %v334_v33  ;;  %v7636_v43 = vpack.c.bf16 %v336_v42, %v335_v41  ;;  %v337_v48 = vld [vmem:[%s7617_s23 + $0x28] sm:$0x3]  ;;  %v7161_v49 = vld [vmem:[%s10932_s1 + $0x100] sm:$0xff]   ;;  %v338_v53 = vld [vmem:[%s7617_s23 + $0x30] sm:$0xff] }
  0x23   : > { %6053 = vmatpush3.bf16.msra.mxu0 %v7141_v13  ;;  %v428_v44 = vrot.slane %v426_v39, 1  ;;  %v389_v50 = vpack.c.bf16 %v337_v48, %v337_v48  ;;  %v339_v54 = vld [vmem:[%s7617_s23 + $0x38] sm:$0xff]  ;;  %v340_v59 = vld [vmem:[%s7617_s23 + $0x40] sm:$0x3]  ;;  %v341_v60 = vld [vmem:[%s7617_s23 + $0x48] sm:$0xff] }
  0x24   : > { %6054 = vmatprep.subr.bf16.mxu0 %v7144_v16  ;;  %v431_v40 = vshll.u32 %v387_v35, 16  ;;  %v665_v47 = vrot.slane %v387_v35, 1  ;;  %1542 = vmatprep.mubr.bf16.mxu1 %v7636_v43  ;;  %v436_v51 = vshrl.u32 %v7636_v43, 16  ;;  %v438_v52 = vshll.u32 %v7636_v43, 16  ;;  %v342_v1 = vld [vmem:[%s7617_s23 + $0x50] sm:$0xff]  ;;  %v7162_v5 = vld [vmem:[%s10932_s1 + $0x148] sm:$0xff]   ;;  %vm8914_vm6 = vmor %vm2537_vm3, %vm2538_vm4 }
  0x25   : > { %6165 = vmatpush3.bf16.msra.mxu1 %v7143_v15  ;;  %v429_v55 = vor.u32 %v428_v44, %v424_v38  ;;  %v7648_v57 = vpack.c.bf16 %v339_v54, %v338_v53  ;;  %v667_v58 = vrot.slane %v7636_v43, 1  ;;  %v443_v62 = vshll.u32 %v389_v50, 16  ;;  %v343_v9 = vld [vmem:[%s7617_s23 + $0x58] sm:$0x3]  ;;  %v7163_v14 = vld [vmem:[%s10932_s1 + $0x108] sm:$0xff]   ;;  %v7169_v41 = vld [vmem:[%s10932_s1 + $0x1c0] sm:$0xff]  }
  0x26   : > { %6166 = vmatprep.subr.bf16.mxu1 %v7146_v18  ;;  %v433_v45 = vrot.slane %v431_v40, 1  ;;  %v666_v56 = vsel %vm663_vm0, %v664_v46, %v665_v47  ;;  %v440_v61 = vrot.slane %v438_v52, 1  ;;  %v668_v63 = vrot.slane %v389_v50, 1  ;;  %v346_v31 = vld [vmem:[%s7617_s23 + $0x70] sm:$0x3]  ;;  %v347_v32 = vld [vmem:[%s7617_s23 + $0x78] sm:$0xff]  ;;  %vm8993_vm8 = vmand %vm2868_vm2, %vm2862_vm7 }
  0x27   : > { %6055 = vmatpush3.bf16.msra.mxu0 %v7145_v17  ;;  %v391_v0 = vpack.c.bf16 %v340_v59, %v340_v59  ;;  %v448_v3 = vshrl.u32 %v7648_v57, 16  ;;  %v450_v4 = vshll.u32 %v7648_v57, 16  ;;  %v445_v7 = vrot.slane %v443_v62, 1  ;;  %v7167_v35 = vld [vmem:[%s10932_s1 + $0x118] sm:$0xff]   ;;  %v7168_v40 = vld [vmem:[%s10932_s1 + $0x160] sm:$0xff]   ;;  %v350_v46 = vld [vmem:[%s7617_s23 + $0x90] sm:$0xff] }
  0x28   : > { %6056 = vmatprep.subr.bf16.mxu0 %v7148_v20  ;;  %v434_v2 = vsel %vm422_vm1, %v429_v55, %v433_v45  ;;  %v441_v6 = vor.u32 %v440_v61, %v436_v51  ;;  %v7662_v11 = vpack.c.bf16 %v342_v1, %v341_v60  ;;  %v7668_v13 = vsel %vm663_vm0, %v667_v58, %v668_v63  ;;  %v344_v20 = vld [vmem:[%s7617_s23 + $0x60] sm:$0xff]  ;;  %v351_v47 = vld [vmem:[%s7617_s23 + $0x98] sm:$0xff]  ;;  %v354_v1 = vld [vmem:[%s7617_s23 + $0xb0] sm:$0xff] }
  0x29   : > { %6167 = vmatpush3.bf16.msra.mxu1 %v7147_v19  ;;  %1381 = vmatprep.mubr.bf16.mxu0 %v434_v2  ;;  %v455_v8 = vshll.u32 %v391_v0, 16  ;;  %v452_v10 = vrot.slane %v450_v4, 1  ;;  %v393_v17 = vpack.c.bf16 %v343_v9, %v343_v9  ;;  %v7164_v19 = vld [vmem:[%s10932_s1 + $0x150] sm:$0xff]   ;;  %v7706_v38 = vpack.c.bf16 %v346_v31, %v346_v31  ;;  %v7170_v52 = vld [vmem:[%s10932_s1 + $0x120] sm:$0xff]   ;;  %v7172_v2 = vld [vmem:[%s10932_s1 + $0x168] sm:$0xff]  }
  0x2a   : > { %6168 = vmatprep.subr.bf16.mxu1 %v7150_v22  ;;  %v7665_v12 = vsel %vm422_vm1, %v441_v6, %v445_v7  ;;  %v462_v18 = vshll.u32 %v7662_v11, 16  ;;  %v670_v22 = vrot.slane %v7648_v57, 1  ;;  %v673_v44 = vrot.slane %v7662_v11, 1  ;;  %v352_v54 = vld [vmem:[%s7617_s23 + $0xa0] sm:$0x3]  ;;  %v7173_v9 = vld [vmem:[%s10932_s1 + $0x1c8] sm:$0xff]   ;;  %vm9268_vm10 = vmand %vm2861_vm9, %vm2862_vm7 }
  0x2b   : > { %6057 = vmatpush3.bf16.msra.mxu0 %v7149_v21  ;;  %v453_v15 = vor.u32 %v452_v10, %v448_v3  ;;  %v457_v16 = vrot.slane %v455_v8, 1  ;;  %v345_v21 = vld [vmem:[%s7617_s23 + $0x68] sm:$0xff]  ;;  %v674_v45 = vrot.slane %v393_v17, 1  ;;  %v479_v51 = vshll.u32 %v7706_v38, 16  ;;  %v7171_v58 = vld [vmem:[%s10932_s1 + $0x180] sm:$0xff]  }
  0x2c   : > { %6058 = vmatprep.subr.bf16.mxu0 %v7152_v24  ;;  %v460_v24 = vshrl.u32 %v7662_v11, 16  ;;  %v7746_v63 = vpack.c.bf16 %v352_v54, %v352_v54  ;;  %v355_v4 = vld [vmem:[%s7617_s23 + $0xb8] sm:$0x3]  ;;  %v357_v8 = vld [vmem:[%s7617_s23 + $0xc8] sm:$0xff]  ;;  %v360_v31 = vld [vmem:[%s7617_s23 + $0xe0] sm:$0xff] }
  0x2d   : > { %6169 = vmatpush3.bf16.msra.mxu1 %v7151_v23  ;;  %v671_v23 = vrot.slane %v391_v0, 1  ;;  %v7743_v59 = vsel %vm663_vm0, %v673_v44, %v674_v45  ;;  %v481_v61 = vrot.slane %v479_v51, 1  ;;  %v353_v0 = vld [vmem:[%s7617_s23 + $0xa8] sm:$0xff]  ;;  %v7176_v44 = vld [vmem:[%s10932_s1 + $0x170] sm:$0xff]  }
  0x2e   : > { %6170 = vmatprep.subr.bf16.mxu1 %v7154_v26  ;;  %v7687_v26 = vsel %vm422_vm1, %v453_v15, %v457_v16  ;;  %v7764_v15 = vpack.c.bf16 %v354_v1, %v353_v0  ;;  %v358_v16 = vld [vmem:[%s7617_s23 + $0xd0] sm:$0x3] }
  0x2f   : > { %6059 = vmatpush3.bf16.msra.mxu0 %v7153_v25  ;;  %v7165_v25 = vld [vmem:[%s10932_s1 + $0x110] sm:$0xff]   ;;  %v7700_v33 = vsel %vm663_vm0, %v670_v22, %v671_v23 }
  0x30   : > { %6060 = vmatprep.subr.bf16.mxu0 %v7156_v28  ;;  %v467_v28 = vshll.u32 %v393_v17, 16  ;;  %v685_v45 = vrot.slane %v7764_v15, 1 }
  0x31   : > { %6171 = vmatpush3.bf16.msra.mxu1 %v7155_v27  ;;  %v464_v27 = vrot.slane %v462_v18, 1 }
  0x32   : > { %6172 = vmatprep.subr.bf16.mxu1 %v7158_v30  ;;  %v7166_v30 = vld [vmem:[%s10932_s1 + $0x158] sm:$0xff]  }
  0x33   : > { %6061 = vmatpush3.bf16.msra.mxu0 %v7157_v29  ;;  %v7690_v29 = vpack.c.bf16 %v345_v21, %v344_v20  ;;  %v7773_v20 = vpack.c.bf16 %v355_v4, %v355_v4 }
  0x34   : > { %6270 = vmatprep.subr.bf16.mxu0 %v7160_v37  ;;  %v469_v37 = vrot.slane %v467_v28, 1 }
  0x35   : > { %6173 = vmatpush3.bf16.msra.mxu1 %v7159_v36  ;;  %v465_v36 = vor.u32 %v464_v27, %v460_v24  ;;  %v474_v39 = vshll.u32 %v7690_v29, 16  ;;  %v676_v10 = vrot.slane %v7690_v29, 1  ;;  %v359_v24 = vld [vmem:[%s7617_s23 + $0xd8] sm:$0xff]  ;;  %v686_v54 = vrot.slane %v7773_v20, 1 }
  0x36   : > { %1382 = vmatmul.mubr.bf16.vlgmr.msra.gmra.mrb[0].mxu0 %v386_v34  ;;  %v348_v34 = vld [vmem:[%s7617_s23 + $0x80] sm:$0xff]  ;;  %6382 = vmatprep.subr.bf16.mxu1 %v7169_v41  ;;  %v515_v41 = vshll.u32 %v7773_v20, 16 }
  0x37   : > { %6271 = vmatpush3.bf16.msra.mxu0 %v7161_v49  ;;  %1389 = vmatprep.mubr.bf16.mxu0 %v7665_v12  ;;  %v7715_v42 = vpack.c.bf16 %v348_v34, %v347_v32  ;;  %v7723_v48 = vsel %vm422_vm1, %v465_v36, %v469_v37  ;;  %v472_v49 = vshrl.u32 %v7690_v29, 16  ;;  %v476_v50 = vrot.slane %v474_v39, 1  ;;  %v7175_v32 = vld [vmem:[%s10932_s1 + $0x188] sm:$0xff]  }
  0x38   : > { %1543 = vmatmul.mubr.bf16.vlgmr.msra.gmra.mrb[0].mxu1 %v666_v56  ;;  %6272 = vmatprep.subr.bf16.mxu0 %v7162_v5  ;;  %v7736_v56 = vpack.c.bf16 %v351_v47, %v350_v46  ;;  %v356_v5 = vld [vmem:[%s7617_s23 + $0xc0] sm:$0xff]  ;;  %v510_v36 = vshll.u32 %v7764_v15, 16  ;;  %v7792_v37 = vpack.c.bf16 %v358_v16, %v358_v16  ;;  %v7807_v47 = vpack.c.bf16 %v360_v31, %v359_v24  ;;  %v367_v16 = vld [vmem:[%s7617_s23 + $0x118] sm:$0x3]  ;;  %v370_v31 = vld [vmem:[%s7617_s23 + $0x130] sm:$0x3] }
  0x39   : > { %1550 = vmatprep.mubr.bf16.mxu1 %v7648_v57  ;;  %v486_v55 = vshll.u32 %v7715_v42, 16  ;;  %v477_v60 = vor.u32 %v476_v50, %v472_v49  ;;  %v484_v62 = vshrl.u32 %v7715_v42, 16  ;;  %6383 = vmatpush3.bf16.msra.mxu1 %v7171_v58  ;;  %v679_v18 = vrot.slane %v7715_v42, 1  ;;  %v362_v49 = vld [vmem:[%s7617_s23 + $0xf0] sm:$0xff]  ;;  %v363_v50 = vld [vmem:[%s7617_s23 + $0xf8] sm:$0xff] }
  0x3a   : > { %v498_v7 = vshll.u32 %v7736_v56, 16  ;;  %6384 = vmatprep.subr.bf16.mxu1 %v7173_v9  ;;  %v7776_v23 = vpack.c.bf16 %v357_v8, %v356_v5  ;;  %v496_v28 = vshrl.u32 %v7736_v56, 16  ;;  %v682_v34 = vrot.slane %v7736_v56, 1  ;;  %v7179_v9 = vld [vmem:[%s10932_s1 + $0x190] sm:$0xff]  }
  0x3b   : > { %6273 = vmatpush3.bf16.msra.mxu0 %v7163_v14  ;;  %v488_v6 = vrot.slane %v486_v55, 1  ;;  %v677_v14 = vrot.slane %v7706_v38, 1  ;;  %v7768_v17 = vsel %vm422_vm1, %v477_v60, %v481_v61  ;;  %v527_v55 = vshll.u32 %v7792_v37, 16  ;;  %v7177_v60 = vld [vmem:[%s10932_s1 + $0x1d0] sm:$0xff]  }
  0x3c   : > { %6274 = vmatprep.subr.bf16.mxu0 %v7164_v19  ;;  %v503_v19 = vshll.u32 %v7746_v63, 16  ;;  %v522_v46 = vshll.u32 %v7776_v23, 16  ;;  %v7826_v61 = vrot.slane %v515_v41, 1  ;;  %v688_v0 = vrot.slane %v7776_v23, 1 }
  0x3d   : > { %v489_v27 = vor.u32 %v488_v6, %v484_v62  ;;  %v7795_v38 = vsel %vm663_vm0, %v676_v10, %v677_v14  ;;  %6385 = vmatpush3.bf16.msra.mxu1 %v7175_v32  ;;  %v520_v62 = vshrl.u32 %v7776_v23, 16  ;;  %v7830_v1 = vpack.c.bf16 %v363_v50, %v362_v49  ;;  %v366_v6 = vld [vmem:[%s7617_s23 + $0x110] sm:$0xff]  ;;  %v7180_v32 = vld [vmem:[%s10932_s1 + $0x1d8] sm:$0xff]  }
  0x3e   : > { %1390 = vmatmul.mubr.bf16.gmra.mrb[4].mxu0 %v7636_v43  ;;  %v349_v43 = vld [vmem:[%s7617_s23 + $0x88] sm:$0x3]  ;;  %v7797_v39 = vrot.slane %v503_v19, 1  ;;  %v534_v4 = vshll.u32 %v7807_v47, 16  ;;  %6386 = vmatprep.subr.bf16.mxu1 %v7177_v60  ;;  %v689_v8 = vrot.slane %v7792_v37, 1  ;;  %v7848_v10 = vrot.slane %v527_v55, 1 }
  0x3f   : > { %1397 = vmatprep.mubr.bf16.mxu0 %v7687_v26  ;;  %6275 = vmatpush3.bf16.msra.mxu0 %v7165_v25  ;;  %v7731_v53 = vpack.c.bf16 %v349_v43, %v349_v43  ;;  %v7174_v25 = vld [vmem:[%s10932_s1 + $0x128] sm:$0xff]   ;;  %v368_v19 = vld [vmem:[%s7617_s23 + $0x120] sm:$0xff]  ;;  %v544_v50 = vshrl.u32 %v7830_v1, 16 }
  0x40   : > { %1551 = vmatmul.mubr.bf16.gmra.mrb[4].mxu1 %v7668_v13  ;;  %6276 = vmatprep.subr.bf16.mxu0 %v7166_v30  ;;  %v500_v30 = vrot.slane %v498_v7, 1  ;;  %v361_v43 = vld [vmem:[%s7617_s23 + $0xe8] sm:$0x3]  ;;  %v7178_v7 = vld [vmem:[%s10932_s1 + $0x130] sm:$0xff]   ;;  %v7865_v41 = vrot.slane %v534_v4, 1  ;;  %v7995_v4 = vld [vmem:[%s10932_s1 + $0x200] sm:$0xff]  }
  0x41   : > { %1558 = vmatprep.mubr.bf16.mxu1 %v7662_v11  ;;  %v491_v3 = vshll.u32 %v7731_v53, 16  ;;  %v680_v22 = vrot.slane %v7731_v53, 1  ;;  %v7816_v53 = vrot.slane %v510_v36, 1  ;;  %v7820_v58 = vpack.c.bf16 %v361_v43, %v361_v43  ;;  %6387 = vmatpush3.bf16.msra.mxu1 %v7179_v9 }
  0x42   : > { %v532_v36 = vshrl.u32 %v7807_v47, 16  ;;  %6388 = vmatprep.subr.bf16.mxu1 %v7180_v32  ;;  %v7185_v32 = vld [vmem:[%s10932_s1 + $0x1a0] sm:$0xff]  }
  0x43   : > { %6277 = vmatpush3.bf16.msra.mxu0 %v7167_v35  ;;  %v493_v21 = vrot.slane %v491_v3, 1  ;;  %v683_v35 = vrot.slane %v7746_v63, 1  ;;  %v7833_v3 = vrot.slane %v522_v46, 1  ;;  %v539_v14 = vshll.u32 %v7820_v58, 16  ;;  %v7181_v46 = vld [vmem:[%s10932_s1 + $0x198] sm:$0xff]   ;;  %v7186_v63 = vld [vmem:[%s10932_s1 + $0x1e8] sm:$0xff]  }
  0x44   : > { %6278 = vmatprep.subr.bf16.mxu0 %v7168_v40  ;;  %v508_v40 = vshrl.u32 %v7764_v15, 16  ;;  %v7857_v24 = vsel %vm663_vm0, %v679_v18, %v680_v22  ;;  %v691_v18 = vrot.slane %v7807_v47, 1  ;;  %v692_v22 = vrot.slane %v7820_v58, 1 }
  0x45   : > { %v7812_v51 = vsel %vm422_vm1, %v489_v27, %v493_v21  ;;  %v369_v21 = vld [vmem:[%s7617_s23 + $0x128] sm:$0xff]  ;;  %v546_v27 = vshll.u32 %v7830_v1, 16  ;;  %v7880_v49 = vrot.slane %v539_v14, 1  ;;  %6389 = vmatpush3.bf16.msra.mxu1 %v7181_v46  ;;  %v371_v14 = vld [vmem:[%s7617_s23 + $0x138] sm:$0xff] }
  0x46   : > { %1398 = vmatmul.mubr.bf16.gmra.mrb[8].mxu0 %v7648_v57  ;;  %v513_v46 = vor.u32 %v7816_v53, %v508_v40 }
  0x47   : > { %1405 = vmatprep.mubr.bf16.mxu0 %v7723_v48  ;;  %6279 = vmatpush3.bf16.msra.mxu0 %v7170_v52  ;;  %v364_v52 = vld [vmem:[%s7617_s23 + $0x100] sm:$0x3]  ;;  %v7890_v60 = vrot.slane %v546_v27, 1 }
  0x48   : > { %1559 = vmatmul.mubr.bf16.gmra.mrb[8].mxu1 %v7700_v33  ;;  %6280 = vmatprep.subr.bf16.mxu0 %v7172_v2  ;;  %v365_v2 = vld [vmem:[%s7617_s23 + $0x108] sm:$0xff]  ;;  %v7836_v5 = vpack.c.bf16 %v364_v52, %v364_v52  ;;  %v7883_v52 = vpack.c.bf16 %v370_v31, %v370_v31  ;;  %v7184_v27 = vld [vmem:[%s10932_s1 + $0x1e0] sm:$0xff]  }
  0x49   : > { %1566 = vmatprep.mubr.bf16.mxu1 %v7690_v29  ;;  %6390 = vmatprep.subr.bf16.mxu1 %v7184_v27 }
  0x4a   : > { %v551_v43 = vshll.u32 %v7836_v5, 16  ;;  %v575_v31 = vshll.u32 %v7883_v52, 16  ;;  %6391 = vmatpush3.bf16.msra.mxu1 %v7185_v32  ;;  %v10953_v58 = vrot.slane %v7836_v5, 1 }
  0x4b   : > { %6281 = vmatpush3.bf16.msra.mxu0 %v7174_v25  ;;  %v501_v25 = vor.u32 %v500_v30, %v496_v28  ;;  %v7872_v28 = vpack.c.bf16 %v367_v16, %v367_v16  ;;  %v7874_v30 = vpack.c.bf16 %v369_v21, %v368_v19  ;;  %v373_v21 = vld [vmem:[%s7617_s23 + $0x148] sm:$0x3]  ;;  %6392 = vmatprep.subr.bf16.mxu1 %v7186_v63  ;;  %v376_v63 = vld [vmem:[%s7617_s23 + $0x160] sm:$0x3] }
  0x4c   : > { %6282 = vmatprep.subr.bf16.mxu0 %v7176_v44  ;;  %v7868_v44 = vpack.c.bf16 %v366_v6, %v365_v2  ;;  %v7182_v6 = vld [vmem:[%s10932_s1 + $0x178] sm:$0xff]   ;;  %v7944_v32 = vpack.c.bf16 %v373_v21, %v373_v21  ;;  %v374_v2 = vld [vmem:[%s7617_s23 + $0x150] sm:$0xff]  ;;  %v7986_v20 = vpack.c.bf16 %v376_v63, %v376_v63 }
  0x4d   : > { %v7887_v55 = vsel %vm422_vm1, %v501_v25, %v7797_v39  ;;  %v372_v39 = vld [vmem:[%s7617_s23 + $0x140] sm:$0xff]  ;;  %v563_v16 = vshll.u32 %v7872_v28, 16  ;;  %v570_v19 = vshll.u32 %v7874_v30, 16  ;;  %v7183_v25 = vld [vmem:[%s10932_s1 + $0x138] sm:$0xff]   ;;  %v7188_v21 = vld [vmem:[%s10932_s1 + $0x1f0] sm:$0xff]  }
  0x4e   : > { %1406 = vmatmul.mubr.bf16.gmra.mrb[12].mxu0 %v7662_v11  ;;  %v558_v9 = vshll.u32 %v7868_v44, 16  ;;  %v7937_v40 = vpack.c.bf16 %v372_v39, %v371_v14  ;;  %v7952_v14 = vsel %vm422_vm1, %v513_v46, %v7826_v61  ;;  %v7955_v39 = vrot.slane %v575_v31, 1  ;;  %v7189_v61 = vld [vmem:[%s10932_s1 + $0x1b0] sm:$0xff]  }
  0x4f   : > { %1413 = vmatprep.mubr.bf16.mxu0 %v7768_v17  ;;  %6283 = vmatpush3.bf16.msra.mxu0 %v7178_v7  ;;  %v7897_v7 = vrot.slane %v551_v43, 1  ;;  %v7922_v43 = vsel %vm663_vm0, %v682_v34, %v683_v35  ;;  %v7935_v35 = vrot.slane %v563_v16, 1  ;;  %v7974_v31 = vsel %vm663_vm0, %v685_v45, %v686_v54  ;;  %v7191_v45 = vld [vmem:[%s10932_s1 + $0x1b8] sm:$0xff]  }
  0x50   : > { %1567 = vmatmul.mubr.bf16.gmra.mrb[12].mxu1 %v7743_v59  ;;  %6284 = vmatprep.subr.bf16.mxu0 %v7182_v6  ;;  %v7933_v34 = vrot.slane %v558_v9, 1  ;;  %v7187_v9 = vld [vmem:[%s10932_s1 + $0x1a8] sm:$0xff]   ;;  %v582_v27 = vshll.u32 %v7937_v40, 16  ;;  %v587_v46 = vshll.u32 %v7944_v32, 16  ;;  %v580_v16 = vshrl.u32 %v7937_v40, 16 }
  0x51   : > { %1574 = vmatprep.mubr.bf16.mxu1 %v7715_v42  ;;  %6393 = vmatpush3.bf16.msra.mxu1 %v7187_v9  ;;  %v7190_v9 = vld [vmem:[%s10932_s1 + $0x1f8] sm:$0xff]   ;;  %v703_v54 = vrot.slane %v7937_v40, 1 }
  0x52   : > { %6394 = vmatprep.subr.bf16.mxu1 %v7188_v21  ;;  %v525_v21 = vor.u32 %v7833_v3, %v520_v62  ;;  %v584_v6 = vrot.slane %v582_v27, 1  ;;  %v704_v62 = vrot.slane %v7944_v32, 1  ;;  %v589_v3 = vrot.slane %v587_v46, 1 }
  0x53   : > { %6285 = vmatpush3.bf16.msra.mxu0 %v7183_v25  ;;  %v7941_v25 = vrot.slane %v570_v19, 1  ;;  %v375_v19 = vld [vmem:[%s7617_s23 + $0x158] sm:$0xff]  ;;  %v599_v27 = vshll.u32 %v7986_v20, 16  ;;  %v8015_v32 = vsel %vm663_vm0, %v688_v0, %v689_v8  ;;  %v8034_v8 = vsel %vm663_vm0, %v691_v18, %v692_v22 }
  0x54   : > { %v7984_v53 = vpack.c.bf16 %v375_v19, %v374_v2  ;;  %6990 = vmatprep.subr.bf16.mxu0 %v7995_v4  ;;  %v8003_v19 = vsel %vm422_vm1, %v525_v21, %v7848_v10  ;;  %v537_v10 = vor.u32 %v7865_v41, %v532_v36  ;;  %v549_v36 = vor.u32 %v7890_v60, %v544_v50  ;;  %v377_v60 = vld [vmem:[%s7617_s23 + $0x168] sm:$0xff] }
  0x55   : > { %6395 = vmatpush3.bf16.msra.mxu1 %v7189_v61  ;;  %v10954_v18 = vrot.slane %v7830_v1, 1  ;;  %v707_v21 = vrot.slane %v7986_v20, 1 }
  0x56   : > { %1414 = vmatmul.mubr.bf16.gmra.mrb[16].mxu0 %v7690_v29  ;;  %6396 = vmatprep.subr.bf16.mxu1 %v7190_v9  ;;  %v592_v2 = vshrl.u32 %v7984_v53, 16  ;;  %v594_v63 = vshll.u32 %v7984_v53, 16  ;;  %v8023_v61 = vsel %vm422_vm1, %v537_v10, %v7880_v49  ;;  %v706_v0 = vrot.slane %v7984_v53, 1 }
  0x57   : > { %1421 = vmatprep.mubr.bf16.mxu0 %v7812_v51  ;;  %v8042_v41 = vsel %vm422_vm1, %v549_v36, %v7897_v7  ;;  %v8052_v22 = vsel %vm663_vm0, %v10954_v18, %v10953_v58  ;;  %v10955_v49 = vshrl.u32 %v7868_v44, 16  ;;  %v378_v7 = vld [vmem:[%s7617_s23 + $0x170] sm:$0xff]  ;;  %v601_v9 = vrot.slane %v599_v27, 1 }
  0x58   : > { %1575 = vmatmul.mubr.bf16.gmra.mrb[16].mxu1 %v7795_v38  ;;  %v596_v37 = vrot.slane %v594_v63, 1  ;;  %v8065_v5 = vpack.c.bf16 %v378_v7, %v377_v60  ;;  %v10960_v27 = vrot.slane %v7874_v30, 1  ;;  %v8108_v7 = vsel %vm663_vm0, %v703_v54, %v704_v62 }
  0x59   : > { %1582 = vmatprep.mubr.bf16.mxu1 %v7736_v56  ;;  %6397 = vmatpush3.bf16.msra.mxu1 %v7191_v45  ;;  %v561_v50 = vor.u32 %v7933_v34, %v10955_v49  ;;  %v10956_v34 = vrot.slane %v7872_v28, 1  ;;  %v10957_v45 = vrot.slane %v7868_v44, 1  ;;  %v379_v28 = vld [vmem:[%s7617_s23 + $0x178] sm:$0x3]  ;;  %v585_v49 = vor.u32 %v584_v6, %v580_v16  ;;  %v380_v16 = vld [vmem:[%s7617_s23 + $0x180] sm:$0xff] }
  0x5a   : > { %v604_v36 = vshrl.u32 %v8065_v5, 16  ;;  %v606_v58 = vshll.u32 %v8065_v5, 16  ;;  %v597_v6 = vor.u32 %v596_v37, %v592_v2  ;;  %v709_v37 = vrot.slane %v8065_v5, 1 }
  0x5b   : > { %v8062_v46 = vsel %vm422_vm1, %v561_v50, %v7935_v35  ;;  %v8075_v63 = vsel %vm663_vm0, %v10957_v45, %v10956_v34  ;;  %v10958_v35 = vshrl.u32 %v7874_v30, 16  ;;  %v8100_v50 = vsel %vm422_vm1, %v585_v49, %v589_v3  ;;  %v381_v34 = vld [vmem:[%s7617_s23 + $0x188] sm:$0xff] }
  0x5c   : > { %v608_v60 = vrot.slane %v606_v58, 1  ;;  %v8114_v3 = vsel %vm422_vm1, %v597_v6, %v601_v9  ;;  %v8120_v45 = vsel %vm663_vm0, %v706_v0, %v707_v21  ;;  %v8122_v62 = vpack.c.bf16 %v381_v34, %v380_v16  ;;  %v7193_v21 = vld [vmem:[%s10932_s1 + $0x208] sm:$0xff]  }
  0x5d   : > { %v573_v10 = vor.u32 %v7941_v25, %v10958_v35  ;;  %v10959_v25 = vrot.slane %v7883_v52, 1 }
  0x5e   : > { %1422 = vmatmul.mubr.bf16.gmra.mrb[20].mxu0 %v7715_v42  ;;  %v609_v35 = vor.u32 %v608_v60, %v604_v36  ;;  %v384_v36 = vld [vmem:[%s7617_s23 + $0x1a0] sm:$0xff]  ;;  %v729_v49 = vshrl.u32 %v8122_v62, 16 }
  0x5f   : > { %1429 = vmatprep.mubr.bf16.mxu0 %v7887_v55  ;;  %v8085_v20 = vsel %vm422_vm1, %v573_v10, %v7955_v39  ;;  %v8096_v18 = vsel %vm663_vm0, %v10960_v27, %v10959_v25  ;;  %v417_v39 = vpack.c.bf16 %v379_v28, %v379_v28  ;;  %v7194_v10 = vld [vmem:[%s10932_s1 + $0x210] sm:$0xff]  }
  0x60   : > { %1583 = vmatmul.mubr.bf16.gmra.mrb[20].mxu1 %v7857_v24 }
  0x61   : > { %1590 = vmatprep.mubr.bf16.mxu1 %v7764_v15  ;;  %v611_v52 = vshll.u32 %v417_v39, 16  ;;  %v710_v9 = vrot.slane %v417_v39, 1 }
  0x63   : > { %v613_v54 = vrot.slane %v611_v52, 1  ;;  %v8133_v0 = vsel %vm663_vm0, %v709_v37, %v710_v9 }
  0x65   : > { %v8126_v2 = vsel %vm422_vm1, %v609_v35, %v613_v54  ;;  %v385_v54 = vld [vmem:[%s7617_s23 + $0x1a8] sm:$0x3] }
  0x66   : > { %1430 = vmatmul.mubr.bf16.gmra.mrb[24].mxu0 %v7736_v56 }
  0x67   : > { %1437 = vmatprep.mubr.bf16.mxu0 %v7952_v14 }
  0x68   : > { %1591 = vmatmul.mubr.bf16.gmra.mrb[24].mxu1 %v7922_v43 }
  0x69   : > { %1598 = vmatprep.mubr.bf16.mxu1 %v7776_v23 }
  0x6e   : > { %1438 = vmatmul.mubr.bf16.gmra.mrb[28].mxu0 %v7764_v15 }
  0x6f   : > { %1445 = vmatprep.mubr.bf16.mxu0 %v8003_v19 }
  0x70   : > { %1599 = vmatmul.mubr.bf16.gmra.mrb[28].mxu1 %v7974_v31 }
  0x71   : > { %1606 = vmatprep.mubr.bf16.mxu1 %v7807_v47 }
  0x76   : > { %1446 = vmatmul.mubr.bf16.gmra.mrb[32].mxu0 %v7776_v23 }
  0x77   : > { %1453 = vmatprep.mubr.bf16.mxu0 %v8023_v61 }
  0x78   : > { %1607 = vmatmul.mubr.bf16.gmra.mrb[32].mxu1 %v8015_v32 }
  0x79   : > { %1614 = vmatprep.mubr.bf16.mxu1 %v7830_v1 }
  0x7e   : > { %1454 = vmatmul.mubr.bf16.gmra.mrb[36].mxu0 %v7807_v47 }
  0x7f   : > { %1461 = vmatprep.mubr.bf16.mxu0 %v8042_v41 }
  0x80   : > { %1615 = vmatmul.mubr.bf16.gmra.mrb[36].mxu1 %v8034_v8 }
  0x81   : > { %1622 = vmatprep.mubr.bf16.mxu1 %v7868_v44 }
  0x86   : > { %1462 = vmatmul.mubr.bf16.gmra.mrb[40].mxu0 %v7830_v1 }
  0x87   : > { %1469 = vmatprep.mubr.bf16.mxu0 %v8062_v46 }
  0x88   : > { %1623 = vmatmul.mubr.bf16.gmra.mrb[40].mxu1 %v8052_v22 }
  0x89   : > { %1630 = vmatprep.mubr.bf16.mxu1 %v7874_v30 }
  0x8e   : > { %1470 = vmatmul.mubr.bf16.gmra.mrb[44].mxu0 %v7868_v44 }
  0x8f   : > { %1477 = vmatprep.mubr.bf16.mxu0 %v8085_v20 }
  0x90   : > { %1631 = vmatmul.mubr.bf16.gmra.mrb[44].mxu1 %v8075_v63 }
  0x91   : > { %1638 = vmatprep.mubr.bf16.mxu1 %v7937_v40 }
  0x96   : > { %1478 = vmatmul.mubr.bf16.gmra.mrb[48].mxu0 %v7874_v30 }
  0x97   : > { %1485 = vmatprep.mubr.bf16.mxu0 %v8100_v50 }
  0x98   : > { %1639 = vmatmul.mubr.bf16.gmra.mrb[48].mxu1 %v8096_v18 }
  0x99   : > { %1646 = vmatprep.mubr.bf16.mxu1 %v7984_v53 }
  0x9e   : > { %1486 = vmatmul.mubr.bf16.gmra.mrb[52].mxu0 %v7937_v40 }
  0x9f   : > { %1493 = vmatprep.mubr.bf16.mxu0 %v8114_v3 }
  0xa0   : > { %1647 = vmatmul.mubr.bf16.gmra.mrb[52].mxu1 %v8108_v7 }
  0xa1   : > { %1654 = vmatprep.mubr.bf16.mxu1 %v8065_v5 }
  0xa6   : > { %1494 = vmatmul.mubr.bf16.gmra.mrb[56].mxu0 %v7984_v53 }
  0xa7   : > { %1501 = vmatprep.mubr.bf16.mxu0 %v8126_v2 }
  0xa8   : > { %1655 = vmatmul.mubr.bf16.gmra.mrb[56].mxu1 %v8120_v45 }
  0xa9   : > { %1662 = vmatprep.mubr.bf16.mxu1 %v8122_v62 }
  0xae   : > { %1502 = vmatmul.mubr.bf16.gmra.mrb[60].mxu0 %v8065_v5 }
  0xaf   : > { %1703 = vmatprep.mubr.bf16.mxu0 %v7668_v13  ;;  %v7198_v13 = vld [vmem:[%s10932_s1 + $0x230] sm:$0xff]  }
  0xb0   : > { %1663 = vmatmul.mubr.bf16.gmra.mrb[60].mxu1 %v8133_v0 }
  0xb1   : > { %1864 = vmatprep.mubr.bf16.mxu1 %v7687_v26 }
  0xb6   : > { %1704 = vmatmul.mubr.bf16.vlgmr.msra.gmra.mrb[64].mxu0 %v7665_v12  ;;  %v7196_v12 = vld [vmem:[%s10932_s1 + $0x220] sm:$0xff]  }
  0xb7   : > { %6991 = vmatpush3.bf16.msra.mxu0 %v7995_v4  ;;  %1711 = vmatprep.mubr.bf16.mxu0 %v7700_v33 }
  0xb8   : > { %1865 = vmatmul.mubr.bf16.vlgmr.msra.gmra.mrb[64].mxu1 %v7648_v57  ;;  %6992 = vmatprep.subr.bf16.mxu0 %v7193_v21  ;;  %v7195_v57 = vld [vmem:[%s10932_s1 + $0x218] sm:$0xff]  }
  0xb9   : > { %1872 = vmatprep.mubr.bf16.mxu1 %v7723_v48 }
  0xbb   : > { %6993 = vmatpush3.bf16.msra.mxu0 %v7193_v21 }
  0xbc   : > { %6994 = vmatprep.subr.bf16.mxu0 %v7194_v10 }
  0xbe   : > { %1712 = vmatmul.mubr.bf16.gmra.mrb[68].mxu0 %v7687_v26  ;;  %v7199_v26 = vld [vmem:[%s10932_s1 + $0x238] sm:$0xff]  }
  0xbf   : > { %1719 = vmatprep.mubr.bf16.mxu0 %v7743_v59  ;;  %6995 = vmatpush3.bf16.msra.mxu0 %v7194_v10 }
  0xc0   : > { %1873 = vmatmul.mubr.bf16.gmra.mrb[68].mxu1 %v7662_v11  ;;  %6996 = vmatprep.subr.bf16.mxu0 %v7195_v57  ;;  %v7197_v11 = vld [vmem:[%s10932_s1 + $0x228] sm:$0xff]  }
  0xc1   : > { %1880 = vmatprep.mubr.bf16.mxu1 %v7768_v17 }
  0xc3   : > { %6997 = vmatpush3.bf16.msra.mxu0 %v7195_v57 }
  0xc4   : > { %6998 = vmatprep.subr.bf16.mxu0 %v7196_v12 }
  0xc6   : > { %1720 = vmatmul.mubr.bf16.gmra.mrb[72].mxu0 %v7723_v48 }
  0xc7   : > { %1727 = vmatprep.mubr.bf16.mxu0 %v7795_v38  ;;  %6999 = vmatpush3.bf16.msra.mxu0 %v7196_v12 }
  0xc8   : > { %1881 = vmatmul.mubr.bf16.gmra.mrb[72].mxu1 %v7690_v29  ;;  %7000 = vmatprep.subr.bf16.mxu0 %v7197_v11 }
  0xc9   : > { %1888 = vmatprep.mubr.bf16.mxu1 %v7812_v51 }
  0xcb   : > { %7001 = vmatpush3.bf16.msra.mxu0 %v7197_v11 }
  0xcc   : > { %7002 = vmatprep.subr.bf16.mxu0 %v7198_v13 }
  0xce   : > { %1728 = vmatmul.mubr.bf16.gmra.mrb[76].mxu0 %v7768_v17 }
  0xcf   : > { %1735 = vmatprep.mubr.bf16.mxu0 %v7857_v24  ;;  %7003 = vmatpush3.bf16.msra.mxu0 %v7198_v13  ;;  %v8234_v13 = vpack.c.bf16 %v385_v54, %v385_v54 }
  0xd0   : > { %1889 = vmatmul.mubr.bf16.gmra.mrb[76].mxu1 %v7715_v42  ;;  %7004 = vmatprep.subr.bf16.mxu0 %v7199_v26 }
  0xd1   : > { %1896 = vmatprep.mubr.bf16.mxu1 %v7887_v55 }
  0xd3   : > { %7005 = vmatpush3.bf16.msra.mxu0 %v7199_v26 }
  0xd6   : > { %1736 = vmatmul.mubr.bf16.gmra.mrb[80].mxu0 %v7812_v51 }
  0xd7   : > { %1743 = vmatprep.mubr.bf16.mxu0 %v7922_v43 }
  0xd8   : > { %1897 = vmatmul.mubr.bf16.gmra.mrb[80].mxu1 %v7736_v56 }
  0xd9   : > { %1904 = vmatprep.mubr.bf16.mxu1 %v7952_v14 }
  0xde   : > { %1744 = vmatmul.mubr.bf16.gmra.mrb[84].mxu0 %v7887_v55 }
  0xdf   : > { %1751 = vmatprep.mubr.bf16.mxu0 %v7974_v31 }
  0xe0   : > { %1905 = vmatmul.mubr.bf16.gmra.mrb[84].mxu1 %v7764_v15 }
  0xe1   : > { %1912 = vmatprep.mubr.bf16.mxu1 %v8003_v19 }
  0xe6   : > { %1752 = vmatmul.mubr.bf16.gmra.mrb[88].mxu0 %v7952_v14  ;;  %v731_v14 = vshll.u32 %v8122_v62, 16 }
  0xe7   : > { %1759 = vmatprep.mubr.bf16.mxu0 %v8015_v32 }
  0xe8   : > { %1913 = vmatmul.mubr.bf16.gmra.mrb[88].mxu1 %v7776_v23  ;;  %v382_v23 = vld [vmem:[%s7617_s23 + $0x190] sm:$0x3]  ;;  %v733_v39 = vrot.slane %v731_v14, 1 }
  0xe9   : > { %1920 = vmatprep.mubr.bf16.mxu1 %v8023_v61  ;;  %v8213_v4 = vpack.c.bf16 %v382_v23, %v382_v23 }
  0xea   : > { %v734_v10 = vor.u32 %v733_v39, %v729_v49 }
  0xeb   : > { %v736_v60 = vshll.u32 %v8213_v4, 16 }
  0xed   : > { %v738_v57 = vrot.slane %v736_v60, 1 }
  0xee   : > { %1760 = vmatmul.mubr.bf16.gmra.mrb[92].mxu0 %v8003_v19 }
  0xef   : > { %1767 = vmatprep.mubr.bf16.mxu0 %v8034_v8 }
  0xf0   : > { %1921 = vmatmul.mubr.bf16.gmra.mrb[92].mxu1 %v7807_v47  ;;  %v8209_v47 = vld [vmem:[%s10933_s2] ss:$0 sm:$0xff] }
  0xf1   : > { %1928 = vmatprep.mubr.bf16.mxu1 %v8042_v41 }
  0xf6   : > { %1768 = vmatmul.mubr.bf16.gmra.mrb[96].mxu0 %v8023_v61 }
  0xf7   : > { %1775 = vmatprep.mubr.bf16.mxu0 %v8052_v22 }
  0xf8   : > { %1929 = vmatmul.mubr.bf16.gmra.mrb[96].mxu1 %v7830_v1 }
  0xf9   : > { %1936 = vmatprep.mubr.bf16.mxu1 %v8062_v46 }
  0xfe   : > { %1776 = vmatmul.mubr.bf16.gmra.mrb[100].mxu0 %v8042_v41 }
  0xff   : > { %1783 = vmatprep.mubr.bf16.mxu0 %v8075_v63 }
 0x100   : > { %1937 = vmatmul.mubr.bf16.gmra.mrb[100].mxu1 %v7868_v44 }
 0x101   : > { %1944 = vmatprep.mubr.bf16.mxu1 %v8085_v20 }
 0x106   : > { %1784 = vmatmul.mubr.bf16.gmra.mrb[104].mxu0 %v8062_v46  ;;  %v383_v46 = vld [vmem:[%s7617_s23 + $0x198] sm:$0xff] }
 0x107   : > { %1791 = vmatprep.mubr.bf16.mxu0 %v8096_v18  ;;  %v8226_v6 = vpack.c.bf16 %v384_v36, %v383_v46 }
 0x108   : > { %1945 = vmatmul.mubr.bf16.gmra.mrb[104].mxu1 %v7874_v30 }
 0x109   : > { %1952 = vmatprep.mubr.bf16.mxu1 %v8100_v50  ;;  %v6062_v15 = vpop.f32.mrb[0].mxu0  ;;  %v750_v26 = vshll.u32 %v8226_v6, 16 }
 0x10a   : > { %v6063_v51 = vpop.f32.mrb[1].mxu0 }
 0x10b   : > { %v6174_v29 = vpop.f32.mrb[0].mxu1  ;;  %v6064_v44 = vadd.f32 %v6063_v51, %v6062_v15  ;;  %v6065_v30 = vpop.f32.mrb[2].mxu0 }
 0x10c   : > { %v6175_v42 = vpop.f32.mrb[1].mxu1  ;;  %v6066_v55 = vpop.f32.mrb[3].mxu0 }
 0x10d   : > { %v6176_v48 = vadd.f32 %v6175_v42, %v6174_v29  ;;  %v6177_v56 = vpop.f32.mrb[2].mxu1  ;;  %v1384_v19 = vadd.f32 %v6064_v44, %v8209_v47  ;;  %v6067_v61 = vadd.f32 %v6066_v55, %v6065_v30  ;;  %v752_v44 = vrot.slane %v750_v26, 1 }
 0x10e   : > { %v6178_v17 = vpop.f32.mrb[3].mxu1  ;;  %1792 = vmatmul.mubr.bf16.gmra.mrb[108].mxu0 %v8085_v20  ;;  %v755_v30 = vshll.u32 %v8234_v13, 16 }
 0x10f   : > { %v6179_v1 = vadd.f32 %v6178_v17, %v6177_v56  ;;  %v1387_v58 = vadd.f32 %v6067_v61, %v8209_v47  ;;  %1799 = vmatprep.mubr.bf16.mxu0 %v8108_v7  ;;  %v739_v17 = vsel %vm422_vm1, %v734_v10, %v738_v57 }
 0x110   : > { %1953 = vmatmul.mubr.bf16.gmra.mrb[108].mxu1 %v7937_v40  ;;  %v8222_v40 = vadd.f32 %v6176_v48, %v1384_v19 }
 0x111   : > { %1960 = vmatprep.mubr.bf16.mxu1 %v8114_v3  ;;  %v6068_v52 = vpop.f32.mrb[4].mxu0  ;;  %v8228_v16 = vadd.f32 %v6179_v1, %v1387_v58  ;;  %v748_v1 = vshrl.u32 %v8226_v6, 16 }
 0x112   : > { %v6069_v34 = vpop.f32.mrb[5].mxu0 }
 0x113   : > { %v6180_v41 = vpop.f32.mrb[4].mxu1  ;;  %v6070_v37 = vadd.f32 %v6069_v34, %v6068_v52  ;;  %v6071_v9 = vpop.f32.mrb[6].mxu0  ;;  %v753_v58 = vor.u32 %v752_v44, %v748_v1 }
 0x114   : > { %v6181_v28 = vpop.f32.mrb[5].mxu1  ;;  %v6072_v21 = vpop.f32.mrb[7].mxu0 }
 0x115   : > { %v6182_v25 = vadd.f32 %v6181_v28, %v6180_v41  ;;  %v6183_v27 = vpop.f32.mrb[6].mxu1  ;;  %v1392_v12 = vadd.f32 %v6070_v37, %v8209_v47  ;;  %v6073_v11 = vadd.f32 %v6072_v21, %v6071_v9  ;;  %v757_v28 = vrot.slane %v755_v30, 1 }
 0x116   : > { %v6184_v20 = vpop.f32.mrb[7].mxu1  ;;  %1800 = vmatmul.mubr.bf16.gmra.mrb[112].mxu0 %v8100_v50 }
 0x117   : > { %v6185_v35 = vadd.f32 %v6184_v20, %v6183_v27  ;;  %v1395_v42 = vadd.f32 %v6073_v11, %v8209_v47  ;;  %1807 = vmatprep.mubr.bf16.mxu0 %v8120_v45  ;;  %v744_v20 = vrot.slane %v8213_v4, 1  ;;  %v758_v54 = vsel %vm422_vm1, %v753_v58, %v757_v28 }
 0x118   : > { %1961 = vmatmul.mubr.bf16.gmra.mrb[112].mxu1 %v7984_v53  ;;  %v8240_v53 = vadd.f32 %v6182_v25, %v1392_v12 }
 0x119   : > { %1968 = vmatprep.mubr.bf16.mxu1 %v8126_v2  ;;  %v6074_v23 = vpop.f32.mrb[8].mxu0  ;;  %v8245_v50 = vadd.f32 %v6185_v35, %v1395_v42 }
 0x11a   : > { %v6075_v55 = vpop.f32.mrb[9].mxu0 }
 0x11b   : > { %v6186_v29 = vpop.f32.mrb[8].mxu1  ;;  %v6076_v19 = vadd.f32 %v6075_v55, %v6074_v23  ;;  %v6077_v61 = vpop.f32.mrb[10].mxu0 }
 0x11c   : > { %v6187_v48 = vpop.f32.mrb[9].mxu1  ;;  %v6078_v41 = vpop.f32.mrb[11].mxu0 }
 0x11d   : > { %v6188_v56 = vadd.f32 %v6187_v48, %v6186_v29  ;;  %v6189_v15 = vpop.f32.mrb[10].mxu1  ;;  %v1400_v46 = vadd.f32 %v6076_v19, %v8209_v47  ;;  %v6079_v36 = vadd.f32 %v6078_v41, %v6077_v61 }
 0x11e   : > { %v6190_v51 = vpop.f32.mrb[11].mxu1  ;;  %1808 = vmatmul.mubr.bf16.gmra.mrb[116].mxu0 %v8114_v3 }
 0x11f   : > { %v6191_v14 = vadd.f32 %v6190_v51, %v6189_v15  ;;  %v1403_v27 = vadd.f32 %v6079_v36, %v8209_v47  ;;  %1815 = vmatprep.mubr.bf16.mxu0 %v8133_v0  ;;  %v8252_v39 = vadd.f32 %v6188_v56, %v1400_v46 }
 0x120   : > { %1969 = vmatmul.mubr.bf16.gmra.mrb[116].mxu1 %v8065_v5  ;;  %v743_v5 = vrot.slane %v8122_v62, 1 }
 0x121   : > { %1976 = vmatprep.mubr.bf16.mxu1 %v739_v17  ;;  %v6080_v34 = vpop.f32.mrb[12].mxu0  ;;  %v8257_v37 = vadd.f32 %v6191_v14, %v1403_v27 }
 0x122   : > { %v6081_v3 = vpop.f32.mrb[13].mxu0  ;;  %v8261_v12 = vsel %vm663_vm0, %v743_v5, %v744_v20 }
 0x123   : > { %v6192_v25 = vpop.f32.mrb[12].mxu1  ;;  %v6082_v21 = vadd.f32 %v6081_v3, %v6080_v34  ;;  %v6083_v10 = vpop.f32.mrb[14].mxu0 }
 0x124   : > { %v6193_v49 = vpop.f32.mrb[13].mxu1  ;;  %v6084_v57 = vpop.f32.mrb[15].mxu0 }
 0x125   : > { %v6194_v60 = vadd.f32 %v6193_v49, %v6192_v25  ;;  %v6195_v52 = vpop.f32.mrb[14].mxu1  ;;  %v1408_v11 = vadd.f32 %v6082_v21, %v8209_v47  ;;  %v6085_v4 = vadd.f32 %v6084_v57, %v6083_v10 }
 0x126   : > { %v6196_v35 = vpop.f32.mrb[15].mxu1  ;;  %1816 = vmatmul.mubr.bf16.gmra.mrb[120].mxu0 %v8126_v2 }
 0x127   : > { %v6197_v9 = vadd.f32 %v6196_v35, %v6195_v52  ;;  %v1411_v29 = vadd.f32 %v6085_v4, %v8209_v47  ;;  %1823 = vmatprep.mubr.bf16.mxu0 %v8261_v12  ;;  %v8267_v48 = vadd.f32 %v6194_v60, %v1408_v11 }
 0x128   : > { %1977 = vmatmul.mubr.bf16.gmra.mrb[120].mxu1 %v8122_v62 }
 0x129   : > { %1984 = vmatprep.mubr.bf16.mxu1 %v758_v54  ;;  %v6086_v15 = vpop.f32.mrb[16].mxu0  ;;  %v8269_v51 = vadd.f32 %v6197_v9, %v1411_v29 }
 0x12a   : > { %v6087_v1 = vpop.f32.mrb[17].mxu0 }
 0x12b   : > { %v6198_v26 = vpop.f32.mrb[16].mxu1  ;;  %v6088_v30 = vadd.f32 %v6087_v1, %v6086_v15  ;;  %v6089_v55 = vpop.f32.mrb[18].mxu0 }
 0x12c   : > { %v6199_v42 = vpop.f32.mrb[17].mxu1  ;;  %v6090_v2 = vpop.f32.mrb[19].mxu0 }
 0x12d   : > { %v6200_v56 = vadd.f32 %v6199_v42, %v6198_v26  ;;  %v6201_v62 = vpop.f32.mrb[18].mxu1  ;;  %v1416_v14 = vadd.f32 %v6088_v30, %v8209_v47  ;;  %v6091_v19 = vadd.f32 %v6090_v2, %v6089_v55 }
 0x12e   : > { %v6202_v23 = vpop.f32.mrb[19].mxu1  ;;  %1824 = vmatmul.mubr.bf16.gmra.mrb[124].mxu0 %v739_v17 }
 0x12f   : > { %v6203_v44 = vadd.f32 %v6202_v23, %v6201_v62  ;;  %v1419_v41 = vadd.f32 %v6091_v19, %v8209_v47  ;;  %7006 = vmatprep.mubr.bf16.mxu0 %v7700_v33  ;;  %v8275_v36 = vadd.f32 %v6200_v56, %v1416_v14 }
 0x130   : > { %1985 = vmatmul.mubr.bf16.gmra.mrb[124].mxu1 %v8226_v6 }
 0x131   : > { %v6092_v25 = vpop.f32.mrb[20].mxu0  ;;  %v8277_v49 = vadd.f32 %v6203_v44, %v1419_v41 }
 0x132   : > { %v6093_v60 = vpop.f32.mrb[21].mxu0 }
 0x133   : > { %v6204_v61 = vpop.f32.mrb[20].mxu1  ;;  %v6094_v5 = vadd.f32 %v6093_v60, %v6092_v25  ;;  %v6095_v20 = vpop.f32.mrb[22].mxu0 }
 0x134   : > { %v6205_v46 = vpop.f32.mrb[21].mxu1  ;;  %v6096_v34 = vpop.f32.mrb[23].mxu0 }
 0x135   : > { %v6206_v58 = vadd.f32 %v6205_v46, %v6204_v61  ;;  %v6207_v28 = vpop.f32.mrb[22].mxu1  ;;  %v1424_v17 = vadd.f32 %v6094_v5, %v8209_v47  ;;  %v6097_v35 = vadd.f32 %v6096_v34, %v6095_v20 }
 0x136   : > { %v6208_v27 = vpop.f32.mrb[23].mxu1  ;;  %7007 = vmatmul.mubr.bf16.vlgmr.msra.gmra.mrb[128].mxu0 %v7743_v59 }
 0x137   : > { %v6209_v52 = vadd.f32 %v6208_v27, %v6207_v28  ;;  %v1427_v33 = vadd.f32 %v6097_v35, %v8209_v47  ;;  %7010 = vmatprep.mubr.bf16.mxu0 %v7795_v38  ;;  %v8283_v9 = vadd.f32 %v6206_v58, %v1424_v17 }
 0x139   : > { %v6098_v57 = vpop.f32.mrb[24].mxu0  ;;  %v8285_v4 = vadd.f32 %v6209_v52, %v1427_v33 }
 0x13a   : > { %v6099_v26 = vpop.f32.mrb[25].mxu0 }
 0x13b   : > { %v6210_v54 = vpop.f32.mrb[24].mxu1  ;;  %v6100_v42 = vadd.f32 %v6099_v26, %v6098_v57  ;;  %v6101_v56 = vpop.f32.mrb[26].mxu0 }
 0x13c   : > { %v6211_v3 = vpop.f32.mrb[25].mxu1  ;;  %v6102_v62 = vpop.f32.mrb[27].mxu0 }
 0x13d   : > { %v6212_v21 = vadd.f32 %v6211_v3, %v6210_v54  ;;  %v6213_v10 = vpop.f32.mrb[26].mxu1  ;;  %v1432_v59 = vadd.f32 %v6100_v42, %v8209_v47  ;;  %v6103_v15 = vadd.f32 %v6102_v62, %v6101_v56 }
 0x13e   : > { %v6214_v11 = vpop.f32.mrb[27].mxu1  ;;  %7011 = vmatmul.mubr.bf16.gmra.mrb[132].mxu0 %v7857_v24 }
 0x13f   : > { %v6215_v29 = vadd.f32 %v6214_v11, %v6213_v10  ;;  %v1435_v38 = vadd.f32 %v6103_v15, %v8209_v47  ;;  %7014 = vmatprep.mubr.bf16.mxu0 %v7922_v43  ;;  %v8291_v44 = vadd.f32 %v6212_v21, %v1432_v59 }
 0x141   : > { %v6104_v2 = vpop.f32.mrb[28].mxu0  ;;  %v8293_v19 = vadd.f32 %v6215_v29, %v1435_v38 }
 0x142   : > { %v6105_v61 = vpop.f32.mrb[29].mxu0 }
 0x143   : > { %v6216_v23 = vpop.f32.mrb[28].mxu1  ;;  %v6106_v46 = vadd.f32 %v6105_v61, %v6104_v2  ;;  %v6107_v58 = vpop.f32.mrb[30].mxu0 }
 0x144   : > { %v6217_v1 = vpop.f32.mrb[29].mxu1  ;;  %v6108_v28 = vpop.f32.mrb[31].mxu0 }
 0x145   : > { %v6218_v30 = vadd.f32 %v6217_v1, %v6216_v23  ;;  %v6219_v55 = vpop.f32.mrb[30].mxu1  ;;  %v1440_v24 = vadd.f32 %v6106_v46, %v8209_v47  ;;  %v6109_v25 = vadd.f32 %v6108_v28, %v6107_v58 }
 0x146   : > { %v6220_v14 = vpop.f32.mrb[31].mxu1  ;;  %7015 = vmatmul.mubr.bf16.gmra.mrb[136].mxu0 %v7974_v31 }
 0x147   : > { %v6221_v41 = vadd.f32 %v6220_v14, %v6219_v55  ;;  %v1443_v43 = vadd.f32 %v6109_v25, %v8209_v47  ;;  %7018 = vmatprep.mubr.bf16.mxu0 %v8015_v32  ;;  %v8299_v52 = vadd.f32 %v6218_v30, %v1440_v24 }
 0x149   : > { %v6110_v34 = vpop.f32.mrb[32].mxu0  ;;  %v8301_v35 = vadd.f32 %v6221_v41, %v1443_v43 }
 0x14a   : > { %v6111_v54 = vpop.f32.mrb[33].mxu0 }
 0x14b   : > { %v6222_v27 = vpop.f32.mrb[32].mxu1  ;;  %v6112_v3 = vadd.f32 %v6111_v54, %v6110_v34  ;;  %v6113_v21 = vpop.f32.mrb[34].mxu0 }
 0x14c   : > { %v6223_v60 = vpop.f32.mrb[33].mxu1  ;;  %v6114_v10 = vpop.f32.mrb[35].mxu0 }
 0x14d   : > { %v6224_v5 = vadd.f32 %v6223_v60, %v6222_v27  ;;  %v6225_v20 = vpop.f32.mrb[34].mxu1  ;;  %v1448_v31 = vadd.f32 %v6112_v3, %v8209_v47  ;;  %v6115_v57 = vadd.f32 %v6114_v10, %v6113_v21 }
 0x14e   : > { %v6226_v17 = vpop.f32.mrb[35].mxu1  ;;  %7019 = vmatmul.mubr.bf16.gmra.mrb[140].mxu0 %v8034_v8 }
 0x14f   : > { %v6227_v33 = vadd.f32 %v6226_v17, %v6225_v20  ;;  %v1451_v32 = vadd.f32 %v6115_v57, %v8209_v47  ;;  %v8306_v26 = vadd.f32 %v6224_v5, %v1448_v31  ;;  %7022 = vmatprep.mubr.bf16.mxu0 %v8052_v22 }
 0x151   : > { %v8309_v62 = vadd.f32 %v6227_v33, %v1451_v32  ;;  %v6116_v59 = vpop.f32.mrb[36].mxu0 }
 0x152   : > { %v6117_v23 = vpop.f32.mrb[37].mxu0 }
 0x153   : > { %v6228_v11 = vpop.f32.mrb[36].mxu1  ;;  %v6118_v1 = vadd.f32 %v6117_v23, %v6116_v59  ;;  %v6119_v30 = vpop.f32.mrb[38].mxu0 }
 0x154   : > { %v6229_v29 = vpop.f32.mrb[37].mxu1  ;;  %v6120_v55 = vpop.f32.mrb[39].mxu0 }
 0x155   : > { %v6230_v42 = vadd.f32 %v6229_v29, %v6228_v11  ;;  %v6231_v56 = vpop.f32.mrb[38].mxu1  ;;  %v1456_v8 = vadd.f32 %v6118_v1, %v8209_v47  ;;  %v6121_v2 = vadd.f32 %v6120_v55, %v6119_v30  ;;  %v762_v1 = vrot.slane %v8226_v6, 1 }
 0x156   : > { %v6232_v15 = vpop.f32.mrb[39].mxu1  ;;  %7023 = vmatmul.mubr.bf16.gmra.mrb[144].mxu0 %v8075_v63  ;;  %v763_v30 = vrot.slane %v8234_v13, 1 }
 0x157   : > { %v6233_v38 = vadd.f32 %v6232_v15, %v6231_v56  ;;  %v1459_v61 = vadd.f32 %v6121_v2, %v8209_v47  ;;  %v8314_v22 = vadd.f32 %v6230_v42, %v1456_v8  ;;  %7026 = vmatprep.mubr.bf16.mxu0 %v8096_v18 }
 0x159   : > { %v8317_v28 = vadd.f32 %v6233_v38, %v1459_v61  ;;  %v6122_v24 = vpop.f32.mrb[40].mxu0 }
 0x15a   : > { %v6123_v27 = vpop.f32.mrb[41].mxu0 }
 0x15b   : > { %v6234_v14 = vpop.f32.mrb[40].mxu1  ;;  %v6124_v60 = vadd.f32 %v6123_v27, %v6122_v24  ;;  %v6125_v5 = vpop.f32.mrb[42].mxu0  ;;  %v764_v24 = vsel %vm663_vm0, %v762_v1, %v763_v30 }
 0x15c   : > { %v6235_v41 = vpop.f32.mrb[41].mxu1  ;;  %v6126_v20 = vpop.f32.mrb[43].mxu0 }
 0x15d   : > { %v6236_v46 = vadd.f32 %v6235_v41, %v6234_v14  ;;  %v6237_v58 = vpop.f32.mrb[42].mxu1  ;;  %v1464_v63 = vadd.f32 %v6124_v60, %v8209_v47  ;;  %v6127_v34 = vadd.f32 %v6126_v20, %v6125_v5 }
 0x15e   : > { %v6238_v25 = vpop.f32.mrb[43].mxu1  ;;  %7027 = vmatmul.mubr.bf16.gmra.mrb[148].mxu0 %v8108_v7 }
 0x15f   : > { %v6239_v43 = vadd.f32 %v6238_v25, %v6237_v58  ;;  %v1467_v54 = vadd.f32 %v6127_v34, %v8209_v47  ;;  %v8322_v18 = vadd.f32 %v6236_v46, %v1464_v63  ;;  %7030 = vmatprep.mubr.bf16.mxu0 %v8120_v45 }
 0x161   : > { %v8325_v10 = vadd.f32 %v6239_v43, %v1467_v54  ;;  %v6128_v31 = vpop.f32.mrb[44].mxu0 }
 0x162   : > { %v6129_v11 = vpop.f32.mrb[45].mxu0 }
 0x163   : > { %v6240_v17 = vpop.f32.mrb[44].mxu1  ;;  %v6130_v29 = vadd.f32 %v6129_v11, %v6128_v31  ;;  %v6131_v42 = vpop.f32.mrb[46].mxu0 }
 0x164   : > { %v6241_v33 = vpop.f32.mrb[45].mxu1  ;;  %v6132_v56 = vpop.f32.mrb[47].mxu0 }
 0x165   : > { %v6242_v3 = vadd.f32 %v6241_v33, %v6240_v17  ;;  %v6243_v21 = vpop.f32.mrb[46].mxu1  ;;  %v1472_v7 = vadd.f32 %v6130_v29, %v8209_v47  ;;  %v6133_v59 = vadd.f32 %v6132_v56, %v6131_v42 }
 0x166   : > { %v6244_v57 = vpop.f32.mrb[47].mxu1  ;;  %7031 = vmatmul.mubr.bf16.gmra.mrb[152].mxu0 %v8133_v0 }
 0x167   : > { %v6245_v32 = vadd.f32 %v6244_v57, %v6243_v21  ;;  %v1475_v23 = vadd.f32 %v6133_v59, %v8209_v47  ;;  %v8330_v45 = vadd.f32 %v6242_v3, %v1472_v7  ;;  %7034 = vmatprep.mubr.bf16.mxu0 %v8261_v12 }
 0x169   : > { %v8335_v2 = vadd.f32 %v6245_v32, %v1475_v23  ;;  %v6134_v14 = vpop.f32.mrb[48].mxu0 }
 0x16a   : > { %v6135_v41 = vpop.f32.mrb[49].mxu0 }
 0x16b   : > { %v6246_v15 = vpop.f32.mrb[48].mxu1  ;;  %v6136_v46 = vadd.f32 %v6135_v41, %v6134_v14  ;;  %v6137_v58 = vpop.f32.mrb[50].mxu0 }
 0x16c   : > { %v6247_v38 = vpop.f32.mrb[49].mxu1  ;;  %v6138_v25 = vpop.f32.mrb[51].mxu0 }
 0x16d   : > { %v6248_v55 = vadd.f32 %v6247_v38, %v6246_v15  ;;  %v6249_v8 = vpop.f32.mrb[50].mxu1  ;;  %v1480_v27 = vadd.f32 %v6136_v46, %v8209_v47  ;;  %v6139_v12 = vadd.f32 %v6138_v25, %v6137_v58 }
 0x16e   : > { %v6250_v61 = vpop.f32.mrb[51].mxu1  ;;  %7035 = vmatmul.mubr.bf16.gmra.mrb[156].mxu0 %v764_v24 }
 0x16f   : > { %v6251_v0 = vadd.f32 %v6250_v61, %v6249_v8  ;;  %v1483_v13 = vadd.f32 %v6139_v12, %v8209_v47  ;;  %v8340_v43 = vadd.f32 %v6248_v55, %v1480_v27 }
 0x171   : > { %v8342_v63 = vadd.f32 %v6251_v0, %v1483_v13  ;;  %v6140_v34 = vpop.f32.mrb[52].mxu0 }
 0x172   : > { %v6141_v54 = vpop.f32.mrb[53].mxu0 }
 0x173   : > { %v6252_v6 = vpop.f32.mrb[52].mxu1  ;;  %v6142_v3 = vadd.f32 %v6141_v54, %v6140_v34  ;;  %v6143_v21 = vpop.f32.mrb[54].mxu0 }
 0x174   : > { %v6253_v60 = vpop.f32.mrb[53].mxu1  ;;  %v6144_v31 = vpop.f32.mrb[55].mxu0 }
 0x175   : > { %v6254_v5 = vadd.f32 %v6253_v60, %v6252_v6  ;;  %v6255_v20 = vpop.f32.mrb[54].mxu1  ;;  %v1488_v57 = vadd.f32 %v6142_v3, %v8209_v47  ;;  %v6145_v11 = vadd.f32 %v6144_v31, %v6143_v21 }
 0x176   : > { %v6256_v17 = vpop.f32.mrb[55].mxu1 }
 0x177   : > { %v6257_v33 = vadd.f32 %v6256_v17, %v6255_v20  ;;  %v1491_v29 = vadd.f32 %v6145_v11, %v8209_v47  ;;  %v8346_v42 = vadd.f32 %v6254_v5, %v1488_v57 }
 0x179   : > { %v8348_v15 = vadd.f32 %v6257_v33, %v1491_v29  ;;  %v6146_v23 = vpop.f32.mrb[56].mxu0 }
 0x17a   : > { %v6147_v1 = vpop.f32.mrb[57].mxu0 }
 0x17b   : > { %v6258_v32 = vpop.f32.mrb[56].mxu1  ;;  %v6148_v55 = vadd.f32 %v6147_v1, %v6146_v23  ;;  %v6149_v8 = vpop.f32.mrb[58].mxu0 }
 0x17c   : > { %v6259_v56 = vpop.f32.mrb[57].mxu1  ;;  %v6150_v14 = vpop.f32.mrb[59].mxu0 }
 0x17d   : > { %v6260_v7 = vadd.f32 %v6259_v56, %v6258_v32  ;;  %v6261_v59 = vpop.f32.mrb[58].mxu1  ;;  %v1496_v61 = vadd.f32 %v6148_v55, %v8209_v47  ;;  %v6151_v41 = vadd.f32 %v6150_v14, %v6149_v8 }
 0x17e   : > { %v6262_v38 = vpop.f32.mrb[59].mxu1 }
 0x17f   : > { %v6263_v30 = vadd.f32 %v6262_v38, %v6261_v59  ;;  %v1499_v46 = vadd.f32 %v6151_v41, %v8209_v47  ;;  %v8352_v58 = vadd.f32 %v6260_v7, %v1496_v61 }
 0x181   : > { %v8354_v12 = vadd.f32 %v6263_v30, %v1499_v46  ;;  %v6152_v6 = vpop.f32.mrb[60].mxu0 }
 0x182   : > { %v6153_v60 = vpop.f32.mrb[61].mxu0 }
 0x183   : > { %v6264_v0 = vpop.f32.mrb[60].mxu1  ;;  %v6154_v20 = vadd.f32 %v6153_v60, %v6152_v6  ;;  %v6155_v34 = vpop.f32.mrb[62].mxu0 }
 0x184   : > { %v6265_v24 = vpop.f32.mrb[61].mxu1  ;;  %v6156_v17 = vpop.f32.mrb[63].mxu0 }
 0x185   : > { %v6266_v25 = vadd.f32 %v6265_v24, %v6264_v0  ;;  %v6267_v27 = vpop.f32.mrb[62].mxu1  ;;  %v1504_v54 = vadd.f32 %v6154_v20, %v8209_v47  ;;  %v6157_v33 = vadd.f32 %v6156_v17, %v6155_v34 }
 0x186   : > { %v6268_v13 = vpop.f32.mrb[63].mxu1 }
 0x187   : > { %v6269_v5 = vadd.f32 %v6268_v13, %v6267_v27  ;;  %v1507_v21 = vadd.f32 %v6157_v33, %v8209_v47  ;;  %v8358_v31 = vadd.f32 %v6266_v25, %v1504_v54 }
 0x189   : > { %v8360_v29 = vadd.f32 %v6269_v5, %v1507_v21  ;;  %v6286_v56 = vpop.f32.mrb[64].mxu0 }
 0x18a   : > { %v6287_v59 = vpop.f32.mrb[65].mxu0 }
 0x18b   : > { %v6398_v3 = vpop.f32.mrb[64].mxu1  ;;  %v6288_v38 = vadd.f32 %v6287_v59, %v6286_v56  ;;  %v6289_v1 = vpop.f32.mrb[66].mxu0 }
 0x18c   : > { %v6399_v57 = vpop.f32.mrb[65].mxu1  ;;  %v6290_v30 = vpop.f32.mrb[67].mxu0 }
 0x18d   : > { %v6400_v11 = vadd.f32 %v6399_v57, %v6398_v3  ;;  %v6401_v32 = vpop.f32.mrb[66].mxu1  ;;  %v1706_v55 = vadd.f32 %v6288_v38, %v8222_v40  ;;  %v6291_v8 = vadd.f32 %v6290_v30, %v6289_v1 }
 0x18e   : > { %v6402_v7 = vpop.f32.mrb[67].mxu1 }
 0x18f   : > { %v6403_v23 = vadd.f32 %v6402_v7, %v6401_v32  ;;  %v1709_v47 = vadd.f32 %v6291_v8, %v8228_v16  ;;  %v8364_v41 = vadd.f32 %v6400_v11, %v1706_v55 }
 0x191   : > { %v6292_v24 = vpop.f32.mrb[68].mxu0  ;;  %v8366_v27 = vadd.f32 %v6403_v23, %v1709_v47 }
 0x192   : > { %v6293_v6 = vpop.f32.mrb[69].mxu0 }
 0x193   : > { %v6404_v14 = vpop.f32.mrb[68].mxu1  ;;  %v6294_v60 = vadd.f32 %v6293_v6, %v6292_v24  ;;  %v6295_v5 = vpop.f32.mrb[70].mxu0 }
 0x194   : > { %v6405_v61 = vpop.f32.mrb[69].mxu1  ;;  %v6296_v20 = vpop.f32.mrb[71].mxu0 }
 0x195   : > { %v6406_v0 = vadd.f32 %v6405_v61, %v6404_v14  ;;  %v6407_v46 = vpop.f32.mrb[70].mxu1  ;;  %v1714_v40 = vadd.f32 %v6294_v60, %v8240_v53  ;;  %v6297_v34 = vadd.f32 %v6296_v20, %v6295_v5 }
 0x196   : > { %v6408_v25 = vpop.f32.mrb[71].mxu1 }
 0x197   : > { %v6409_v13 = vadd.f32 %v6408_v25, %v6407_v46  ;;  %v1717_v16 = vadd.f32 %v6297_v34, %v8245_v50  ;;  %v8370_v33 = vadd.f32 %v6406_v0, %v1714_v40 }
 0x199   : > { %v6298_v57 = vpop.f32.mrb[72].mxu0  ;;  %v8372_v32 = vadd.f32 %v6409_v13, %v1717_v16 }
 0x19a   : > { %v6299_v56 = vpop.f32.mrb[73].mxu0 }
 0x19b   : > { %v6410_v17 = vpop.f32.mrb[72].mxu1  ;;  %v6300_v59 = vadd.f32 %v6299_v56, %v6298_v57  ;;  %v6301_v23 = vpop.f32.mrb[74].mxu0 }
 0x19c   : > { %v6411_v54 = vpop.f32.mrb[73].mxu1  ;;  %v6302_v38 = vpop.f32.mrb[75].mxu0 }
 0x19d   : > { %v6412_v3 = vadd.f32 %v6411_v54, %v6410_v17  ;;  %v6413_v21 = vpop.f32.mrb[74].mxu1  ;;  %v1722_v53 = vadd.f32 %v6300_v59, %v8252_v39  ;;  %v6303_v1 = vadd.f32 %v6302_v38, %v6301_v23  ;;  %v7200_v39 = vld [vmem:[%s10936_s5 + $0x40] sm:$0xff]  }
 0x19e   : > { %v6414_v11 = vpop.f32.mrb[75].mxu1  ;;  %6518 = vmatprep.subr.bf16.mxu1 %v7200_v39 }
 0x19f   : > { %v6415_v7 = vadd.f32 %v6414_v11, %v6413_v21  ;;  %v1725_v50 = vadd.f32 %v6303_v1, %v8257_v37  ;;  %v8376_v8 = vadd.f32 %v6412_v3, %v1722_v53  ;;  %v7201_v37 = vld [vmem:[%s10936_s5] sm:$0xff]  }
 0x1a0   : > { %6519 = vmatpush3.bf16.msra.mxu1 %v7201_v37 }
 0x1a1   : > { %v6304_v61 = vpop.f32.mrb[76].mxu0  ;;  %v8378_v46 = vadd.f32 %v6415_v7, %v1725_v50 }
 0x1a2   : > { %v6305_v24 = vpop.f32.mrb[77].mxu0 }
 0x1a3   : > { %v6416_v30 = vpop.f32.mrb[76].mxu1  ;;  %v6306_v6 = vadd.f32 %v6305_v24, %v6304_v61  ;;  %v6307_v13 = vpop.f32.mrb[78].mxu0 }
 0x1a4   : > { %v6417_v55 = vpop.f32.mrb[77].mxu1  ;;  %v6308_v60 = vpop.f32.mrb[79].mxu0 }
 0x1a5   : > { %v6418_v14 = vadd.f32 %v6417_v55, %v6416_v30  ;;  %v6419_v47 = vpop.f32.mrb[78].mxu1  ;;  %v1730_v5 = vadd.f32 %v6306_v6, %v8267_v48  ;;  %v6309_v20 = vadd.f32 %v6308_v60, %v6307_v13 }
 0x1a6   : > { %v6420_v0 = vpop.f32.mrb[79].mxu1 }
 0x1a7   : > { %v6421_v25 = vadd.f32 %v6420_v0, %v6419_v47  ;;  %v1733_v34 = vadd.f32 %v6309_v20, %v8269_v51  ;;  %v8388_v16 = vadd.f32 %v6418_v14, %v1730_v5 }
 0x1a9   : > { %v6310_v21 = vpop.f32.mrb[80].mxu0  ;;  %v8390_v11 = vadd.f32 %v6421_v25, %v1733_v34 }
 0x1aa   : > { %v6311_v56 = vpop.f32.mrb[81].mxu0 }
 0x1ab   : > { %v6422_v40 = vpop.f32.mrb[80].mxu1  ;;  %v6312_v59 = vadd.f32 %v6311_v56, %v6310_v21  ;;  %v6313_v23 = vpop.f32.mrb[82].mxu0 }
 0x1ac   : > { %v6423_v17 = vpop.f32.mrb[81].mxu1  ;;  %v6314_v48 = vpop.f32.mrb[83].mxu0 }
 0x1ad   : > { %v6424_v54 = vadd.f32 %v6423_v17, %v6422_v40  ;;  %v6425_v3 = vpop.f32.mrb[82].mxu1  ;;  %v1738_v38 = vadd.f32 %v6312_v59, %v8275_v36  ;;  %v6315_v53 = vadd.f32 %v6314_v48, %v6313_v23  ;;  %v7202_v36 = vld [vmem:[%s10936_s5 + $0x48] sm:$0xff]  }
 0x1ae   : > { %v6426_v57 = vpop.f32.mrb[83].mxu1  ;;  %6520 = vmatprep.subr.bf16.mxu1 %v7202_v36 }
 0x1af   : > { %v6427_v7 = vadd.f32 %v6426_v57, %v6425_v3  ;;  %v1741_v51 = vadd.f32 %v6315_v53, %v8277_v49  ;;  %v8394_v50 = vadd.f32 %v6424_v54, %v1738_v38  ;;  %v7203_v49 = vld [vmem:[%s10936_s5 + $0x8] sm:$0xff]  }
 0x1b0   : > { %6521 = vmatpush3.bf16.msra.mxu1 %v7203_v49 }
 0x1b1   : > { %v6316_v47 = vpop.f32.mrb[84].mxu0  ;;  %v8396_v0 = vadd.f32 %v6427_v7, %v1741_v51 }
 0x1b2   : > { %v6317_v24 = vpop.f32.mrb[85].mxu0 }
 0x1b3   : > { %v6428_v1 = vpop.f32.mrb[84].mxu1  ;;  %v6318_v6 = vadd.f32 %v6317_v24, %v6316_v47  ;;  %v6319_v13 = vpop.f32.mrb[86].mxu0 }
 0x1b4   : > { %v6429_v30 = vpop.f32.mrb[85].mxu1  ;;  %v6320_v39 = vpop.f32.mrb[87].mxu0 }
 0x1b5   : > { %v6430_v55 = vadd.f32 %v6429_v30, %v6428_v1  ;;  %v6431_v14 = vpop.f32.mrb[86].mxu1  ;;  %v1746_v37 = vadd.f32 %v6318_v6, %v8283_v9  ;;  %v6321_v60 = vadd.f32 %v6320_v39, %v6319_v13 }
 0x1b6   : > { %v6432_v61 = vpop.f32.mrb[87].mxu1 }
 0x1b7   : > { %v6433_v25 = vadd.f32 %v6432_v61, %v6431_v14  ;;  %v1749_v20 = vadd.f32 %v6321_v60, %v8285_v4  ;;  %v8406_v34 = vadd.f32 %v6430_v55, %v1746_v37 }
 0x1b9   : > { %v6322_v3 = vpop.f32.mrb[88].mxu0  ;;  %v8408_v57 = vadd.f32 %v6433_v25, %v1749_v20 }
 0x1ba   : > { %v6323_v56 = vpop.f32.mrb[89].mxu0 }
 0x1bb   : > { %v6434_v5 = vpop.f32.mrb[88].mxu1  ;;  %v6324_v59 = vadd.f32 %v6323_v56, %v6322_v3  ;;  %v6325_v23 = vpop.f32.mrb[90].mxu0 }
 0x1bc   : > { %v6435_v40 = vpop.f32.mrb[89].mxu1  ;;  %v6326_v9 = vpop.f32.mrb[91].mxu0 }
 0x1bd   : > { %v6436_v17 = vadd.f32 %v6435_v40, %v6434_v5  ;;  %v6437_v54 = vpop.f32.mrb[90].mxu1  ;;  %v1754_v48 = vadd.f32 %v6324_v59, %v8291_v44  ;;  %v6327_v38 = vadd.f32 %v6326_v9, %v6325_v23  ;;  %v7204_v44 = vld [vmem:[%s10936_s5 + $0x50] sm:$0xff]  }
 0x1be   : > { %v6438_v21 = vpop.f32.mrb[91].mxu1  ;;  %6522 = vmatprep.subr.bf16.mxu1 %v7204_v44 }
 0x1bf   : > { %v6439_v7 = vadd.f32 %v6438_v21, %v6437_v54  ;;  %v1757_v4 = vadd.f32 %v6327_v38, %v8293_v19  ;;  %v8412_v51 = vadd.f32 %v6436_v17, %v1754_v48  ;;  %v7205_v19 = vld [vmem:[%s10936_s5 + $0x10] sm:$0xff]  }
 0x1c0   : > { %6523 = vmatpush3.bf16.msra.mxu1 %v7205_v19 }
 0x1c1   : > { %v6328_v14 = vpop.f32.mrb[92].mxu0  ;;  %v8414_v61 = vadd.f32 %v6439_v7, %v1757_v4 }
 0x1c2   : > { %v6329_v24 = vpop.f32.mrb[93].mxu0 }
 0x1c3   : > { %v6440_v53 = vpop.f32.mrb[92].mxu1  ;;  %v6330_v6 = vadd.f32 %v6329_v24, %v6328_v14  ;;  %v6331_v13 = vpop.f32.mrb[94].mxu0 }
 0x1c4   : > { %v6441_v1 = vpop.f32.mrb[93].mxu1  ;;  %v6332_v36 = vpop.f32.mrb[95].mxu0 }
 0x1c5   : > { %v6442_v30 = vadd.f32 %v6441_v1, %v6440_v53  ;;  %v6443_v55 = vpop.f32.mrb[94].mxu1  ;;  %v1762_v49 = vadd.f32 %v6330_v6, %v8299_v52  ;;  %v6333_v39 = vadd.f32 %v6332_v36, %v6331_v13 }
 0x1c6   : > { %v6444_v47 = vpop.f32.mrb[95].mxu1 }
 0x1c7   : > { %v6445_v25 = vadd.f32 %v6444_v47, %v6443_v55  ;;  %v1765_v60 = vadd.f32 %v6333_v39, %v8301_v35  ;;  %v8424_v20 = vadd.f32 %v6442_v30, %v1762_v49 }
 0x1c9   : > { %v6334_v54 = vpop.f32.mrb[96].mxu0  ;;  %v8426_v21 = vadd.f32 %v6445_v25, %v1765_v60 }
 0x1ca   : > { %v6335_v56 = vpop.f32.mrb[97].mxu0 }
 0x1cb   : > { %v6446_v37 = vpop.f32.mrb[96].mxu1  ;;  %v6336_v59 = vadd.f32 %v6335_v56, %v6334_v54  ;;  %v6337_v23 = vpop.f32.mrb[98].mxu0 }
 0x1cc   : > { %v6447_v5 = vpop.f32.mrb[97].mxu1  ;;  %v6338_v52 = vpop.f32.mrb[99].mxu0 }
 0x1cd   : > { %v6448_v40 = vadd.f32 %v6447_v5, %v6446_v37  ;;  %v6449_v17 = vpop.f32.mrb[98].mxu1  ;;  %v1770_v9 = vadd.f32 %v6336_v59, %v8306_v26  ;;  %v6339_v48 = vadd.f32 %v6338_v52, %v6337_v23 }
 0x1ce   : > { %v6450_v3 = vpop.f32.mrb[99].mxu1 }
 0x1cf   : > { %v6451_v7 = vadd.f32 %v6450_v3, %v6449_v17  ;;  %v1773_v35 = vadd.f32 %v6339_v48, %v8309_v62  ;;  %v8430_v4 = vadd.f32 %v6448_v40, %v1770_v9 }
 0x1d1   : > { %v6340_v55 = vpop.f32.mrb[100].mxu0  ;;  %v8432_v47 = vadd.f32 %v6451_v7, %v1773_v35 }
 0x1d2   : > { %v6341_v24 = vpop.f32.mrb[101].mxu0 }
 0x1d3   : > { %v6452_v38 = vpop.f32.mrb[100].mxu1  ;;  %v6342_v6 = vadd.f32 %v6341_v24, %v6340_v55  ;;  %v6343_v13 = vpop.f32.mrb[102].mxu0 }
 0x1d4   : > { %v6453_v53 = vpop.f32.mrb[101].mxu1  ;;  %v6344_v44 = vpop.f32.mrb[103].mxu0 }
 0x1d5   : > { %v6454_v1 = vadd.f32 %v6453_v53, %v6452_v38  ;;  %v6455_v30 = vpop.f32.mrb[102].mxu1  ;;  %v1778_v26 = vadd.f32 %v6342_v6, %v8314_v22  ;;  %v6345_v19 = vadd.f32 %v6344_v44, %v6343_v13 }
 0x1d6   : > { %v6456_v14 = vpop.f32.mrb[103].mxu1 }
 0x1d7   : > { %v6457_v25 = vadd.f32 %v6456_v14, %v6455_v30  ;;  %v1781_v62 = vadd.f32 %v6345_v19, %v8317_v28  ;;  %v8436_v39 = vadd.f32 %v6454_v1, %v1778_v26 }
 0x1d9   : > { %v6346_v5 = vpop.f32.mrb[104].mxu0  ;;  %v8438_v17 = vadd.f32 %v6457_v25, %v1781_v62 }
 0x1da   : > { %v6347_v54 = vpop.f32.mrb[105].mxu0 }
 0x1db   : > { %v6458_v36 = vpop.f32.mrb[104].mxu1  ;;  %v6348_v56 = vadd.f32 %v6347_v54, %v6346_v5  ;;  %v6349_v7 = vpop.f32.mrb[106].mxu0 }
 0x1dc   : > { %v6459_v49 = vpop.f32.mrb[105].mxu1  ;;  %v6350_v59 = vpop.f32.mrb[107].mxu0 }
 0x1dd   : > { %v6460_v37 = vadd.f32 %v6459_v49, %v6458_v36  ;;  %v6461_v60 = vpop.f32.mrb[106].mxu1  ;;  %v1786_v22 = vadd.f32 %v6348_v56, %v8322_v18  ;;  %v6351_v23 = vadd.f32 %v6350_v59, %v6349_v7 }
 0x1de   : > { %v6462_v40 = vpop.f32.mrb[107].mxu1 }
 0x1df   : > { %v6463_v3 = vadd.f32 %v6462_v40, %v6461_v60  ;;  %v1789_v28 = vadd.f32 %v6351_v23, %v8325_v10  ;;  %v8442_v48 = vadd.f32 %v6460_v37, %v1786_v22 }
 0x1e1   : > { %v6352_v53 = vpop.f32.mrb[108].mxu0  ;;  %v8444_v30 = vadd.f32 %v6463_v3, %v1789_v28 }
 0x1e2   : > { %v6353_v55 = vpop.f32.mrb[109].mxu0 }
 0x1e3   : > { %v6464_v52 = vpop.f32.mrb[108].mxu1  ;;  %v6354_v24 = vadd.f32 %v6353_v55, %v6352_v53  ;;  %v6355_v25 = vpop.f32.mrb[110].mxu0 }
 0x1e4   : > { %v6465_v9 = vpop.f32.mrb[109].mxu1  ;;  %v6356_v6 = vpop.f32.mrb[111].mxu0 }
 0x1e5   : > { %v6466_v38 = vadd.f32 %v6465_v9, %v6464_v52  ;;  %v6467_v35 = vpop.f32.mrb[110].mxu1  ;;  %v1794_v18 = vadd.f32 %v6354_v24, %v8330_v45  ;;  %v6357_v13 = vadd.f32 %v6356_v6, %v6355_v25 }
 0x1e6   : > { %v6468_v1 = vpop.f32.mrb[111].mxu1 }
 0x1e7   : > { %v6469_v14 = vadd.f32 %v6468_v1, %v6467_v35  ;;  %v1797_v10 = vadd.f32 %v6357_v13, %v8335_v2  ;;  %v8448_v19 = vadd.f32 %v6466_v38, %v1794_v18 }
 0x1e9   : > { %v6358_v49 = vpop.f32.mrb[112].mxu0  ;;  %v8450_v60 = vadd.f32 %v6469_v14, %v1797_v10 }
 0x1ea   : > { %v6359_v5 = vpop.f32.mrb[113].mxu0 }
 0x1eb   : > { %v6470_v44 = vpop.f32.mrb[112].mxu1  ;;  %v6360_v54 = vadd.f32 %v6359_v5, %v6358_v49  ;;  %v6361_v3 = vpop.f32.mrb[114].mxu0 }
 0x1ec   : > { %v6471_v26 = vpop.f32.mrb[113].mxu1  ;;  %v6362_v56 = vpop.f32.mrb[115].mxu0 }
 0x1ed   : > { %v6472_v36 = vadd.f32 %v6471_v26, %v6470_v44  ;;  %v6473_v62 = vpop.f32.mrb[114].mxu1  ;;  %v1802_v45 = vadd.f32 %v6360_v54, %v8340_v43  ;;  %v6363_v7 = vadd.f32 %v6362_v56, %v6361_v3 }
 0x1ee   : > { %v6474_v37 = vpop.f32.mrb[115].mxu1 }
 0x1ef   : > { %v6475_v40 = vadd.f32 %v6474_v37, %v6473_v62  ;;  %v1805_v2 = vadd.f32 %v6363_v7, %v8342_v63  ;;  %v8454_v23 = vadd.f32 %v6472_v36, %v1802_v45 }
 0x1f1   : > { %v6364_v9 = vpop.f32.mrb[116].mxu0  ;;  %v8456_v35 = vadd.f32 %v6475_v40, %v1805_v2 }
 0x1f2   : > { %v6365_v53 = vpop.f32.mrb[117].mxu0 }
 0x1f3   : > { %v6476_v59 = vpop.f32.mrb[116].mxu1  ;;  %v6366_v55 = vadd.f32 %v6365_v53, %v6364_v9  ;;  %v6367_v14 = vpop.f32.mrb[118].mxu0 }
 0x1f4   : > { %v6477_v22 = vpop.f32.mrb[117].mxu1  ;;  %v6368_v24 = vpop.f32.mrb[119].mxu0 }
 0x1f5   : > { %v6478_v52 = vadd.f32 %v6477_v22, %v6476_v59  ;;  %v6479_v28 = vpop.f32.mrb[118].mxu1  ;;  %v1810_v43 = vadd.f32 %v6366_v55, %v8346_v42  ;;  %v6369_v25 = vadd.f32 %v6368_v24, %v6367_v14 }
 0x1f6   : > { %v6480_v38 = vpop.f32.mrb[119].mxu1 }
 0x1f7   : > { %v6481_v1 = vadd.f32 %v6480_v38, %v6479_v28  ;;  %v1813_v63 = vadd.f32 %v6369_v25, %v8348_v15  ;;  %v8460_v13 = vadd.f32 %v6478_v52, %v1810_v43 }
 0x1f9   : > { %v6370_v26 = vpop.f32.mrb[120].mxu0  ;;  %v8462_v62 = vadd.f32 %v6481_v1, %v1813_v63 }
 0x1fa   : > { %v6371_v49 = vpop.f32.mrb[121].mxu0 }
 0x1fb   : > { %v6482_v6 = vpop.f32.mrb[120].mxu1  ;;  %v6372_v5 = vadd.f32 %v6371_v49, %v6370_v26  ;;  %v6373_v40 = vpop.f32.mrb[122].mxu0 }
 0x1fc   : > { %v6483_v18 = vpop.f32.mrb[121].mxu1  ;;  %v6374_v54 = vpop.f32.mrb[123].mxu0 }
 0x1fd   : > { %v6484_v44 = vadd.f32 %v6483_v18, %v6482_v6  ;;  %v6485_v10 = vpop.f32.mrb[122].mxu1  ;;  %v1818_v42 = vadd.f32 %v6372_v5, %v8352_v58  ;;  %v6375_v3 = vadd.f32 %v6374_v54, %v6373_v40 }
 0x1fe   : > { %v6486_v36 = vpop.f32.mrb[123].mxu1 }
 0x1ff   : > { %v6487_v37 = vadd.f32 %v6486_v36, %v6485_v10  ;;  %v1821_v15 = vadd.f32 %v6375_v3, %v8354_v12  ;;  %v8466_v7 = vadd.f32 %v6484_v44, %v1818_v42 }
 0x201   : > { %v6376_v22 = vpop.f32.mrb[124].mxu0  ;;  %v8468_v28 = vadd.f32 %v6487_v37, %v1821_v15 }
 0x202   : > { %v6377_v9 = vpop.f32.mrb[125].mxu0 }
 0x203   : > { %v6488_v56 = vpop.f32.mrb[124].mxu1  ;;  %v6378_v53 = vadd.f32 %v6377_v9, %v6376_v22  ;;  %v6379_v1 = vpop.f32.mrb[126].mxu0 }
 0x204   : > { %v6489_v45 = vpop.f32.mrb[125].mxu1  ;;  %v6380_v55 = vpop.f32.mrb[127].mxu0 }
 0x205   : > { %v6490_v59 = vadd.f32 %v6489_v45, %v6488_v56  ;;  %v6491_v2 = vpop.f32.mrb[126].mxu1  ;;  %v1826_v58 = vadd.f32 %v6378_v53, %v8358_v31  ;;  %v6381_v14 = vadd.f32 %v6380_v55, %v6379_v1 }
 0x206   : > { %v6492_v52 = vpop.f32.mrb[127].mxu1 }
 0x207   : > { %v6493_v38 = vadd.f32 %v6492_v52, %v6491_v2  ;;  %v1829_v24 = vadd.f32 %v6381_v14, %v8360_v29  ;;  %v8472_v12 = vadd.f32 %v6490_v59, %v1826_v58 }
 0x209   : > { %v7008_v43 = vpop.f32.mrb[128].mxu0  ;;  %v8474_v25 = vadd.f32 %v6493_v38, %v1829_v24 }
 0x20a   : > { %v8477_v6 = vadd.f32 %v7008_v43, %v8370_v33  ;;  %v2027_v63 = vpop.f32.mrb[129].mxu0 }
 0x20b   : > { %v8480_v18 = vadd.f32 %v2027_v63, %v8364_v41  ;;  %v7009_v44 = vpop.f32.mrb[130].mxu0 }
 0x20c   : > { %v8483_v10 = vadd.f32 %v7009_v44, %v8372_v32  ;;  %v2030_v31 = vpop.f32.mrb[131].mxu0  ;;  %v2196_v41 = vmul.f32 %v8477_v6, %v8477_v6 }
 0x20d   : > { %v8486_v26 = vadd.f32 %v2030_v31, %v8366_v27  ;;  %v2194_v29 = vmul.f32 %v8480_v18, %v8480_v18 }
 0x20e   : > { %v2197_v40 = vmul.f32 %v8483_v10, %v8483_v10 }
 0x20f   : > { %v2156_v36 = vadd.f32 %v8486_v26, %v8480_v18  ;;  %v2195_v33 = vmul.f32 %v8486_v26, %v8486_v26 }
 0x211   : > { %v2157_v49 = vadd.f32 %v2156_v36, %v8477_v6  ;;  %v2226_v32 = vadd.f32 %v2195_v33, %v2194_v29  ;;  %v7012_v37 = vpop.f32.mrb[132].mxu0 }
 0x212   : > { %v8498_v5 = vadd.f32 %v7012_v37, %v8388_v16  ;;  %v2043_v27 = vpop.f32.mrb[133].mxu0 }
 0x213   : > { %v2227_v54 = vadd.f32 %v2226_v32, %v2196_v41  ;;  %v8503_v42 = vadd.f32 %v2043_v27, %v8376_v8  ;;  %v2158_v3 = vadd.f32 %v2157_v49, %v8483_v10  ;;  %v7013_v56 = vpop.f32.mrb[134].mxu0 }
 0x214   : > { %v8507_v15 = vadd.f32 %v7013_v56, %v8390_v11  ;;  %v2046_v45 = vpop.f32.mrb[135].mxu0  ;;  %v2200_v11 = vmul.f32 %v8498_v5, %v8498_v5 }
 0x215   : > { %v2159_v59 = vadd.f32 %v2158_v3, %v8503_v42  ;;  %v2198_v16 = vmul.f32 %v8503_v42, %v8503_v42  ;;  %v2228_v2 = vadd.f32 %v2227_v54, %v2197_v40  ;;  %v8513_v22 = vadd.f32 %v2046_v45, %v8378_v46 }
 0x216   : > { %v2201_v46 = vmul.f32 %v8507_v15, %v8507_v15 }
 0x217   : > { %v2229_v52 = vadd.f32 %v2228_v2, %v2198_v16  ;;  %v2160_v8 = vadd.f32 %v2159_v59, %v8513_v22  ;;  %v2199_v9 = vmul.f32 %v8513_v22, %v8513_v22 }
 0x219   : > { %v2161_v38 = vadd.f32 %v2160_v8, %v8498_v5  ;;  %v2230_v53 = vadd.f32 %v2229_v52, %v2199_v9  ;;  %v7016_v1 = vpop.f32.mrb[136].mxu0 }
 0x21a   : > { %v8522_v55 = vadd.f32 %v7016_v1, %v8406_v34  ;;  %v2059_v58 = vpop.f32.mrb[137].mxu0 }
 0x21b   : > { %v2231_v14 = vadd.f32 %v2230_v53, %v2200_v11  ;;  %v8527_v24 = vadd.f32 %v2059_v58, %v8394_v50  ;;  %v2162_v43 = vadd.f32 %v2161_v38, %v8507_v15  ;;  %v7017_v63 = vpop.f32.mrb[138].mxu0 }
 0x21c   : > { %v8531_v44 = vadd.f32 %v7017_v63, %v8408_v57  ;;  %v2062_v31 = vpop.f32.mrb[139].mxu0  ;;  %v2204_v57 = vmul.f32 %v8522_v55, %v8522_v55 }
 0x21d   : > { %v2163_v29 = vadd.f32 %v2162_v43, %v8527_v24  ;;  %v2202_v34 = vmul.f32 %v8527_v24, %v8527_v24  ;;  %v2232_v36 = vadd.f32 %v2231_v14, %v2201_v46  ;;  %v8537_v33 = vadd.f32 %v2062_v31, %v8396_v0 }
 0x21e   : > { %v2205_v0 = vmul.f32 %v8531_v44, %v8531_v44 }
 0x21f   : > { %v2233_v41 = vadd.f32 %v2232_v36, %v2202_v34  ;;  %v2164_v50 = vadd.f32 %v2163_v29, %v8537_v33  ;;  %v2203_v49 = vmul.f32 %v8537_v33, %v8537_v33 }
 0x221   : > { %v2165_v32 = vadd.f32 %v2164_v50, %v8522_v55  ;;  %v2234_v37 = vadd.f32 %v2233_v41, %v2203_v49  ;;  %v7020_v27 = vpop.f32.mrb[140].mxu0 }
 0x222   : > { %v8546_v40 = vadd.f32 %v7020_v27, %v8424_v20  ;;  %v2075_v54 = vpop.f32.mrb[141].mxu0 }
 0x223   : > { %v2235_v3 = vadd.f32 %v2234_v37, %v2204_v57  ;;  %v8551_v56 = vadd.f32 %v2075_v54, %v8412_v51  ;;  %v2166_v45 = vadd.f32 %v2165_v32, %v8531_v44  ;;  %v7021_v59 = vpop.f32.mrb[142].mxu0 }
 0x224   : > { %v8555_v16 = vadd.f32 %v7021_v59, %v8426_v21  ;;  %v2078_v2 = vpop.f32.mrb[143].mxu0  ;;  %v2208_v21 = vmul.f32 %v8546_v40, %v8546_v40 }
 0x225   : > { %v2167_v52 = vadd.f32 %v2166_v45, %v8551_v56  ;;  %v2206_v20 = vmul.f32 %v8551_v56, %v8551_v56  ;;  %v2236_v8 = vadd.f32 %v2235_v3, %v2205_v0  ;;  %v8561_v9 = vadd.f32 %v2078_v2, %v8414_v61 }
 0x226   : > { %v2209_v61 = vmul.f32 %v8555_v16, %v8555_v16 }
 0x227   : > { %v2237_v11 = vadd.f32 %v2236_v8, %v2206_v20  ;;  %v2168_v51 = vadd.f32 %v2167_v52, %v8561_v9  ;;  %v2207_v38 = vmul.f32 %v8561_v9, %v8561_v9 }
 0x229   : > { %v2169_v53 = vadd.f32 %v2168_v51, %v8546_v40  ;;  %v2238_v1 = vadd.f32 %v2237_v11, %v2207_v38  ;;  %v7024_v58 = vpop.f32.mrb[144].mxu0 }
 0x22a   : > { %v8570_v46 = vadd.f32 %v7024_v58, %v8436_v39  ;;  %v2091_v14 = vpop.f32.mrb[145].mxu0 }
 0x22b   : > { %v2239_v43 = vadd.f32 %v2238_v1, %v2208_v21  ;;  %v8575_v63 = vadd.f32 %v2091_v14, %v8430_v4  ;;  %v2170_v31 = vadd.f32 %v2169_v53, %v8555_v16  ;;  %v7025_v29 = vpop.f32.mrb[146].mxu0 }
 0x22c   : > { %v8579_v34 = vadd.f32 %v7025_v29, %v8438_v17  ;;  %v2094_v36 = vpop.f32.mrb[147].mxu0  ;;  %v2212_v17 = vmul.f32 %v8570_v46, %v8570_v46 }
 0x22d   : > { %v2171_v41 = vadd.f32 %v2170_v31, %v8575_v63  ;;  %v2210_v39 = vmul.f32 %v8575_v63, %v8575_v63  ;;  %v2240_v50 = vadd.f32 %v2239_v43, %v2209_v61  ;;  %v8585_v49 = vadd.f32 %v2094_v36, %v8432_v47 }
 0x22e   : > { %v2213_v47 = vmul.f32 %v8579_v34, %v8579_v34 }
 0x22f   : > { %v2241_v57 = vadd.f32 %v2240_v50, %v2210_v39  ;;  %v2172_v4 = vadd.f32 %v2171_v41, %v8585_v49  ;;  %v2211_v32 = vmul.f32 %v8585_v49, %v8585_v49 }
 0x231   : > { %v2173_v37 = vadd.f32 %v2172_v4, %v8570_v46  ;;  %v2242_v27 = vadd.f32 %v2241_v57, %v2211_v32  ;;  %v7028_v54 = vpop.f32.mrb[148].mxu0 }
 0x232   : > { %v8594_v0 = vadd.f32 %v7028_v54, %v8448_v19  ;;  %v2107_v3 = vpop.f32.mrb[149].mxu0 }
 0x233   : > { %v2243_v45 = vadd.f32 %v2242_v27, %v2212_v17  ;;  %v8599_v59 = vadd.f32 %v2107_v3, %v8442_v48  ;;  %v2174_v2 = vadd.f32 %v2173_v37, %v8579_v34  ;;  %v7029_v52 = vpop.f32.mrb[150].mxu0 }
 0x234   : > { %v8603_v20 = vadd.f32 %v7029_v52, %v8450_v60  ;;  %v2110_v8 = vpop.f32.mrb[151].mxu0  ;;  %v2216_v60 = vmul.f32 %v8594_v0, %v8594_v0 }
 0x235   : > { %v2175_v11 = vadd.f32 %v2174_v2, %v8599_v59  ;;  %v2214_v19 = vmul.f32 %v8599_v59, %v8599_v59  ;;  %v2244_v51 = vadd.f32 %v2243_v45, %v2213_v47  ;;  %v8609_v38 = vadd.f32 %v2110_v8, %v8444_v30 }
 0x236   : > { %v2217_v30 = vmul.f32 %v8603_v20, %v8603_v20 }
 0x237   : > { %v2245_v21 = vadd.f32 %v2244_v51, %v2214_v19  ;;  %v2176_v48 = vadd.f32 %v2175_v11, %v8609_v38  ;;  %v2215_v53 = vmul.f32 %v8609_v38, %v8609_v38 }
 0x239   : > { %v2177_v1 = vadd.f32 %v2176_v48, %v8594_v0  ;;  %v2246_v58 = vadd.f32 %v2245_v21, %v2215_v53  ;;  %v7032_v14 = vpop.f32.mrb[152].mxu0 }
 0x23a   : > { %v8618_v61 = vadd.f32 %v7032_v14, %v8460_v13  ;;  %v2123_v43 = vpop.f32.mrb[153].mxu0 }
 0x23b   : > { %v2247_v31 = vadd.f32 %v2246_v58, %v2216_v60  ;;  %v8623_v29 = vadd.f32 %v2123_v43, %v8454_v23  ;;  %v2178_v36 = vadd.f32 %v2177_v1, %v8603_v20  ;;  %v7033_v41 = vpop.f32.mrb[154].mxu0 }
 0x23c   : > { %v8627_v39 = vadd.f32 %v7033_v41, %v8462_v62  ;;  %v2126_v50 = vpop.f32.mrb[155].mxu0  ;;  %v2220_v62 = vmul.f32 %v8618_v61, %v8618_v61 }
 0x23d   : > { %v2179_v57 = vadd.f32 %v2178_v36, %v8623_v29  ;;  %v2218_v13 = vmul.f32 %v8623_v29, %v8623_v29  ;;  %v2248_v4 = vadd.f32 %v2247_v31, %v2217_v30  ;;  %v8633_v32 = vadd.f32 %v2126_v50, %v8456_v35 }
 0x23e   : > { %v2221_v35 = vmul.f32 %v8627_v39, %v8627_v39 }
 0x23f   : > { %v2249_v17 = vadd.f32 %v2248_v4, %v2218_v13  ;;  %v2180_v23 = vadd.f32 %v2179_v57, %v8633_v32  ;;  %v2219_v37 = vmul.f32 %v8633_v32, %v8633_v32  ;;  %v7212_v57 = vld [vmem:[%s10936_s5 + $0xc0] sm:$0xff]  }
 0x240   : > { %v7213_v13 = vld [vmem:[%s10936_s5 + $0x80] sm:$0xff]   ;;  %6630 = vmatprep.subr.bf16.mxu0 %v7212_v57  ;;  %v7206_v57 = vld [vmem:[%s10936_s5 + $0x58] sm:$0xff]  }
 0x241   : > { %v2181_v27 = vadd.f32 %v2180_v23, %v8618_v61  ;;  %v2250_v54 = vadd.f32 %v2249_v17, %v2219_v37  ;;  %v7036_v3 = vpop.f32.mrb[156].mxu0  ;;  %6631 = vmatpush3.bf16.msra.mxu0 %v7213_v13  ;;  %v7223_v13 = vld [vmem:[%s10936_s5 + $0xa0] sm:$0xff]   ;;  %6524 = vmatprep.subr.bf16.mxu1 %v7206_v57  ;;  %v7211_v57 = vld [vmem:[%s10936_s5 + $0x28] sm:$0xff]  }
 0x242   : > { %v8642_v47 = vadd.f32 %v7036_v3, %v8472_v12  ;;  %v2139_v45 = vpop.f32.mrb[157].mxu0 }
 0x243   : > { %v2251_v2 = vadd.f32 %v2250_v54, %v2220_v62  ;;  %v8647_v52 = vadd.f32 %v2139_v45, %v8466_v7  ;;  %v2182_v8 = vadd.f32 %v2181_v27, %v8627_v39  ;;  %v7037_v11 = vpop.f32.mrb[158].mxu0  ;;  %v7214_v62 = vld [vmem:[%s10936_s5 + $0xc8] sm:$0xff]  }
 0x244   : > { %v8651_v19 = vadd.f32 %v7037_v11, %v8474_v25  ;;  %v2142_v51 = vpop.f32.mrb[159].mxu0  ;;  %v2224_v25 = vmul.f32 %v8642_v47, %v8642_v47  ;;  %v7216_v27 = vld [vmem:[%s10936_s5 + $0x88] sm:$0xff]   ;;  %6632 = vmatprep.subr.bf16.mxu0 %v7214_v62  ;;  %v7207_v62 = vld [vmem:[%s10936_s5 + $0x18] sm:$0xff]  }
 0x245   : > { %v2183_v21 = vadd.f32 %v2182_v8, %v8647_v52  ;;  %v2222_v12 = vmul.f32 %v8647_v52, %v8647_v52  ;;  %v2252_v48 = vadd.f32 %v2251_v2, %v2221_v35  ;;  %v8657_v53 = vadd.f32 %v2142_v51, %v8468_v28  ;;  %6633 = vmatpush3.bf16.msra.mxu0 %v7216_v27  ;;  %v7218_v2 = vld [vmem:[%s10936_s5 + $0xd0] sm:$0xff]  }
 0x246   : > { %v2225_v43 = vmul.f32 %v8651_v19, %v8651_v19  ;;  %v7219_v8 = vld [vmem:[%s10936_s5 + $0x90] sm:$0xff]   ;;  %6634 = vmatprep.subr.bf16.mxu0 %v7218_v2  ;;  %6525 = vmatpush3.bf16.msra.mxu1 %v7207_v62  ;;  %v7230_v62 = vld [vmem:[%s10936_s5 + $0xf8] sm:$0xff]  }
 0x247   : > { %v2253_v60 = vadd.f32 %v2252_v48, %v2222_v12  ;;  %v2184_v7 = vadd.f32 %v2183_v21, %v8657_v53  ;;  %v2223_v1 = vmul.f32 %v8657_v53, %v8657_v53 }
 0x249   : > { %v2185_v58 = vadd.f32 %v2184_v7, %v8642_v47  ;;  %v2254_v14 = vadd.f32 %v2253_v60, %v2223_v1  ;;  %6635 = vmatpush3.bf16.msra.mxu0 %v7219_v8  ;;  %v7220_v7 = vld [vmem:[%s10936_s5 + $0xd8] sm:$0xff]  }
 0x24a   : > { %v7221_v1 = vld [vmem:[%s10936_s5 + $0x98] sm:$0xff]   ;;  %6636 = vmatprep.subr.bf16.mxu0 %v7220_v7 }
 0x24b   : > { %v2186_v30 = vadd.f32 %v2185_v58, %v8651_v19  ;;  %v2255_v31 = vadd.f32 %v2254_v14, %v2224_v25 }
 0x24d   : > { %v2187_v28 = vrot.slane %v2186_v30, 4  ;;  %v2256_v36 = vadd.f32 %v2255_v31, %v2225_v43  ;;  %6637 = vmatpush3.bf16.msra.mxu0 %v7221_v1  ;;  %v7222_v31 = vld [vmem:[%s10936_s5 + $0xe0] sm:$0xff]   ;;  %v7210_v1 = vld [vmem:[%s10936_s5 + $0x68] sm:$0xff]  }
 0x24e   : > { %6638 = vmatprep.subr.bf16.mxu0 %v7222_v31  ;;  %v7228_v31 = vld [vmem:[%s10936_s5 + $0xf0] sm:$0xff]  }
 0x24f   : > { %v2188_v41 = vadd.f32 %v2187_v28, %v2186_v30  ;;  %v2257_v50 = vrot.slane %v2256_v36, 4 }
 0x251   : > { %v2189_v4 = vrot.slane %v2188_v41, 2  ;;  %v2258_v17 = vadd.f32 %v2257_v50, %v2256_v36  ;;  %6639 = vmatpush3.bf16.msra.mxu0 %v7223_v13  ;;  %v7215_v13 = vld [vmem:[%s10936_s5 + $0x70] sm:$0xff]  }
 0x253   : > { %v2190_v23 = vadd.f32 %v2189_v4, %v2188_v41  ;;  %v2259_v37 = vrot.slane %v2258_v17, 2 }
 0x255   : > { %v2191_v54 = vrot.slane %v2190_v23, 1  ;;  %v2260_v3 = vadd.f32 %v2259_v37, %v2258_v17 }
 0x257   : > { %v2192_v45 = vadd.f32 %v2191_v54, %v2190_v23  ;;  %v2261_v35 = vrot.slane %v2260_v3, 1 }
 0x259   : > { %v8686_v11 = vmul.f32 0.00390625, %v2192_v45  ;;  %v2262_v51 = vadd.f32 %v2261_v35, %v2260_v3 }
 0x25b   : > { %v2263_v21 = vmul.f32 0.00390625, %v2262_v51  ;;  %v2264_v12 = vmul.f32 %v8686_v11, %v8686_v11  ;;  %v2295_v48 = vsub.f32 %v8647_v52, %v8686_v11  ;;  %v2296_v60 = vsub.f32 %v8657_v53, %v8686_v11  ;;  %v7208_v51 = vld [vmem:[%s10936_s5 + $0x60] sm:$0xff]   ;;  %v7227_v52 = vld [vmem:[%s10936_s5 + $0x38] sm:$0xff]  }
 0x25c   : > { %v2276_v58 = vsub.f32 %v8537_v33, %v8686_v11  ;;  %v2279_v43 = vsub.f32 %v8551_v56, %v8686_v11  ;;  %v2280_v30 = vsub.f32 %v8561_v9, %v8686_v11  ;;  %v2281_v28 = vsub.f32 %v8546_v40, %v8686_v11  ;;  %6526 = vmatprep.subr.bf16.mxu1 %v7208_v51 }
 0x25d   : > { %v2265_v25 = vsub.f32 %v2263_v21, %v2264_v12  ;;  %v2282_v36 = vsub.f32 %v8555_v16, %v8686_v11  ;;  %v2283_v41 = vsub.f32 %v8575_v63, %v8686_v11  ;;  %v2284_v50 = vsub.f32 %v8585_v49, %v8686_v11  ;;  %v7209_v21 = vld [vmem:[%s10936_s5 + $0x20] sm:$0xff]  }
 0x25e   : > { %v2285_v17 = vsub.f32 %v8570_v46, %v8686_v11  ;;  %v2286_v23 = vsub.f32 %v8579_v34, %v8686_v11  ;;  %v2287_v37 = vsub.f32 %v8599_v59, %v8686_v11  ;;  %v2288_v27 = vsub.f32 %v8609_v38, %v8686_v11  ;;  %6527 = vmatpush3.bf16.msra.mxu1 %v7209_v21 }
 0x25f   : > { %v2266_v14 = vmax.f32 %v2265_v25, 0.0  ;;  %v2289_v54 = vsub.f32 %v8594_v0, %v8686_v11  ;;  %v2290_v3 = vsub.f32 %v8603_v20, %v8686_v11  ;;  %v2291_v45 = vsub.f32 %v8623_v29, %v8686_v11  ;;  %v7224_v25 = vld [vmem:[%s10936_s5 + $0xe8] sm:$0xff]   ;;  %6528 = vmatprep.subr.bf16.mxu1 %v7210_v1 }
 0x260   : > { %v2292_v35 = vsub.f32 %v8633_v32, %v8686_v11  ;;  %6640 = vmatprep.subr.bf16.mxu0 %v7224_v25  ;;  %v2267_v51 = vsub.f32 %v8480_v18, %v8686_v11  ;;  %v2268_v21 = vsub.f32 %v8486_v26, %v8686_v11  ;;  %v2269_v1 = vsub.f32 %v8477_v6, %v8686_v11  ;;  %v7225_v6 = vld [vmem:[%s10936_s5 + $0x78] sm:$0xff]  }
 0x261   : > { %v2299_v4 = vadd.f32 1e-09, %v2266_v14  ;;  %v7226_v14 = vld [vmem:[%s10936_s5 + $0xa8] sm:$0xff]   ;;  %v2270_v25 = vsub.f32 %v8483_v10, %v8686_v11  ;;  %v2272_v18 = vsub.f32 %v8513_v22, %v8686_v11  ;;  %v2273_v26 = vsub.f32 %v8498_v5, %v8686_v11 }
 0x262   : > { %6641 = vmatpush3.bf16.msra.mxu0 %v7226_v14  ;;  %6529 = vmatpush3.bf16.msra.mxu1 %v7211_v57  ;;  %v7217_v14 = vld [vmem:[%s10936_s5 + $0x30] sm:$0xff]   ;;  %v8803_v57 = vld [vmem:[%s10934_s3] ss:$0 sm:$0xff]  ;;  %v2275_v22 = vsub.f32 %v8527_v24, %v8686_v11  ;;  %v2277_v5 = vsub.f32 %v8522_v55, %v8686_v11  ;;  %v10964_v29 = vsub.f32 %v8651_v19, %v8686_v11 }
 0x263   : > { %7308 = vrsqrt.f32 %v2299_v4  ;;  %v7229_v4 = vld [vmem:[%s10936_s5 + $0xb0] sm:$0xff]   ;;  %6642 = vmatprep.subr.bf16.mxu0 %v7228_v31  ;;  %v2271_v31 = vsub.f32 %v8503_v42, %v8686_v11  ;;  %6530 = vmatprep.subr.bf16.mxu1 %v7215_v13  ;;  %v2274_v42 = vsub.f32 %v8507_v15, %v8686_v11  ;;  %v2278_v13 = vsub.f32 %v8531_v44, %v8686_v11  ;;  %v8825_v55 = vld [vmem:[%s10935_s4] ss:$0 sm:$0xff] }
 0x266   : > { %6643 = vmatpush3.bf16.msra.mxu0 %v7229_v4  ;;  %v7231_v4 = vld [vmem:[%s10936_s5 + $0xb8] sm:$0xff]   ;;  %6531 = vmatpush3.bf16.msra.mxu1 %v7217_v14 }
 0x267   : > { %6644 = vmatprep.subr.bf16.mxu0 %v7230_v62  ;;  %6532 = vmatprep.subr.bf16.mxu1 %v7225_v6 }
 0x26a   : > { %6645 = vmatpush3.bf16.msra.mxu0 %v7231_v4  ;;  %6533 = vmatpush3.bf16.msra.mxu1 %v7227_v52 }
 0x26d   : > { %v7309_v10 = vpop.eup %7308 }
 0x26e   : > { %v2329_v7 = vmul.f32 %v7309_v10, %v2295_v48  ;;  %v2330_v15 = vmul.f32 %v7309_v10, %v2296_v60  ;;  %v2301_v24 = vmul.f32 %v7309_v10, %v2267_v51  ;;  %v2302_v12 = vmul.f32 %v7309_v10, %v2268_v21  ;;  %v7236_v21 = vld [vmem:[%s10936_s5 + $0x140] sm:$0xff]  }
 0x26f   : > { %v2303_v44 = vmul.f32 %v7309_v10, %v2269_v1  ;;  %v2304_v62 = vmul.f32 %v7309_v10, %v2270_v25  ;;  %v2305_v8 = vmul.f32 %v7309_v10, %v2271_v31  ;;  %v2306_v2 = vmul.f32 %v7309_v10, %v2272_v18  ;;  %6742 = vmatprep.subr.bf16.mxu1 %v7236_v21 }
 0x270   : > { %v2367_v53 = vmul.f32 %v8803_v57, %v2329_v7  ;;  %v2368_v48 = vmul.f32 %v8803_v57, %v2330_v15  ;;  %v2307_v60 = vmul.f32 %v7309_v10, %v2273_v26  ;;  %v2308_v51 = vmul.f32 %v7309_v10, %v2274_v42 }
 0x271   : > { %v2309_v1 = vmul.f32 %v7309_v10, %v2275_v22  ;;  %v2310_v25 = vmul.f32 %v7309_v10, %v2276_v58  ;;  %v2311_v14 = vmul.f32 %v7309_v10, %v2277_v5  ;;  %v2312_v31 = vmul.f32 %v7309_v10, %v2278_v13  ;;  %v2968_v22 = vld [vmem:[#allocation2 + $0xbc] sm:$0x1]  ;;  %v2990_v5 = vld [vmem:[#allocation2 + $0xd4] sm:$0x1] }
 0x272   : > { %v2405_v18 = vadd.f32 %v8825_v55, %v2367_v53  ;;  %v2406_v7 = vadd.f32 %v8825_v55, %v2368_v48  ;;  %v2313_v26 = vmul.f32 %v7309_v10, %v2279_v43  ;;  %v2314_v6 = vmul.f32 %v7309_v10, %v2280_v30 }
 0x273   : > { %v2315_v33 = vmul.f32 %v7309_v10, %v2281_v28  ;;  %v2316_v58 = vmul.f32 %v7309_v10, %v2282_v36  ;;  %v2317_v42 = vmul.f32 %v7309_v10, %v2283_v41  ;;  %v2318_v56 = vmul.f32 %v7309_v10, %v2284_v50 }
 0x274   : > { %v2437_v43 = vmax.f32 %v2405_v18, 0.0  ;;  %v2438_v9 = vmax.f32 %v2406_v7, 0.0  ;;  %v2319_v40 = vmul.f32 %v7309_v10, %v2285_v17  ;;  %v2320_v16 = vmul.f32 %v7309_v10, %v2286_v23 }
 0x275   : > { %v2321_v63 = vmul.f32 %v7309_v10, %v2287_v37  ;;  %v2322_v49 = vmul.f32 %v7309_v10, %v2288_v27  ;;  %v2323_v30 = vmul.f32 %v7309_v10, %v2289_v54  ;;  %v2324_v46 = vmul.f32 %v7309_v10, %v2290_v3 }
 0x276   : > { %v8876_v28 = vpack.c.bf16 %v2437_v43, %v2437_v43  ;;  %v6042_v34 = vpack.c.bf16 %v2438_v9, %v2438_v9  ;;  %v2325_v59 = vmul.f32 %v7309_v10, %v2291_v45  ;;  %v2326_v38 = vmul.f32 %v7309_v10, %v2292_v35 }
 0x277   : > { %v10961_v36 = vsub.f32 %v8618_v61, %v8686_v11  ;;  %v10962_v41 = vsub.f32 %v8627_v39, %v8686_v11  ;;  %v10963_v50 = vsub.f32 %v8642_v47, %v8686_v11  ;;  %v2332_v23 = vmul.f32 %v7309_v10, %v10964_v29 }
 0x278   : > { %v2779_v37 = vshrl.u32 %v8876_v28, 16  ;;  %v2787_v32 = vshrl.u32 %v6042_v34, 16  ;;  %v2790_v27 = vshll.u32 %v6042_v34, 16  ;;  %v2782_v54 = vshll.u32 %v8876_v28, 16  ;;  %v2901_v28 = vld [vmem:[#allocation2 + $0x48] sm:$0xf] }
 0x279   : > { %v2327_v0 = vmul.f32 %v7309_v10, %v10961_v36  ;;  %v2328_v20 = vmul.f32 %v7309_v10, %v10962_v41  ;;  %v2331_v17 = vmul.f32 %v7309_v10, %v10963_v50  ;;  %v2339_v61 = vmul.f32 %v8803_v57, %v2301_v24 }
 0x27a   : > { %v2340_v3 = vmul.f32 %v8803_v57, %v2302_v12  ;;  %v2341_v39 = vmul.f32 %v8803_v57, %v2303_v44  ;;  %v2342_v45 = vmul.f32 %v8803_v57, %v2304_v62  ;;  %v8908_v19 = vrot.slane %v2779_v37, 7  ;;  %v9334_v12 = vld [vmem:[#allocation2] sm:$0xf] }
 0x27b   : > { %v2789_v11 = vrot.slane %v2787_v32, 7  ;;  %v2343_v35 = vmul.f32 %v8803_v57, %v2305_v8  ;;  %v2344_v10 = vmul.f32 %v8803_v57, %v2306_v2  ;;  %v2345_v13 = vmul.f32 %v8803_v57, %v2307_v60 }
 0x27c   : > { %v2346_v4 = vmul.f32 %v8803_v57, %v2308_v51  ;;  %v2347_v15 = vmul.f32 %v8803_v57, %v2309_v1  ;;  %v2348_v24 = vmul.f32 %v8803_v57, %v2310_v25  ;;  %v2785_v8 = vrot.slane %v8908_v19, 4 }
 0x27d   : > { %v2792_v44 = vor.u32 %v2790_v27, %v2789_v11  ;;  %v2794_v2 = vrot.slane %v2789_v11, 4  ;;  %v2349_v62 = vmul.f32 %v8803_v57, %v2311_v14  ;;  %v2350_v52 = vmul.f32 %v8803_v57, %v2312_v31 }
 0x27e   : > { %v2351_v53 = vmul.f32 %v8803_v57, %v2313_v26  ;;  %v2352_v48 = vmul.f32 %v8803_v57, %v2314_v6  ;;  %v2353_v60 = vmul.f32 %v8803_v57, %v2315_v33  ;;  %v2354_v25 = vmul.f32 %v8803_v57, %v2316_v58 }
 0x27f   : > { %v2793_v51 = vsel %vm8914_vm6, %v2785_v8, %v2792_v44  ;;  %v2969_v21 = vsel %vm8904_vm5, %v2794_v2, %v2968_v22  ;;  %v2991_v1 = vsel %vm8904_vm5, %v2794_v2, %v2990_v5  ;;  %v2355_v14 = vmul.f32 %v8803_v57, %v2317_v42 }
 0x280   : > { %2967 = vst [vmem:[#allocation2 + $0xb8] sm:$0xf] %v2793_v51  ;;  %2970 = vst [vmem:[#allocation2 + $0xbc] sm:$0x1] %v2969_v21  ;;  %v2356_v31 = vmul.f32 %v8803_v57, %v2318_v56  ;;  %v2357_v18 = vmul.f32 %v8803_v57, %v2319_v40  ;;  %v2358_v7 = vmul.f32 %v8803_v57, %v2320_v16  ;;  %v10969_v29 = vmov 0 }
 0x281   : > { %2989 = vst [vmem:[#allocation2 + $0xd0] sm:$0xf] %v2793_v51  ;;  %2992 = vst [vmem:[#allocation2 + $0xd4] sm:$0x1] %v2991_v1  ;;  %v2359_v26 = vmul.f32 %v8803_v57, %v2321_v63  ;;  %v2360_v6 = vmul.f32 %v8803_v57, %v2322_v49  ;;  %v2361_v33 = vmul.f32 %v8803_v57, %v2323_v30  ;;  %v10970_v29 = vsel %vm8993_vm8, 4294967295, %v10969_v29 }
 0x282   : > { %v2362_v58 = vmul.f32 %v8803_v57, %v2324_v46  ;;  %v2363_v43 = vmul.f32 %v8803_v57, %v2325_v59  ;;  %v2364_v9 = vmul.f32 %v8803_v57, %v2326_v38  ;;  %v2365_v42 = vmul.f32 %v8803_v57, %v2327_v0  ;;  %10971 = vst [vmem:[#allocation6_spill] sm:$0xff] %v10970_v29  ;;  %v2912_v29 = vld [vmem:[#allocation2 + $0x5c] sm:$0x1] }
 0x283   : > { %v2366_v56 = vmul.f32 %v8803_v57, %v2328_v20  ;;  %v2369_v40 = vmul.f32 %v8803_v57, %v2331_v17  ;;  %v2370_v16 = vmul.f32 %v8803_v57, %v2332_v23  ;;  %v8950_v63 = vadd.f32 %v8825_v55, %v2339_v61 }
 0x284   : > { %v8953_v49 = vadd.f32 %v8825_v55, %v2340_v3  ;;  %v8956_v30 = vadd.f32 %v8825_v55, %v2341_v39  ;;  %v8959_v46 = vadd.f32 %v8825_v55, %v2342_v45  ;;  %v8962_v34 = vadd.f32 %v8825_v55, %v2343_v35 }
 0x285   : > { %v8965_v59 = vadd.f32 %v8825_v55, %v2344_v10  ;;  %v8968_v57 = vadd.f32 %v8825_v55, %v2345_v13  ;;  %v8971_v38 = vadd.f32 %v8825_v55, %v2346_v4  ;;  %v8974_v36 = vadd.f32 %v8825_v55, %v2347_v15 }
 0x286   : > { %v8977_v0 = vadd.f32 %v8825_v55, %v2348_v24  ;;  %v8980_v41 = vadd.f32 %v8825_v55, %v2349_v62  ;;  %v8983_v20 = vadd.f32 %v8825_v55, %v2350_v52  ;;  %v8986_v50 = vadd.f32 %v8825_v55, %v2351_v53 }
 0x287   : > { %v8989_v17 = vadd.f32 %v8825_v55, %v2352_v48  ;;  %v3152_v23 = vld [vmem:[#allocation2 + $0xb8] sm:$0x8]  ;;  %v8998_v32 = vadd.f32 %v8825_v55, %v2353_v60  ;;  %v9001_v27 = vadd.f32 %v8825_v55, %v2354_v25  ;;  %v9004_v61 = vadd.f32 %v8825_v55, %v2355_v14  ;;  %v3273_v10 = vld [vmem:[#allocation2 + $0xbc] sm:$0x1] }
 0x288   : > { %v3154_v37 = vld [vmem:[#allocation2 + $0xd0] sm:$0x8]  ;;  %v9007_v3 = vadd.f32 %v8825_v55, %v2356_v31  ;;  %v5894_v39 = vrot.slane %v3152_v23, 11  ;;  %v9010_v11 = vadd.f32 %v8825_v55, %v2357_v18  ;;  %v9013_v35 = vadd.f32 %v8825_v55, %v2358_v7  ;;  %v3279_v22 = vld [vmem:[#allocation2 + $0xd4] sm:$0x1] }
 0x289   : > { %v5896_v45 = vrot.slane %v3154_v37, 11  ;;  %v9016_v5 = vadd.f32 %v8825_v55, %v2359_v26  ;;  %v9019_v13 = vadd.f32 %v8825_v55, %v2360_v6  ;;  %v9022_v4 = vadd.f32 %v8825_v55, %v2361_v33 }
 0x28a   : > { %v9025_v15 = vadd.f32 %v8825_v55, %v2362_v58  ;;  %v3274_v24 = vsel %vm8993_vm8, %v5894_v39, %v3273_v10  ;;  %v9032_v44 = vadd.f32 %v8825_v55, %v2363_v43  ;;  %v9035_v2 = vadd.f32 %v8825_v55, %v2364_v9 }
 0x28b   : > { %v3280_v8 = vsel %vm8993_vm8, %v5896_v45, %v3279_v22  ;;  %3275 = vst [vmem:[#allocation2 + $0xbc] sm:$0x1] %v3274_v24  ;;  %v2403_v62 = vadd.f32 %v8825_v55, %v2365_v42  ;;  %v2404_v52 = vadd.f32 %v8825_v55, %v2366_v56  ;;  %v2407_v53 = vadd.f32 %v8825_v55, %v2369_v40 }
 0x28c   : > { %3281 = vst [vmem:[#allocation2 + $0xd4] sm:$0x1] %v3280_v8  ;;  %v2408_v48 = vadd.f32 %v8825_v55, %v2370_v16  ;;  %v2409_v60 = vmax.f32 %v8950_v63, 0.0  ;;  %v2410_v51 = vmax.f32 %v8953_v49, 0.0  ;;  %v2411_v21 = vmax.f32 %v8956_v30, 0.0 }
 0x28d   : > { %v2412_v1 = vmax.f32 %v8959_v46, 0.0  ;;  %v2413_v25 = vmax.f32 %v8962_v34, 0.0  ;;  %v2414_v14 = vmax.f32 %v8965_v59, 0.0  ;;  %v2415_v31 = vmax.f32 %v8968_v57, 0.0 }
 0x28e   : > { %v2416_v18 = vmax.f32 %v8971_v38, 0.0  ;;  %v2417_v7 = vmax.f32 %v8974_v36, 0.0  ;;  %v2418_v55 = vmax.f32 %v8977_v0, 0.0  ;;  %v2419_v26 = vmax.f32 %v8980_v41, 0.0 }
 0x28f   : > { %v2420_v6 = vmax.f32 %v8983_v20, 0.0  ;;  %v2421_v33 = vmax.f32 %v8986_v50, 0.0  ;;  %v2422_v58 = vmax.f32 %v8989_v17, 0.0  ;;  %v2423_v43 = vmax.f32 %v8998_v32, 0.0 }
 0x290   : > { %v2424_v9 = vmax.f32 %v9001_v27, 0.0  ;;  %v2425_v42 = vmax.f32 %v9004_v61, 0.0  ;;  %v2426_v56 = vmax.f32 %v9007_v3, 0.0  ;;  %v2427_v40 = vmax.f32 %v9010_v11, 0.0 }
 0x291   : > { %v2428_v16 = vmax.f32 %v9013_v35, 0.0  ;;  %v2429_v63 = vmax.f32 %v9016_v5, 0.0  ;;  %v2430_v49 = vmax.f32 %v9019_v13, 0.0  ;;  %v2431_v30 = vmax.f32 %v9022_v4, 0.0 }
 0x292   : > { %v2432_v46 = vmax.f32 %v9025_v15, 0.0  ;;  %v2433_v34 = vmax.f32 %v9032_v44, 0.0  ;;  %v2434_v59 = vmax.f32 %v9035_v2, 0.0  ;;  %v2435_v57 = vmax.f32 %v2403_v62, 0.0 }
 0x293   : > { %v2436_v38 = vmax.f32 %v2404_v52, 0.0  ;;  %v2439_v36 = vmax.f32 %v2407_v53, 0.0  ;;  %v2440_v0 = vmax.f32 %v2408_v48, 0.0  ;;  %v6013_v41 = vpack.c.bf16 %v2409_v60, %v2409_v60 }
 0x294   : > { %v6014_v20 = vpack.c.bf16 %v2410_v51, %v2410_v51  ;;  %v6015_v50 = vpack.c.bf16 %v2411_v21, %v2411_v21  ;;  %v6016_v17 = vpack.c.bf16 %v2412_v1, %v2412_v1  ;;  %v6017_v23 = vpack.c.bf16 %v2413_v25, %v2413_v25 }
 0x295   : > { %v6018_v37 = vpack.c.bf16 %v2414_v14, %v2414_v14  ;;  %v9067_v32 = vpack.c.bf16 %v2415_v31, %v2415_v31  ;;  %v9069_v27 = vpack.c.bf16 %v2416_v18, %v2416_v18  ;;  %v9071_v61 = vpack.c.bf16 %v2417_v7, %v2417_v7 }
 0x296   : > { %v9073_v3 = vpack.c.bf16 %v2418_v55, %v2418_v55  ;;  %v9075_v39 = vpack.c.bf16 %v2419_v26, %v2419_v26  ;;  %v9077_v45 = vpack.c.bf16 %v2420_v6, %v2420_v6  ;;  %v9079_v11 = vpack.c.bf16 %v2421_v33, %v2421_v33 }
 0x297   : > { %v9081_v35 = vpack.c.bf16 %v2422_v58, %v2422_v58  ;;  %v9083_v10 = vpack.c.bf16 %v2423_v43, %v2423_v43  ;;  %v9085_v22 = vpack.c.bf16 %v2424_v9, %v2424_v9  ;;  %v9087_v5 = vpack.c.bf16 %v2425_v42, %v2425_v42 }
 0x298   : > { %v9089_v13 = vpack.c.bf16 %v2426_v56, %v2426_v56  ;;  %v9091_v4 = vpack.c.bf16 %v2427_v40, %v2427_v40  ;;  %v9093_v15 = vpack.c.bf16 %v2428_v16, %v2428_v16  ;;  %v9095_v24 = vpack.c.bf16 %v2429_v63, %v2429_v63 }
 0x299   : > { %v9097_v8 = vpack.c.bf16 %v2430_v49, %v2430_v49  ;;  %v9099_v44 = vpack.c.bf16 %v2431_v30, %v2431_v30  ;;  %v9101_v2 = vpack.c.bf16 %v2432_v46, %v2432_v46  ;;  %v9103_v62 = vpack.c.bf16 %v2433_v34, %v2433_v34  ;;  %v2919_v49 = vld [vmem:[#allocation2 + $0x68] sm:$0x1] }
 0x29a   : > { %v9105_v52 = vpack.c.bf16 %v2434_v59, %v2434_v59  ;;  %v9107_v53 = vpack.c.bf16 %v2435_v57, %v2435_v57  ;;  %v9109_v48 = vpack.c.bf16 %v2436_v38, %v2436_v38  ;;  %v9111_v60 = vpack.c.bf16 %v2439_v36, %v2439_v36  ;;  %v2915_v59 = vld [vmem:[#allocation2 + $0x60] sm:$0xf] }
 0x29b   : > { %v9113_v51 = vpack.c.bf16 %v2440_v0, %v2440_v0  ;;  %v2541_v21 = vshrl.u32 %v6013_v41, 16  ;;  %v2544_v1 = vshll.u32 %v6013_v41, 16  ;;  %v2549_v25 = vshrl.u32 %v6014_v20, 16 }
 0x29c   : > { %v2552_v14 = vshll.u32 %v6014_v20, 16  ;;  %v2558_v31 = vshrl.u32 %v6015_v50, 16  ;;  %v2561_v18 = vshll.u32 %v6015_v50, 16  ;;  %v2566_v7 = vshrl.u32 %v6016_v17, 16 }
 0x29d   : > { %v2569_v55 = vshll.u32 %v6016_v17, 16  ;;  %v2543_v26 = vrot.slane %v2541_v21, 7  ;;  %v9115_v6 = vrot.slane %v2549_v25, 7  ;;  %v2575_v33 = vshrl.u32 %v6017_v23, 16 }
 0x29e   : > { %v2578_v58 = vshll.u32 %v6017_v23, 16  ;;  %v2560_v43 = vrot.slane %v2558_v31, 7  ;;  %v9117_v9 = vrot.slane %v2566_v7, 7  ;;  %v2583_v42 = vshrl.u32 %v6018_v37, 16 }
 0x29f   : > { %v2586_v56 = vshll.u32 %v6018_v37, 16  ;;  %v9119_v40 = vor.u32 %v2544_v1, %v2543_v26  ;;  %v2547_v16 = vrot.slane %v2543_v26, 4  ;;  %v2554_v63 = vor.u32 %v2552_v14, %v9115_v6 }
 0x2a0   : > { %v9123_v30 = vor.u32 %v2561_v18, %v2560_v43  ;;  %v2564_v46 = vrot.slane %v2560_v43, 4  ;;  %v2571_v34 = vor.u32 %v2569_v55, %v9117_v9  ;;  %v2577_v38 = vrot.slane %v2575_v33, 7 }
 0x2a1   : > { %v2555_v57 = vsel %vm8914_vm6, %v2547_v16, %v2554_v63  ;;  %v9129_v36 = vrot.slane %v2583_v42, 7  ;;  %v2592_v0 = vshrl.u32 %v9067_v32, 16  ;;  %v2595_v20 = vshll.u32 %v9067_v32, 16 }
 0x2a2   : > { %v2572_v41 = vsel %vm8914_vm6, %v2564_v46, %v2571_v34  ;;  %v2600_v50 = vshrl.u32 %v9069_v27, 16  ;;  %v2603_v17 = vshll.u32 %v9069_v27, 16  ;;  %2867 = vst [vmem:[#allocation2 + $0x10] sm:$0xf] %v2555_v57  ;;  %v9137_v23 = vor.u32 %v2578_v58, %v2577_v38 }
 0x2a3   : > { %v2581_v37 = vrot.slane %v2577_v38, 4  ;;  %v2588_v21 = vor.u32 %v2586_v56, %v9129_v36  ;;  %2876 = vst [vmem:[#allocation2 + $0x1c] sm:$0xf] %v2572_v41  ;;  %2981 = vst [vmem:[#allocation2 + $0x4] sm:$0xf] %v2572_v41  ;;  %v2594_v25 = vrot.slane %v2592_v0, 7 }
 0x2a4   : > { %v9141_v14 = vrot.slane %v2600_v50, 7  ;;  %v2609_v31 = vshrl.u32 %v9071_v61, 16  ;;  %v2612_v32 = vshll.u32 %v9071_v61, 16  ;;  %v2617_v18 = vshrl.u32 %v9073_v3, 16 }
 0x2a5   : > { %v2589_v27 = vsel %vm8914_vm6, %v2581_v37, %v2588_v21  ;;  %v2620_v7 = vshll.u32 %v9073_v3, 16  ;;  %v2626_v55 = vshrl.u32 %v9075_v39, 16  ;;  %v9150_v26 = vor.u32 %v2595_v20, %v2594_v25 }
 0x2a6   : > { %v2598_v33 = vrot.slane %v2594_v25, 4  ;;  %v2605_v58 = vor.u32 %v2603_v17, %v9141_v14  ;;  %2883 = vst [vmem:[#allocation2 + $0x28] sm:$0xf] %v2589_v27  ;;  %v2611_v42 = vrot.slane %v2609_v31, 7  ;;  %v9154_v56 = vrot.slane %v2617_v18, 7 }
 0x2a7   : > { %v2628_v61 = vrot.slane %v2626_v55, 7  ;;  %v2629_v16 = vshll.u32 %v9075_v39, 16  ;;  %v2634_v3 = vshrl.u32 %v9077_v45, 16  ;;  %v2637_v46 = vshll.u32 %v9077_v45, 16 }
 0x2a8   : > { %v2606_v63 = vsel %vm8914_vm6, %v2598_v33, %v2605_v58  ;;  %v2643_v34 = vshrl.u32 %v9079_v11, 16  ;;  %v9162_v57 = vor.u32 %v2612_v32, %v2611_v42  ;;  %v2615_v38 = vrot.slane %v2611_v42, 4 }
 0x2a9   : > { %v2622_v0 = vor.u32 %v2620_v7, %v9154_v56  ;;  %2890 = vst [vmem:[#allocation2 + $0x34] sm:$0xf] %v2606_v63  ;;  %v9166_v20 = vor.u32 %v2629_v16, %v2628_v61  ;;  %v2632_v39 = vrot.slane %v2628_v61, 4  ;;  %v9168_v50 = vrot.slane %v2634_v3, 7 }
 0x2aa   : > { %v2645_v17 = vrot.slane %v2643_v34, 7  ;;  %v2646_v45 = vshll.u32 %v9079_v11, 16  ;;  %v2651_v21 = vshrl.u32 %v9081_v35, 16  ;;  %v2654_v25 = vshll.u32 %v9081_v35, 16 }
 0x2ab   : > { %v2623_v37 = vsel %vm8914_vm6, %v2615_v38, %v2622_v0  ;;  %v2639_v31 = vor.u32 %v2637_v46, %v9168_v50  ;;  %v2660_v18 = vshrl.u32 %v9083_v10, 16  ;;  %v2663_v33 = vshll.u32 %v9083_v10, 16 }
 0x2ac   : > { %v2649_v27 = vrot.slane %v2645_v17, 4  ;;  %2897 = vst [vmem:[#allocation2 + $0x40] sm:$0xf] %v2623_v37  ;;  %v9178_v7 = vor.u32 %v2646_v45, %v2645_v17  ;;  %v9180_v55 = vrot.slane %v2651_v21, 7  ;;  %v2668_v11 = vshrl.u32 %v9085_v22, 16 }
 0x2ad   : > { %v2640_v58 = vsel %vm8914_vm6, %v2632_v39, %v2639_v31  ;;  %v2662_v35 = vrot.slane %v2660_v18, 7  ;;  %v2671_v42 = vshll.u32 %v9085_v22, 16  ;;  %v2677_v61 = vshrl.u32 %v9087_v5, 16  ;;  %v7261_v22 = vld [vmem:[%s10936_s5 + $0x1c0] sm:$0xff]  }
 0x2ae   : > { %v2656_v16 = vor.u32 %v2654_v25, %v9180_v55  ;;  %v9190_v3 = vrot.slane %v2668_v11, 7  ;;  %v2680_v46 = vshll.u32 %v9087_v5, 16  ;;  %2904 = vst [vmem:[#allocation2 + $0x4c] sm:$0xf] %v2640_v58  ;;  %v2685_v0 = vshrl.u32 %v9089_v13, 16  ;;  %6854 = vmatprep.subr.bf16.mxu0 %v7261_v22 }
 0x2af   : > { %v9193_v10 = vor.u32 %v2663_v33, %v2662_v35  ;;  %v2666_v34 = vrot.slane %v2662_v35, 4  ;;  %v2679_v38 = vrot.slane %v2677_v61, 7  ;;  %v2688_v5 = vshll.u32 %v9089_v13, 16 }
 0x2b0   : > { %v2657_v39 = vsel %vm8914_vm6, %v2649_v27, %v2656_v16  ;;  %v2673_v17 = vor.u32 %v2671_v42, %v9190_v3  ;;  %v9206_v25 = vrot.slane %v2685_v0, 7  ;;  %v2694_v31 = vshrl.u32 %v9091_v4, 16 }
 0x2b1   : > { %v9204_v45 = vor.u32 %v2680_v46, %v2679_v38  ;;  %v2683_v21 = vrot.slane %v2679_v38, 4  ;;  %2911 = vst [vmem:[#allocation2 + $0x58] sm:$0xf] %v2657_v39  ;;  %v2697_v27 = vshll.u32 %v9091_v4, 16  ;;  %v2702_v33 = vshrl.u32 %v9093_v15, 16 }
 0x2b2   : > { %v2674_v18 = vsel %vm8914_vm6, %v2666_v34, %v2673_v17  ;;  %v2705_v11 = vshll.u32 %v9093_v15, 16  ;;  %v2690_v13 = vor.u32 %v2688_v5, %v9206_v25  ;;  %v2696_v35 = vrot.slane %v2694_v31, 7  ;;  %v2898_v39 = vld [vmem:[#allocation2 + $0x44] sm:$0x1] }
 0x2b3   : > { %v2711_v42 = vshrl.u32 %v9095_v24, 16  ;;  %2918 = vst [vmem:[#allocation2 + $0x64] sm:$0xf] %v2674_v18  ;;  %v9217_v61 = vrot.slane %v2702_v33, 7  ;;  %v2714_v16 = vshll.u32 %v9095_v24, 16  ;;  %v2719_v46 = vshrl.u32 %v9097_v8, 16 }
 0x2b4   : > { %v2722_v4 = vshll.u32 %v9097_v8, 16  ;;  %v2691_v15 = vsel %vm8914_vm6, %v2683_v21, %v2690_v13  ;;  %v9224_v34 = vor.u32 %v2697_v27, %v2696_v35  ;;  %v2700_v38 = vrot.slane %v2696_v35, 4 }
 0x2b5   : > { %v2713_v0 = vrot.slane %v2711_v42, 7  ;;  %v2707_v22 = vor.u32 %v2705_v11, %v9217_v61  ;;  %v9228_v17 = vrot.slane %v2719_v46, 7  ;;  %v2728_v5 = vshrl.u32 %v9099_v44, 16  ;;  %2925 = vst [vmem:[#allocation2 + $0x70] sm:$0xf] %v2691_v15 }
 0x2b6   : > { %v2731_v8 = vshll.u32 %v9099_v44, 16  ;;  %v2736_v21 = vshrl.u32 %v9101_v2, 16  ;;  %v2739_v35 = vshll.u32 %v9101_v2, 16  ;;  %v2745_v42 = vshrl.u32 %v9103_v62, 16 }
 0x2b7   : > { %v9231_v24 = vor.u32 %v2714_v16, %v2713_v0  ;;  %v2717_v31 = vrot.slane %v2713_v0, 4  ;;  %v2708_v18 = vsel %vm8914_vm6, %v2700_v38, %v2707_v22  ;;  %v2724_v27 = vor.u32 %v2722_v4, %v9228_v17 }
 0x2b8   : > { %v2730_v11 = vrot.slane %v2728_v5, 7  ;;  %v9239_v13 = vrot.slane %v2736_v21, 7  ;;  %v2748_v16 = vshll.u32 %v9103_v62, 16  ;;  %2932 = vst [vmem:[#allocation2 + $0x7c] sm:$0xf] %v2708_v18  ;;  %v2753_v4 = vshrl.u32 %v9105_v52, 16 }
 0x2b9   : > { %v2725_v44 = vsel %vm8914_vm6, %v2717_v31, %v2724_v27  ;;  %v2747_v22 = vrot.slane %v2745_v42, 7  ;;  %v2756_v2 = vshll.u32 %v9105_v52, 16  ;;  %v2762_v62 = vshrl.u32 %v9107_v53, 16  ;;  %v2864_v18 = vld [vmem:[#allocation2 + $0xc] sm:$0xf] }
 0x2ba   : > { %v9246_v46 = vor.u32 %v2731_v8, %v2730_v11  ;;  %v2734_v15 = vrot.slane %v2730_v11, 4  ;;  %v2741_v38 = vor.u32 %v2739_v35, %v9239_v13  ;;  %2939 = vst [vmem:[#allocation2 + $0x88] sm:$0xf] %v2725_v44  ;;  %v9252_v5 = vrot.slane %v2753_v4, 7  ;;  %v2873_v8 = vld [vmem:[#allocation2 + $0x18] sm:$0xf] }
 0x2bb   : > { %v2765_v21 = vshll.u32 %v9107_v53, 16  ;;  %v2770_v31 = vshrl.u32 %v9109_v48, 16  ;;  %v9259_v11 = vor.u32 %v2748_v16, %v2747_v22  ;;  %v2751_v35 = vrot.slane %v2747_v22, 4  ;;  %v2870_v52 = vld [vmem:[#allocation2 + $0x14] sm:$0x1] }
 0x2bc   : > { %v2742_v27 = vsel %vm8914_vm6, %v2734_v15, %v2741_v38  ;;  %v2773_v42 = vshll.u32 %v9109_v48, 16  ;;  %v2758_v44 = vor.u32 %v2756_v2, %v9252_v5  ;;  %v2764_v0 = vrot.slane %v2762_v62, 7  ;;  %v2877_v16 = vld [vmem:[#allocation2 + $0x20] sm:$0x1]  ;;  %v2887_v15 = vld [vmem:[#allocation2 + $0x30] sm:$0xf] }
 0x2bd   : > { %v9264_v33 = vrot.slane %v2770_v31, 7  ;;  %2946 = vst [vmem:[#allocation2 + $0x94] sm:$0xf] %v2742_v27  ;;  %v2880_v38 = vld [vmem:[#allocation2 + $0x24] sm:$0xf]  ;;  %v9275_v48 = vor.u32 %v2782_v54, %v8908_v19  ;;  %v2796_v2 = vshrl.u32 %v9111_v60, 16 }
 0x2be   : > { %v2884_v22 = vld [vmem:[#allocation2 + $0x2c] sm:$0x1]  ;;  %v2799_v62 = vshll.u32 %v9111_v60, 16  ;;  %v2804_v31 = vshrl.u32 %v9113_v51, 16  ;;  %v2891_v27 = vld [vmem:[#allocation2 + $0x38] sm:$0x1]  ;;  %v2759_v58 = vsel %vm8914_vm6, %v2751_v35, %v2758_v44  ;;  %v9282_v37 = vor.u32 %v2765_v21, %v2764_v0 }
 0x2bf   : > { %v2894_v4 = vld [vmem:[#allocation2 + $0x3c] sm:$0xf]  ;;  %v2768_v63 = vrot.slane %v2764_v0, 4  ;;  %v2775_v32 = vor.u32 %v2773_v42, %v9264_v33  ;;  %v2905_v54 = vld [vmem:[#allocation2 + $0x50] sm:$0x1]  ;;  %v2777_v41 = vrot.slane %v9264_v33, 4  ;;  %v2865_v0 = vsel %vm9268_vm10, %v9119_v40, %v2864_v18 }
 0x2c0   : > { %v2908_v19 = vld [vmem:[#allocation2 + $0x54] sm:$0xf]  ;;  %v2798_v43 = vrot.slane %v2796_v2, 7  ;;  %v9286_v60 = vrot.slane %v2804_v31, 7  ;;  %v2807_v1 = vshll.u32 %v9113_v51, 16  ;;  %v10974_v35 = vrot.slane %v9115_v6, 4 }
 0x2c1   : > { %2953 = vst [vmem:[#allocation2 + $0xa0] sm:$0xf] %v2759_v58  ;;  %v2776_v21 = vsel %vm8914_vm6, %v2768_v63, %v2775_v32  ;;  %v2874_v51 = vsel %vm9268_vm10, %v9123_v30, %v2873_v8  ;;  %v9301_v58 = vld [vmem:[#allocation2 + $0x78] sm:$0xf]  ;;  %v2922_v44 = vld [vmem:[#allocation2 + $0x6c] sm:$0xf] }
 0x2c2   : > { %v2871_v42 = vsel %vm8904_vm5, %v10974_v35, %v2870_v52  ;;  %v2933_v2 = vld [vmem:[#allocation2 + $0x80] sm:$0x1]  ;;  %v9303_v31 = vor.u32 %v2799_v62, %v2798_v43  ;;  %v2802_v32 = vrot.slane %v2798_v43, 4  ;;  %v2809_v63 = vor.u32 %v2807_v1, %v9286_v60  ;;  %2866 = vst [vmem:[#allocation2 + $0xc] sm:$0xf] %v2865_v0 }
 0x2c3   : > { %v2811_v40 = vrot.slane %v9286_v60, 4  ;;  %2872 = vst [vmem:[#allocation2 + $0x14] sm:$0x1] %v2871_v42  ;;  %2875 = vst [vmem:[#allocation2 + $0x18] sm:$0xf] %v2874_v51  ;;  %v10975_v8 = vrot.slane %v9117_v9, 4  ;;  %v2881_v43 = vsel %vm9268_vm10, %v9137_v23, %v2880_v38 }
 0x2c4   : > { %2960 = vst [vmem:[#allocation2 + $0xac] sm:$0xf] %v2776_v21  ;;  %v2926_v6 = vld [vmem:[#allocation2 + $0x74] sm:$0x1]  ;;  %v2943_v18 = vld [vmem:[#allocation2 + $0x90] sm:$0xf]  ;;  %v2888_v21 = vsel %vm9268_vm10, %v9150_v26, %v2887_v15  ;;  %v2810_v51 = vsel %vm8914_vm6, %v2802_v32, %v2809_v63 }
 0x2c5   : > { %v2936_v52 = vld [vmem:[#allocation2 + $0x84] sm:$0xf]  ;;  %v2878_v35 = vsel %vm8904_vm5, %v10975_v8, %v2877_v16  ;;  %v10976_v1 = vrot.slane %v9129_v36, 4  ;;  %v2947_v0 = vld [vmem:[#allocation2 + $0x98] sm:$0x1]  ;;  %v10977_v23 = vrot.slane %v9141_v14, 4  ;;  %v2895_v16 = vsel %vm9268_vm10, %v9162_v57, %v2894_v4 }
 0x2c6   : > { %v2940_v42 = vld [vmem:[#allocation2 + $0x8c] sm:$0x1]  ;;  %2879 = vst [vmem:[#allocation2 + $0x20] sm:$0x1] %v2878_v35  ;;  %2882 = vst [vmem:[#allocation2 + $0x24] sm:$0xf] %v2881_v43  ;;  %v2902_v14 = vsel %vm9268_vm10, %v9166_v20, %v2901_v28  ;;  %v2916_v20 = vsel %vm9268_vm10, %v9193_v10, %v2915_v59  ;;  %v2937_v10 = vsel %vm9268_vm10, %v9231_v24, %v2936_v52 }
 0x2c7   : > { %v2885_v62 = vsel %vm8904_vm5, %v10976_v1, %v2884_v22  ;;  %2889 = vst [vmem:[#allocation2 + $0x30] sm:$0xf] %v2888_v21  ;;  %v2892_v36 = vsel %vm8904_vm5, %v10977_v23, %v2891_v27  ;;  %v10978_v26 = vrot.slane %v9154_v56, 4  ;;  %v2982_v38 = vld [vmem:[#allocation2 + $0x8] sm:$0x1]  ;;  %v10979_v57 = vrot.slane %v9168_v50, 4 }
 0x2c8   : > { %2886 = vst [vmem:[#allocation2 + $0x2c] sm:$0x1] %v2885_v62  ;;  %v2957_v22 = vld [vmem:[#allocation2 + $0xa8] sm:$0xf]  ;;  %v2950_v32 = vld [vmem:[#allocation2 + $0x9c] sm:$0xf] }
 0x2c9   : > { %v2899_v15 = vsel %vm8904_vm5, %v10978_v26, %v2898_v39  ;;  %v2954_v63 = vld [vmem:[#allocation2 + $0xa4] sm:$0x1]  ;;  %2893 = vst [vmem:[#allocation2 + $0x38] sm:$0x1] %v2892_v36  ;;  %2896 = vst [vmem:[#allocation2 + $0x3c] sm:$0xf] %v2895_v16  ;;  %v2906_v56 = vsel %vm8904_vm5, %v10979_v57, %v2905_v54  ;;  %v2909_v39 = vsel %vm9268_vm10, %v9178_v7, %v2908_v19 }
 0x2ca   : > { %2900 = vst [vmem:[#allocation2 + $0x44] sm:$0x1] %v2899_v15  ;;  %v10980_v4 = vrot.slane %v9180_v55, 4  ;;  %2974 = vst [vmem:[#allocation2 + $0xc4] sm:$0xf] %v2810_v51  ;;  %v10981_v50 = vrot.slane %v9190_v3, 4 }
 0x2cb   : > { %v2961_v8 = vld [vmem:[#allocation2 + $0xb0] sm:$0x1]  ;;  %v2971_v35 = vld [vmem:[#allocation2 + $0xc0] sm:$0xf]  ;;  %v2964_v43 = vld [vmem:[#allocation2 + $0xb4] sm:$0xf] }
 0x2cc   : > { %v2913_v27 = vsel %vm8904_vm5, %v10980_v4, %v2912_v29  ;;  %2903 = vst [vmem:[#allocation2 + $0x48] sm:$0xf] %v2902_v14  ;;  %2907 = vst [vmem:[#allocation2 + $0x50] sm:$0x1] %v2906_v56  ;;  %v2920_v7 = vsel %vm8904_vm5, %v10981_v50, %v2919_v49  ;;  %v2923_v29 = vsel %vm9268_vm10, %v9204_v45, %v2922_v44  ;;  %v10982_v55 = vrot.slane %v9206_v25, 4 }
 0x2cd   : > { %2910 = vst [vmem:[#allocation2 + $0x54] sm:$0xf] %v2909_v39  ;;  %2914 = vst [vmem:[#allocation2 + $0x5c] sm:$0x1] %v2913_v27  ;;  %v2986_v54 = vld [vmem:[#allocation2 + $0xcc] sm:$0xf]  ;;  %v2930_v49 = vsel %vm9268_vm10, %v9224_v34, %v9301_v58 }
 0x2ce   : > { %v2927_v28 = vsel %vm8904_vm5, %v10982_v55, %v2926_v6  ;;  %v2975_v19 = vld [vmem:[#allocation2 + $0xc8] sm:$0x1]  ;;  %2917 = vst [vmem:[#allocation2 + $0x60] sm:$0xf] %v2916_v20  ;;  %2921 = vst [vmem:[#allocation2 + $0x68] sm:$0x1] %v2920_v7 }
 0x2cf   : > { %2924 = vst [vmem:[#allocation2 + $0x6c] sm:$0xf] %v2923_v29  ;;  %2928 = vst [vmem:[#allocation2 + $0x74] sm:$0x1] %v2927_v28  ;;  %v10983_v59 = vrot.slane %v9217_v61, 4  ;;  %v10984_v45 = vrot.slane %v9228_v17, 4  ;;  %v2944_v61 = vsel %vm9268_vm10, %v9246_v46, %v2943_v18  ;;  %v2951_v17 = vsel %vm9268_vm10, %v9259_v11, %v2950_v32 }
 0x2d0   : > { %2931 = vst [vmem:[#allocation2 + $0x78] sm:$0xf] %v2930_v49  ;;  %2938 = vst [vmem:[#allocation2 + $0x84] sm:$0xf] %v2937_v10  ;;  %v10985_v34 = vrot.slane %v9239_v13, 4  ;;  %v10986_v24 = vrot.slane %v9252_v5, 4  ;;  %v2958_v13 = vsel %vm9268_vm10, %v9282_v37, %v2957_v22  ;;  %v2962_v46 = vsel %vm8904_vm5, %v2777_v41, %v2961_v8 }
 0x2d1   : > { %v2934_v3 = vsel %vm8904_vm5, %v10983_v59, %v2933_v2  ;;  %v2941_v25 = vsel %vm8904_vm5, %v10984_v45, %v2940_v42  ;;  %2945 = vst [vmem:[#allocation2 + $0x90] sm:$0xf] %v2944_v61  ;;  %2952 = vst [vmem:[#allocation2 + $0x9c] sm:$0xf] %v2951_v17  ;;  %v2965_v5 = vsel %vm9268_vm10, %v9275_v48, %v2964_v43  ;;  %v2994_v2 = vld [vmem:[#allocation2 + $0xc] sm:$0x2] }
 0x2d2   : > { %2935 = vst [vmem:[#allocation2 + $0x80] sm:$0x1] %v2934_v3  ;;  %2942 = vst [vmem:[#allocation2 + $0x8c] sm:$0x1] %v2941_v25  ;;  %v2948_v58 = vsel %vm8904_vm5, %v10985_v34, %v2947_v0  ;;  %v2955_v44 = vsel %vm8904_vm5, %v10986_v24, %v2954_v63  ;;  %v2972_v11 = vsel %vm9268_vm10, %v9303_v31, %v2971_v35  ;;  %v2995_v6 = vld [vmem:[#allocation2 + $0x18] sm:$0x2] }
 0x2d3   : > { %2949 = vst [vmem:[#allocation2 + $0x98] sm:$0x1] %v2948_v58  ;;  %2956 = vst [vmem:[#allocation2 + $0xa4] sm:$0x1] %v2955_v44  ;;  %v2976_v37 = vsel %vm8904_vm5, %v2811_v40, %v2975_v19  ;;  %v2979_v41 = vsel %vm9268_vm10, %v9123_v30, %v9334_v12  ;;  %v10987_v33 = vrot.slane %v9117_v9, 4  ;;  %v2987_v18 = vsel %vm9268_vm10, %v9275_v48, %v2986_v54 }
 0x2d4   : > { %2959 = vst [vmem:[#allocation2 + $0xa8] sm:$0xf] %v2958_v13  ;;  %2963 = vst [vmem:[#allocation2 + $0xb0] sm:$0x1] %v2962_v46  ;;  %v3086_v52 = vld [vmem:[#allocation2 + $0xc] sm:$0x1] }
 0x2d5   : > { %2966 = vst [vmem:[#allocation2 + $0xb4] sm:$0xf] %v2965_v5  ;;  %2973 = vst [vmem:[#allocation2 + $0xc0] sm:$0xf] %v2972_v11  ;;  %v2983_v31 = vsel %vm8904_vm5, %v10987_v33, %v2982_v38  ;;  %v3089_v1 = vld [vmem:[#allocation2 + $0x18] sm:$0x1] }
 0x2d6   : > { %v9421_v60 = vld [vmem:[#allocation2 + $0x4] sm:$0x8]  ;;  %2977 = vst [vmem:[#allocation2 + $0xc8] sm:$0x1] %v2976_v37  ;;  %2980 = vst [vmem:[#allocation2] sm:$0xf] %v2979_v41 }
 0x2d7   : > { %2984 = vst [vmem:[#allocation2 + $0x8] sm:$0x1] %v2983_v31  ;;  %2988 = vst [vmem:[#allocation2 + $0xcc] sm:$0xf] %v2987_v18  ;;  %v2996_v40 = vld [vmem:[#allocation2 + $0x24] sm:$0x2] }
 0x2d8   : > { %v2997_v62 = vld [vmem:[#allocation2 + $0x30] sm:$0x2]  ;;  %v5862_v30 = vrot.slane %v2994_v2, 9  ;;  %v5863_v21 = vrot.slane %v2995_v6, 9  ;;  %v2998_v9 = vld [vmem:[#allocation2 + $0x3c] sm:$0x2] }
 0x2d9   : > { %v5864_v0 = vrot.slane %v2996_v40, 9  ;;  %v5865_v42 = vrot.slane %v2997_v62, 9  ;;  %v3092_v51 = vld [vmem:[#allocation2 + $0x24] sm:$0x1]  ;;  %v2999_v23 = vld [vmem:[#allocation2 + $0x48] sm:$0x2] }
 0x2da   : > { %v3000_v36 = vld [vmem:[#allocation2 + $0x54] sm:$0x2]  ;;  %v5866_v53 = vrot.slane %v2998_v9, 9  ;;  %v3087_v48 = vsel %vm8904_vm5, %v5862_v30, %v3086_v52  ;;  %v3090_v16 = vsel %vm8904_vm5, %v5863_v21, %v3089_v1  ;;  %v5879_v26 = vrot.slane %v9421_v60, 11  ;;  %v3001_v15 = vld [vmem:[#allocation2 + $0x60] sm:$0x2] }
 0x2db   : > { %v9428_v12 = vld [vmem:[#allocation2 + $0x6c] sm:$0x2]  ;;  %v5867_v38 = vrot.slane %v2999_v23, 9  ;;  %v5868_v22 = vrot.slane %v3000_v36, 9  ;;  %3088 = vst [vmem:[#allocation2 + $0xc] sm:$0x1] %v3087_v48  ;;  %v3093_v32 = vsel %vm8904_vm5, %v5864_v0, %v3092_v51 }
 0x2dc   : > { %3091 = vst [vmem:[#allocation2 + $0x18] sm:$0x1] %v3090_v16  ;;  %v3003_v63 = vld [vmem:[#allocation2 + $0x78] sm:$0x2]  ;;  %v3004_v14 = vld [vmem:[#allocation2 + $0x84] sm:$0x2] }
 0x2dd   : > { %v5869_v57 = vrot.slane %v3001_v15, 9  ;;  %v5870_v56 = vrot.slane %v9428_v12, 9  ;;  %3094 = vst [vmem:[#allocation2 + $0x24] sm:$0x1] %v3093_v32  ;;  %v3138_v39 = vld [vmem:[#allocation2 + $0x10] sm:$0x8] }
 0x2de   : > { %v9433_v4 = vld [vmem:[#allocation2 + $0x90] sm:$0x2]  ;;  %v9435_v27 = vld [vmem:[#allocation2 + $0x9c] sm:$0x2]  ;;  %v5871_v8 = vrot.slane %v3003_v63, 9  ;;  %v5872_v35 = vrot.slane %v3004_v14, 9 }
 0x2df   : > { %v3007_v43 = vld [vmem:[#allocation2 + $0xa8] sm:$0x2]  ;;  %v9437_v20 = vld [vmem:[#allocation2 + $0xb4] sm:$0x2]  ;;  %v9439_v50 = vld [vmem:[#allocation2 + $0xc0] sm:$0x2] }
 0x2e0   : > { %v2993_v7 = vld [vmem:[#allocation2] sm:$0x2]  ;;  %v9441_v29 = vld [vmem:[#allocation2 + $0xcc] sm:$0x2]  ;;  %v5873_v55 = vrot.slane %v9433_v4, 9  ;;  %v5874_v28 = vrot.slane %v9435_v27, 9 }
 0x2e1   : > { %v5861_v54 = vrot.slane %v2993_v7, 9  ;;  %v5875_v19 = vrot.slane %v3007_v43, 9  ;;  %v5876_v49 = vrot.slane %v9437_v20, 9  ;;  %v5877_v59 = vrot.slane %v9439_v50, 9  ;;  %v3083_v3 = vld [vmem:[#allocation2] sm:$0x1] }
 0x2e2   : > { %v3231_v10 = vld [vmem:[#allocation2 + $0x14] sm:$0x1]  ;;  %v5878_v45 = vrot.slane %v9441_v29, 9  ;;  %v3095_v25 = vld [vmem:[#allocation2 + $0x30] sm:$0x1]  ;;  %v5880_v58 = vrot.slane %v3138_v39, 11 }
 0x2e3   : > { %v3098_v61 = vld [vmem:[#allocation2 + $0x3c] sm:$0x1]  ;;  %v9448_v34 = vld [vmem:[#allocation2 + $0x1c] sm:$0x8]  ;;  %v3084_v17 = vsel %vm8904_vm5, %v5861_v54, %v3083_v3  ;;  %v3096_v24 = vsel %vm8904_vm5, %v5865_v42, %v3095_v25  ;;  %v3101_v13 = vld [vmem:[#allocation2 + $0x48] sm:$0x1] }
 0x2e4   : > { %v3099_v44 = vsel %vm8904_vm5, %v5866_v53, %v3098_v61  ;;  %v3104_v46 = vld [vmem:[#allocation2 + $0x54] sm:$0x1]  ;;  %v3107_v5 = vld [vmem:[#allocation2 + $0x60] sm:$0x1]  ;;  %v9456_v11 = vld [vmem:[#allocation2 + $0x28] sm:$0x8]  ;;  %v3102_v41 = vsel %vm8904_vm5, %v5867_v38, %v3101_v13  ;;  %v3232_v0 = vsel %vm8993_vm8, %v5880_v58, %v3231_v10 }
 0x2e5   : > { %v9458_v2 = vld [vmem:[#allocation2 + $0x34] sm:$0x8]  ;;  %v9460_v6 = vld [vmem:[#allocation2 + $0x40] sm:$0x8]  ;;  %v9462_v37 = vld [vmem:[#allocation2 + $0x4c] sm:$0x8]  ;;  %v3105_v33 = vsel %vm8904_vm5, %v5868_v22, %v3104_v46  ;;  %v3108_v31 = vsel %vm8904_vm5, %v5869_v57, %v3107_v5 }
 0x2e6   : > { %3085 = vst [vmem:[#allocation2] sm:$0x1] %v3084_v17  ;;  %3097 = vst [vmem:[#allocation2 + $0x30] sm:$0x1] %v3096_v24  ;;  %v3110_v18 = vld [vmem:[#allocation2 + $0x6c] sm:$0x1] }
 0x2e7   : > { %3100 = vst [vmem:[#allocation2 + $0x3c] sm:$0x1] %v3099_v44  ;;  %v3113_v52 = vld [vmem:[#allocation2 + $0x78] sm:$0x1]  ;;  %v3116_v1 = vld [vmem:[#allocation2 + $0x84] sm:$0x1]  ;;  %v3111_v42 = vsel %vm8904_vm5, %v5870_v56, %v3110_v18 }
 0x2e8   : > { %v9470_v40 = vld [vmem:[#allocation2 + $0x58] sm:$0x8]  ;;  %v9472_v62 = vld [vmem:[#allocation2 + $0x64] sm:$0x8]  ;;  %v9474_v30 = vld [vmem:[#allocation2 + $0x70] sm:$0x8]  ;;  %v3114_v51 = vsel %vm8904_vm5, %v5871_v8, %v3113_v52  ;;  %v3117_v23 = vsel %vm8904_vm5, %v5872_v35, %v3116_v1 }
 0x2e9   : > { %v9476_v21 = vld [vmem:[#allocation2 + $0x7c] sm:$0x8]  ;;  %3103 = vst [vmem:[#allocation2 + $0x48] sm:$0x1] %v3102_v41  ;;  %3106 = vst [vmem:[#allocation2 + $0x54] sm:$0x1] %v3105_v33 }
 0x2ea   : > { %3109 = vst [vmem:[#allocation2 + $0x60] sm:$0x1] %v3108_v31  ;;  %v3119_v36 = vld [vmem:[#allocation2 + $0x90] sm:$0x1]  ;;  %v3122_v53 = vld [vmem:[#allocation2 + $0x9c] sm:$0x1] }
 0x2eb   : > { %v3125_v48 = vld [vmem:[#allocation2 + $0xa8] sm:$0x1]  ;;  %v9486_v16 = vld [vmem:[#allocation2 + $0x88] sm:$0x8]  ;;  %v9488_v15 = vld [vmem:[#allocation2 + $0x94] sm:$0x8]  ;;  %v3120_v38 = vsel %vm8904_vm5, %v5873_v55, %v3119_v36  ;;  %v3123_v22 = vsel %vm8904_vm5, %v5874_v28, %v3122_v53 }
 0x2ec   : > { %v9490_v12 = vld [vmem:[#allocation2 + $0xa0] sm:$0x8]  ;;  %3233 = vst [vmem:[#allocation2 + $0x14] sm:$0x1] %v3232_v0  ;;  %3112 = vst [vmem:[#allocation2 + $0x6c] sm:$0x1] %v3111_v42  ;;  %v3126_v32 = vsel %vm8904_vm5, %v5875_v19, %v3125_v48 }
 0x2ed   : > { %3115 = vst [vmem:[#allocation2 + $0x78] sm:$0x1] %v3114_v51  ;;  %3118 = vst [vmem:[#allocation2 + $0x84] sm:$0x1] %v3117_v23  ;;  %v3128_v63 = vld [vmem:[#allocation2 + $0xb4] sm:$0x1] }
 0x2ee   : > { %v3131_v14 = vld [vmem:[#allocation2 + $0xc0] sm:$0x1]  ;;  %v3134_v57 = vld [vmem:[#allocation2 + $0xcc] sm:$0x1]  ;;  %3121 = vst [vmem:[#allocation2 + $0x90] sm:$0x1] %v3120_v38  ;;  %v3129_v56 = vsel %vm8904_vm5, %v5876_v49, %v3128_v63 }
 0x2ef   : > { %3124 = vst [vmem:[#allocation2 + $0x9c] sm:$0x1] %v3123_v22  ;;  %3127 = vst [vmem:[#allocation2 + $0xa8] sm:$0x1] %v3126_v32  ;;  %v3132_v39 = vsel %vm8904_vm5, %v5877_v59, %v3131_v14  ;;  %v3135_v4 = vsel %vm8904_vm5, %v5878_v45, %v3134_v57  ;;  %v9504_v27 = vld [vmem:[#allocation2 + $0xac] sm:$0x8] }
 0x2f0   : > { %v9506_v8 = vld [vmem:[#allocation2 + $0xc4] sm:$0x8]  ;;  %v5881_v35 = vrot.slane %v9448_v34, 11  ;;  %v9509_v43 = vld [vmem:[#allocation2 + $0xc] sm:$0xff]   ;;  %3130 = vst [vmem:[#allocation2 + $0xb4] sm:$0x1] %v3129_v56 }
 0x2f1   : > { %3133 = vst [vmem:[#allocation2 + $0xc0] sm:$0x1] %v3132_v39  ;;  %3136 = vst [vmem:[#allocation2 + $0xcc] sm:$0x1] %v3135_v4  ;;  %v5882_v20 = vrot.slane %v9456_v11, 11  ;;  %v5883_v50 = vrot.slane %v9458_v2, 11  ;;  %4580 = vmatprep.mubr.bf16.mxu0 %v9509_v43 }
 0x2f2   : > { %v5884_v7 = vrot.slane %v9460_v6, 11  ;;  %v5885_v47 = vrot.slane %v9462_v37, 11  ;;  %v3228_v29 = vld [vmem:[#allocation2 + $0x8] sm:$0x1]  ;;  %v3234_v55 = vld [vmem:[#allocation2 + $0x20] sm:$0x1] }
 0x2f3   : > { %v5886_v28 = vrot.slane %v9470_v40, 11  ;;  %v5887_v54 = vrot.slane %v9472_v62, 11  ;;  %v5888_v19 = vrot.slane %v9474_v30, 11  ;;  %v5889_v49 = vrot.slane %v9476_v21, 11  ;;  %v3237_v59 = vld [vmem:[#allocation2 + $0x2c] sm:$0x1] }
 0x2f4   : > { %v5890_v3 = vrot.slane %v9486_v16, 11  ;;  %v5891_v10 = vrot.slane %v9488_v15, 11  ;;  %v5892_v45 = vrot.slane %v9490_v12, 11  ;;  %v5893_v25 = vrot.slane %v9504_v27, 11  ;;  %v3240_v61 = vld [vmem:[#allocation2 + $0x38] sm:$0x1] }
 0x2f5   : > { %v5895_v34 = vrot.slane %v9506_v8, 11  ;;  %v3229_v58 = vsel %vm8993_vm8, %v5879_v26, %v3228_v29  ;;  %v3235_v17 = vsel %vm8993_vm8, %v5881_v35, %v3234_v55  ;;  %v3238_v24 = vsel %vm8993_vm8, %v5882_v20, %v3237_v59  ;;  %v3243_v44 = vld [vmem:[#allocation2 + $0x44] sm:$0x1]  ;;  %v3246_v13 = vld [vmem:[#allocation2 + $0x50] sm:$0x1]  ;;  %v9562_v15 = vld [vmem:[#allocation2 + $0x18] sm:$0xff]  }
 0x2f6   : > { %v9533_v46 = vld [vmem:[#allocation2] sm:$0xff]   ;;  %3230 = vst [vmem:[#allocation2 + $0x8] sm:$0x1] %v3229_v58  ;;  %3236 = vst [vmem:[#allocation2 + $0x20] sm:$0x1] %v3235_v17  ;;  %v3241_v5 = vsel %vm8993_vm8, %v5883_v50, %v3240_v61  ;;  %v3244_v60 = vsel %vm8993_vm8, %v5884_v7, %v3243_v44  ;;  %v3247_v26 = vsel %vm8993_vm8, %v5885_v47, %v3246_v13  ;;  %v3495_v48 = vshll.u32 %v9509_v43, 16 }
 0x2f7   : > { %3239 = vst [vmem:[#allocation2 + $0x2c] sm:$0x1] %v3238_v24  ;;  %v3249_v11 = vld [vmem:[#allocation2 + $0x5c] sm:$0x1]  ;;  %v3252_v2 = vld [vmem:[#allocation2 + $0x68] sm:$0x1] }
 0x2f8   : > { %v3255_v6 = vld [vmem:[#allocation2 + $0x74] sm:$0x1]  ;;  %3242 = vst [vmem:[#allocation2 + $0x38] sm:$0x1] %v3241_v5  ;;  %3245 = vst [vmem:[#allocation2 + $0x44] sm:$0x1] %v3244_v60  ;;  %v3250_v37 = vsel %vm8993_vm8, %v5886_v28, %v3249_v11  ;;  %v3253_v41 = vsel %vm8993_vm8, %v5887_v54, %v3252_v2 }
 0x2f9   : > { %3248 = vst [vmem:[#allocation2 + $0x50] sm:$0x1] %v3247_v26  ;;  %v3256_v33 = vsel %vm8993_vm8, %v5888_v19, %v3255_v6  ;;  %v3258_v31 = vld [vmem:[#allocation2 + $0x80] sm:$0x1]  ;;  %v3261_v18 = vld [vmem:[#allocation2 + $0x8c] sm:$0x1] }
 0x2fa   : > { %v3264_v52 = vld [vmem:[#allocation2 + $0x98] sm:$0x1]  ;;  %3251 = vst [vmem:[#allocation2 + $0x5c] sm:$0x1] %v3250_v37  ;;  %3254 = vst [vmem:[#allocation2 + $0x68] sm:$0x1] %v3253_v41  ;;  %v3259_v1 = vsel %vm8993_vm8, %v5889_v49, %v3258_v31  ;;  %v3262_v40 = vsel %vm8993_vm8, %v5890_v3, %v3261_v18 }
 0x2fb   : > { %3257 = vst [vmem:[#allocation2 + $0x74] sm:$0x1] %v3256_v33  ;;  %v3265_v62 = vsel %vm8993_vm8, %v5891_v10, %v3264_v52  ;;  %v3267_v30 = vld [vmem:[#allocation2 + $0xa4] sm:$0x1]  ;;  %v3270_v21 = vld [vmem:[#allocation2 + $0xb0] sm:$0x1] }
 0x2fc   : > { %v3276_v0 = vld [vmem:[#allocation2 + $0xc8] sm:$0x1]  ;;  %3260 = vst [vmem:[#allocation2 + $0x80] sm:$0x1] %v3259_v1  ;;  %3263 = vst [vmem:[#allocation2 + $0x8c] sm:$0x1] %v3262_v40  ;;  %v3268_v42 = vsel %vm8993_vm8, %v5892_v45, %v3267_v30  ;;  %v3271_v51 = vsel %vm8993_vm8, %v5893_v25, %v3270_v21 }
 0x2fd   : > { %3266 = vst [vmem:[#allocation2 + $0x98] sm:$0x1] %v3265_v62  ;;  %v3277_v23 = vsel %vm8993_vm8, %v5895_v34, %v3276_v0  ;;  %3269 = vst [vmem:[#allocation2 + $0xa4] sm:$0x1] %v3268_v42  ;;  %v3483_v36 = vshll.u32 %v9533_v46, 16  ;;  %v3688_v16 = vrot.slane %v9533_v46, 1 }
 0x2fe   : > { %3272 = vst [vmem:[#allocation2 + $0xb0] sm:$0x1] %v3271_v51  ;;  %3278 = vst [vmem:[#allocation2 + $0xc8] sm:$0x1] %v3277_v23  ;;  %v3481_v12 = vshrl.u32 %v9533_v46, 16  ;;  %v3497_v32 = vrot.slane %v3495_v48, 1 }
 0x2ff   : > { %v7237_v53 = vld [vmem:[#allocation2 + $0x14] ss:$0 sps:$4 sm:$0x11]   ;;  %v3485_v38 = vrot.slane %v3483_v36, 1  ;;  %v3493_v9 = vshrl.u32 %v9509_v43, 16  ;;  %v7264_v39 = vld [vmem:[%s10936_s5 + $0x180] sm:$0xff]  }
 0x300   : > { %v7234_v22 = vld [vmem:[#allocation2 + $0x8] ss:$0 sps:$4 sm:$0x11]   ;;  %v3500_v56 = vshll.u32 %v7237_v53, 16  ;;  %v7238_v20 = vld [vmem:[%s10936_s5 + $0x100] sm:$0xff]   ;;  %v3507_v50 = vshll.u32 %v9562_v15, 16 }
 0x301   : > { %v3689_v63 = vrot.slane %v7234_v22, 1  ;;  %v3486_v14 = vor.u32 %v3485_v38, %v3481_v12  ;;  %v3488_v57 = vshll.u32 %v7234_v22, 16  ;;  %v7269_v4 = vld [vmem:[%s10936_s5 + $0x1c8] sm:$0xff]   ;;  %v3498_v35 = vor.u32 %v3497_v32, %v3493_v9  ;;  %v7240_v7 = vld [vmem:[#allocation2 + $0x20] ss:$0 sps:$4 sm:$0x11]  }
 0x302   : > { %v7242_v47 = vld [vmem:[%s10936_s5 + $0x148] sm:$0xff]   ;;  %v3502_v55 = vrot.slane %v3500_v56, 1  ;;  %v3691_v19 = vrot.slane %v9509_v43, 1  ;;  %v3692_v49 = vrot.slane %v7237_v53, 1  ;;  %v3509_v3 = vrot.slane %v3507_v50, 1  ;;  %v7248_v61 = vld [vmem:[%s10936_s5 + $0x150] sm:$0xff]  }
 0x303   : > { %v3690_v27 = vsel %vm663_vm0, %v3688_v16, %v3689_v63  ;;  %v3490_v8 = vrot.slane %v3488_v57, 1  ;;  %v7272_v28 = vld [vmem:[%s10936_s5 + $0x188] sm:$0xff]   ;;  %v3505_v45 = vshrl.u32 %v9562_v15, 16  ;;  %v3512_v25 = vshll.u32 %v7240_v7, 16  ;;  %v7250_v24 = vld [vmem:[%s10936_s5 + $0x110] sm:$0xff]   ;;  %v7256_v6 = vld [vmem:[%s10936_s5 + $0x118] sm:$0xff]  }
 0x304   : > { %4581 = vmatmul.mubr.bf16.vlgmr.msra.gmra.mrb[160].mxu0 %v3690_v27  ;;  %v9587_v54 = vsel %vm422_vm1, %v3498_v35, %v3502_v55  ;;  %v9590_v59 = vld [vmem:[#allocation2 + $0x24] sm:$0xff]   ;;  %v9601_v34 = vsel %vm663_vm0, %v3691_v19, %v3692_v49  ;;  %v7243_v13 = vld [vmem:[#allocation2 + $0x2c] ss:$0 sps:$4 sm:$0x11]   ;;  %v3694_v5 = vrot.slane %v9562_v15, 1  ;;  %v9613_v60 = vld [vmem:[#allocation2 + $0x30] sm:$0xff]  }
 0x305   : > { %4588 = vmatprep.mubr.bf16.mxu0 %v9562_v15  ;;  %v3491_v29 = vsel %vm422_vm1, %v3486_v14, %v3490_v8  ;;  %6855 = vmatpush3.bf16.msra.mxu0 %v7264_v39  ;;  %v7244_v10 = vld [vmem:[%s10936_s5 + $0x108] sm:$0xff]   ;;  %v3510_v58 = vor.u32 %v3509_v3, %v3505_v45  ;;  %v3519_v17 = vshll.u32 %v9590_v59, 16  ;;  %v3514_v44 = vrot.slane %v3512_v25, 1  ;;  %v7263_v52 = vld [vmem:[%s10936_s5 + $0x120] sm:$0xff]   ;;  %v7276_v38 = vld [vmem:[%s10936_s5 + $0x170] sm:$0xff]  }
 0x306   : > { %4419 = vmatprep.mubr.bf16.mxu1 %v3491_v29  ;;  %6856 = vmatprep.subr.bf16.mxu0 %v7269_v4  ;;  %v3695_v11 = vrot.slane %v7240_v7, 1  ;;  %v3517_v37 = vshrl.u32 %v9590_v59, 16  ;;  %v3524_v41 = vshll.u32 %v7243_v13, 16  ;;  %v3531_v18 = vshll.u32 %v9613_v60, 16  ;;  %v7268_v62 = vld [vmem:[%s10936_s5 + $0x168] sm:$0xff]   ;;  %v9644_v42 = vld [vmem:[#allocation2 + $0x3c] sm:$0xff]  }
 0x307   : > { %4420 = vmatmul.mubr.bf16.vlgmr.msra.gmra.mrb[128].mxu1 %v9533_v46  ;;  %v7254_v46 = vld [vmem:[%s10936_s5 + $0x158] sm:$0xff]   ;;  %v9617_v26 = vsel %vm422_vm1, %v3510_v58, %v3514_v44  ;;  %v3521_v2 = vrot.slane %v3519_v17, 1  ;;  %v3697_v21 = vrot.slane %v9590_v59, 1  ;;  %v3698_v0 = vrot.slane %v7243_v13, 1  ;;  %v7271_v23 = vld [vmem:[%s10936_s5 + $0x128] sm:$0xff]   ;;  %v7277_v22 = vld [vmem:[%s10936_s5 + $0x1d0] sm:$0xff]  }
 0x308   : > { %4427 = vmatprep.mubr.bf16.mxu1 %v9587_v54  ;;  %6743 = vmatpush3.bf16.msra.mxu1 %v7238_v20  ;;  %v9628_v33 = vsel %vm663_vm0, %v3694_v5, %v3695_v11  ;;  %v3526_v1 = vrot.slane %v3524_v41, 1  ;;  %v7246_v40 = vld [vmem:[#allocation2 + $0x38] ss:$0 sps:$4 sm:$0x11]   ;;  %v3533_v51 = vrot.slane %v3531_v18, 1  ;;  %v3529_v36 = vshrl.u32 %v9613_v60, 16 }
 0x309   : > { %6744 = vmatprep.subr.bf16.mxu1 %v7242_v47  ;;  %6857 = vmatpush3.bf16.msra.mxu0 %v7272_v28  ;;  %v3522_v31 = vor.u32 %v3521_v2, %v3517_v37  ;;  %v3536_v53 = vshll.u32 %v7246_v40, 16  ;;  %v9652_v48 = vsel %vm663_vm0, %v3697_v21, %v3698_v0  ;;  %v3543_v12 = vshll.u32 %v9644_v42, 16  ;;  %v7279_v32 = vld [vmem:[%s10936_s5 + $0x130] sm:$0xff]   ;;  %v7249_v63 = vld [vmem:[#allocation2 + $0x44] ss:$0 sps:$4 sm:$0x11]  }
 0x30a   : > { %v3534_v16 = vor.u32 %v3533_v51, %v3529_v36  ;;  %6858 = vmatprep.subr.bf16.mxu0 %v7277_v22  ;;  %v7280_v14 = vld [vmem:[%s10936_s5 + $0x190] sm:$0xff]   ;;  %v3700_v56 = vrot.slane %v9613_v60, 1  ;;  %v3701_v39 = vrot.slane %v7246_v40, 1  ;;  %v9674_v4 = vld [vmem:[#allocation2 + $0x48] sm:$0xff]   ;;  %v7282_v8 = vld [vmem:[%s10936_s5 + $0x1d8] sm:$0xff]   ;;  %v3541_v35 = vshrl.u32 %v9644_v42, 16 }
 0x30b   : > { %v9641_v30 = vsel %vm422_vm1, %v3522_v31, %v3526_v1  ;;  %v3538_v9 = vrot.slane %v3536_v53, 1  ;;  %v3545_v27 = vrot.slane %v3543_v12, 1  ;;  %v3548_v20 = vshll.u32 %v7249_v63, 16  ;;  %v7283_v50 = vld [vmem:[%s10936_s5 + $0x198] sm:$0xff]   ;;  %v7285_v7 = vld [vmem:[%s10936_s5 + $0x1e0] sm:$0xff]   ;;  %v7288_v25 = vld [vmem:[%s10936_s5 + $0x1e8] sm:$0xff]  }
 0x30c   : > { %4589 = vmatmul.mubr.bf16.gmra.mrb[164].mxu0 %v9601_v34  ;;  %6745 = vmatpush3.bf16.msra.mxu1 %v7244_v10  ;;  %v9688_v47 = vsel %vm663_vm0, %v3700_v56, %v3701_v39  ;;  %v3555_v55 = vshll.u32 %v9674_v4, 16  ;;  %v7289_v28 = vld [vmem:[%s10936_s5 + $0x178] sm:$0xff]   ;;  %v7252_v3 = vld [vmem:[#allocation2 + $0x50] ss:$0 sps:$4 sm:$0x11]   ;;  %v7287_v10 = vld [vmem:[%s10936_s5 + $0x1a0] sm:$0xff]  }
 0x30d   : > { %4596 = vmatprep.mubr.bf16.mxu0 %v9590_v59  ;;  %6746 = vmatprep.subr.bf16.mxu1 %v7248_v61  ;;  %v9671_v57 = vsel %vm422_vm1, %v3534_v16, %v3538_v9  ;;  %v3546_v29 = vor.u32 %v3545_v27, %v3541_v35  ;;  %v7292_v19 = vld [vmem:[%s10936_s5 + $0x138] sm:$0xff]   ;;  %v3550_v49 = vrot.slane %v3548_v20, 1  ;;  %v9705_v45 = vld [vmem:[%s10936_s5 + $0x200] sm:$0xff]   ;;  %v3703_v58 = vrot.slane %v9644_v42, 1  ;;  %v7290_v5 = vld [vmem:[%s10936_s5 + $0x1a8] sm:$0xff]  }
 0x30e   : > { %6859 = vmatpush3.bf16.msra.mxu0 %v7280_v14  ;;  %v3704_v17 = vrot.slane %v7249_v63, 1  ;;  %v3557_v44 = vrot.slane %v3555_v55, 1  ;;  %v3553_v13 = vshrl.u32 %v9674_v4, 16  ;;  %v7293_v11 = vld [vmem:[%s10936_s5 + $0x1f0] sm:$0xff]   ;;  %v7295_v18 = vld [vmem:[%s10936_s5 + $0x1f8] sm:$0xff]   ;;  %v3706_v1 = vrot.slane %v9674_v4, 1 }
 0x30f   : > { %4428 = vmatmul.mubr.bf16.gmra.mrb[132].mxu1 %v9509_v43  ;;  %v7260_v43 = vld [vmem:[%s10936_s5 + $0x160] sm:$0xff]   ;;  %6860 = vmatprep.subr.bf16.mxu0 %v7282_v8  ;;  %v9712_v61 = vsel %vm422_vm1, %v3546_v29, %v3550_v49  ;;  %v7294_v31 = vld [vmem:[%s10936_s5 + $0x1b0] sm:$0xff]   ;;  %v3707_v40 = vrot.slane %v7252_v3, 1 }
 0x310   : > { %4435 = vmatprep.mubr.bf16.mxu1 %v9617_v26  ;;  %6747 = vmatpush3.bf16.msra.mxu1 %v7250_v24  ;;  %v9715_v24 = vld [vmem:[#allocation2 + $0x54] sm:$0xff]   ;;  %v9727_v2 = vsel %vm663_vm0, %v3703_v58, %v3704_v17  ;;  %v9761_v63 = vld [vmem:[#allocation2 + $0x6c] sm:$0xff]  }
 0x311   : > { %6748 = vmatprep.subr.bf16.mxu1 %v7254_v46  ;;  %v3560_v46 = vshll.u32 %v7252_v3, 16  ;;  %v3567_v37 = vshll.u32 %v9715_v24, 16  ;;  %v3565_v0 = vshrl.u32 %v9715_v24, 16  ;;  %v9751_v36 = vsel %vm663_vm0, %v3706_v1, %v3707_v40  ;;  %v7270_v40 = vld [vmem:[#allocation2 + $0x8c] ss:$0 sps:$4 sm:$0x11]  }
 0x312   : > { %6861 = vmatpush3.bf16.msra.mxu0 %v7283_v50  ;;  %v3591_v35 = vshll.u32 %v9761_v63, 16  ;;  %v7262_v50 = vld [vmem:[#allocation2 + $0x74] ss:$0 sps:$4 sm:$0x11]   ;;  %v3589_v49 = vshrl.u32 %v9761_v63, 16 }
 0x313   : > { %6862 = vmatprep.subr.bf16.mxu0 %v7285_v7  ;;  %v3562_v41 = vrot.slane %v3560_v46, 1  ;;  %v3569_v21 = vrot.slane %v3567_v37, 1  ;;  %v3596_v3 = vshll.u32 %v7262_v50, 16  ;;  %v3715_v46 = vrot.slane %v9761_v63, 1 }
 0x314   : > { %4597 = vmatmul.mubr.bf16.gmra.mrb[168].mxu0 %v9628_v33  ;;  %6749 = vmatpush3.bf16.msra.mxu1 %v7256_v6  ;;  %v3558_v6 = vor.u32 %v3557_v44, %v3553_v13  ;;  %v7266_v44 = vld [vmem:[#allocation2 + $0x80] ss:$0 sps:$4 sm:$0x11]  }
 0x315   : > { %4604 = vmatprep.mubr.bf16.mxu0 %v9613_v60  ;;  %6750 = vmatprep.subr.bf16.mxu1 %v7260_v43  ;;  %v7255_v43 = vld [vmem:[#allocation2 + $0x5c] ss:$0 sps:$4 sm:$0x11]   ;;  %v3570_v53 = vor.u32 %v3569_v21, %v3565_v0  ;;  %v3598_v17 = vrot.slane %v3596_v3, 1 }
 0x316   : > { %6863 = vmatpush3.bf16.msra.mxu0 %v7287_v10  ;;  %v3572_v51 = vshll.u32 %v7255_v43, 16  ;;  %v3710_v9 = vrot.slane %v7255_v43, 1 }
 0x317   : > { %4436 = vmatmul.mubr.bf16.gmra.mrb[136].mxu1 %v9562_v15  ;;  %6864 = vmatprep.subr.bf16.mxu0 %v7288_v25 }
 0x318   : > { %4443 = vmatprep.mubr.bf16.mxu1 %v9641_v30  ;;  %6751 = vmatpush3.bf16.msra.mxu1 %v7263_v52  ;;  %v9740_v52 = vsel %vm422_vm1, %v3558_v6, %v3562_v41  ;;  %v3574_v12 = vrot.slane %v3572_v51, 1  ;;  %v3608_v41 = vshll.u32 %v7266_v44, 16  ;;  %v3719_v51 = vrot.slane %v7266_v44, 1 }
 0x319   : > { %6752 = vmatprep.subr.bf16.mxu1 %v7268_v62  ;;  %v9743_v62 = vld [vmem:[#allocation2 + $0x60] sm:$0xff]  }
 0x31a   : > { %6865 = vmatpush3.bf16.msra.mxu0 %v7290_v5  ;;  %v3579_v16 = vshll.u32 %v9743_v62, 16  ;;  %v9758_v22 = vsel %vm422_vm1, %v3570_v53, %v3574_v12  ;;  %v3577_v56 = vshrl.u32 %v9743_v62, 16  ;;  %v3712_v29 = vrot.slane %v9743_v62, 1 }
 0x31b   : > { %6866 = vmatprep.subr.bf16.mxu0 %v7293_v11  ;;  %v3716_v5 = vrot.slane %v7262_v50, 1  ;;  %v9791_v11 = vld [vmem:[#allocation2 + $0x84] sm:$0xff]   ;;  %v3610_v1 = vrot.slane %v3608_v41, 1  ;;  %v3620_v12 = vshll.u32 %v7270_v40, 16 }
 0x31c   : > { %4605 = vmatmul.mubr.bf16.gmra.mrb[172].mxu0 %v9652_v48  ;;  %6753 = vmatpush3.bf16.msra.mxu1 %v7271_v23  ;;  %v7296_v23 = vld [vmem:[%s10936_s5 + $0x1b8] sm:$0xff]   ;;  %v3581_v14 = vrot.slane %v3579_v16, 1  ;;  %v3613_v16 = vshrl.u32 %v9791_v11, 16 }
 0x31d   : > { %4612 = vmatprep.mubr.bf16.mxu0 %v9644_v42  ;;  %6754 = vmatprep.subr.bf16.mxu1 %v7276_v38  ;;  %v7258_v38 = vld [vmem:[#allocation2 + $0x68] ss:$0 sps:$4 sm:$0x11]   ;;  %v9796_v43 = vsel %vm663_vm0, %v3715_v46, %v3716_v5 }
 0x31e   : > { %6867 = vmatpush3.bf16.msra.mxu0 %v7294_v31  ;;  %v3584_v39 = vshll.u32 %v7258_v38, 16  ;;  %v3582_v8 = vor.u32 %v3581_v14, %v3577_v56  ;;  %v3713_v55 = vrot.slane %v7258_v38, 1  ;;  %v3622_v14 = vrot.slane %v3620_v12, 1  ;;  %v7274_v56 = vld [vmem:[#allocation2 + $0x98] ss:$0 sps:$4 sm:$0x11]  }
 0x31f   : > { %4444 = vmatmul.mubr.bf16.gmra.mrb[140].mxu1 %v9590_v59  ;;  %6868 = vmatprep.subr.bf16.mxu0 %v7295_v18  ;;  %v3615_v18 = vshll.u32 %v9791_v11, 16  ;;  %v3725_v46 = vrot.slane %v7274_v56, 1  ;;  %v9836_v5 = vld [vmem:[#allocation2 + $0xa8] sm:$0xff]   ;;  %v9851_v12 = vld [vmem:[#allocation2 + $0xb4] sm:$0xff]  }
 0x320   : > { %4451 = vmatprep.mubr.bf16.mxu1 %v9671_v57  ;;  %6755 = vmatpush3.bf16.msra.mxu1 %v7279_v32  ;;  %v3709_v32 = vrot.slane %v9715_v24, 1  ;;  %v3586_v20 = vrot.slane %v3584_v39, 1  ;;  %v9781_v10 = vsel %vm663_vm0, %v3712_v29, %v3713_v55  ;;  %v3632_v55 = vshll.u32 %v7274_v56, 16 }
 0x321   : > { %6756 = vmatprep.subr.bf16.mxu1 %v7289_v28  ;;  %v9776_v28 = vld [vmem:[#allocation2 + $0x78] sm:$0xff]   ;;  %v3617_v53 = vrot.slane %v3615_v18, 1 }
 0x322   : > { %6869 = vmatpush3.bf16.msra.mxu0 %v7296_v23  ;;  %v9766_v27 = vsel %vm663_vm0, %v3709_v32, %v3710_v9  ;;  %v9773_v7 = vsel %vm422_vm1, %v3582_v8, %v3586_v20  ;;  %v3603_v58 = vshll.u32 %v9776_v28, 16  ;;  %v3601_v37 = vshrl.u32 %v9776_v28, 16  ;;  %v9806_v23 = vld [vmem:[#allocation2 + $0x90] sm:$0xff]   ;;  %v9821_v20 = vld [vmem:[#allocation2 + $0x9c] sm:$0xff]  }
 0x323   : > { %v3718_v0 = vrot.slane %v9776_v28, 1  ;;  %v3618_v32 = vor.u32 %v3617_v53, %v3613_v16  ;;  %v3627_v9 = vshll.u32 %v9806_v23, 16  ;;  %v3721_v8 = vrot.slane %v9791_v11, 1 }
 0x324   : > { %4613 = vmatmul.mubr.bf16.gmra.mrb[176].mxu0 %v9688_v47  ;;  %6757 = vmatpush3.bf16.msra.mxu1 %v7292_v19  ;;  %v3593_v19 = vrot.slane %v3591_v35, 1  ;;  %v3605_v6 = vrot.slane %v3603_v58, 1  ;;  %v3722_v35 = vrot.slane %v7270_v40, 1  ;;  %v3625_v29 = vshrl.u32 %v9806_v23, 16 }
 0x325   : > { %4620 = vmatprep.mubr.bf16.mxu0 %v9674_v4  ;;  %7038 = vmatprep.subr.bf16.mxu1 %v9705_v45  ;;  %v9811_v38 = vsel %vm663_vm0, %v3718_v0, %v3719_v51  ;;  %v9818_v39 = vsel %vm422_vm1, %v3618_v32, %v3622_v14  ;;  %v3629_v50 = vrot.slane %v3627_v9, 1  ;;  %v3639_v3 = vshll.u32 %v9821_v20, 16  ;;  %v7278_v58 = vld [vmem:[#allocation2 + $0xa4] ss:$0 sps:$4 sm:$0x11]  }
 0x326   : > { %v3594_v25 = vor.u32 %v3593_v19, %v3589_v49  ;;  %v3606_v31 = vor.u32 %v3605_v6, %v3601_v37  ;;  %v9826_v19 = vsel %vm663_vm0, %v3721_v8, %v3722_v35  ;;  %v3724_v44 = vrot.slane %v9806_v23, 1  ;;  %v7284_v0 = vld [vmem:[#allocation2 + $0xb0] ss:$0 sps:$4 sm:$0x11]  }
 0x327   : > { %4452 = vmatmul.mubr.bf16.gmra.mrb[144].mxu1 %v9613_v60  ;;  %v3630_v49 = vor.u32 %v3629_v50, %v3625_v29  ;;  %v3641_v6 = vrot.slane %v3639_v3, 1  ;;  %v3637_v37 = vshrl.u32 %v9821_v20, 16  ;;  %v3644_v41 = vshll.u32 %v7278_v58, 16  ;;  %v7291_v29 = vld [vmem:[#allocation2 + $0xbc] ss:$0 sps:$4 sm:$0x11]  }
 0x328   : > { %4459 = vmatprep.mubr.bf16.mxu1 %v9712_v61  ;;  %v9788_v13 = vsel %vm422_vm1, %v3594_v25, %v3598_v17  ;;  %v9803_v21 = vsel %vm422_vm1, %v3606_v31, %v3610_v1  ;;  %v3634_v25 = vrot.slane %v3632_v55, 1  ;;  %v9841_v31 = vsel %vm663_vm0, %v3724_v44, %v3725_v46 }
 0x329   : > { %v3642_v18 = vor.u32 %v3641_v6, %v3637_v37  ;;  %v3651_v1 = vshll.u32 %v9836_v5, 16  ;;  %v3646_v40 = vrot.slane %v3644_v41, 1  ;;  %v3727_v53 = vrot.slane %v9821_v20, 1  ;;  %v9871_v6 = vld [vmem:[#allocation2 + $0xc0] sm:$0xff]  }
 0x32a   : > { %v9833_v17 = vsel %vm422_vm1, %v3630_v49, %v3634_v25  ;;  %v3728_v16 = vrot.slane %v7278_v58, 1  ;;  %v3649_v9 = vshrl.u32 %v9836_v5, 16  ;;  %v3656_v14 = vshll.u32 %v7284_v0, 16 }
 0x32b   : > { %v9848_v51 = vsel %vm422_vm1, %v3642_v18, %v3646_v40  ;;  %v3653_v32 = vrot.slane %v3651_v1, 1  ;;  %v3663_v35 = vshll.u32 %v9851_v12, 16  ;;  %v3730_v49 = vrot.slane %v9836_v5, 1 }
 0x32c   : > { %4621 = vmatmul.mubr.bf16.gmra.mrb[180].mxu0 %v9727_v2  ;;  %v9856_v56 = vsel %vm663_vm0, %v3727_v53, %v3728_v16  ;;  %v3658_v50 = vrot.slane %v3656_v14, 1  ;;  %v3731_v3 = vrot.slane %v7284_v0, 1  ;;  %v3661_v58 = vshrl.u32 %v9851_v12, 16  ;;  %v7298_v53 = vld [vmem:[%s10936_s5 + $0x208] sm:$0xff]   ;;  %v7299_v16 = vld [vmem:[%s10936_s5 + $0x210] sm:$0xff]  }
 0x32d   : > { %4628 = vmatprep.mubr.bf16.mxu0 %v9715_v24  ;;  %v3654_v8 = vor.u32 %v3653_v32, %v3649_v9  ;;  %v3665_v25 = vrot.slane %v3663_v35, 1  ;;  %v3668_v44 = vshll.u32 %v7291_v29, 16  ;;  %v3733_v1 = vrot.slane %v9851_v12, 1 }
 0x32e   : > { %v9869_v46 = vsel %vm663_vm0, %v3730_v49, %v3731_v3  ;;  %v3734_v40 = vrot.slane %v7291_v29, 1 }
 0x32f   : > { %4460 = vmatmul.mubr.bf16.gmra.mrb[148].mxu1 %v9644_v42  ;;  %v9863_v55 = vsel %vm422_vm1, %v3654_v8, %v3658_v50  ;;  %v3666_v37 = vor.u32 %v3665_v25, %v3661_v58  ;;  %v3670_v41 = vrot.slane %v3668_v44, 1  ;;  %v9968_v8 = vld [vmem:[#allocation2 + $0xc8] ss:$0 sps:$4 sm:$0x11]   ;;  %v9973_v25 = vld [vmem:[#allocation2 + $0xcc] sm:$0xff]  }
 0x330   : > { %4467 = vmatprep.mubr.bf16.mxu1 %v9740_v52  ;;  %v9882_v0 = vsel %vm663_vm0, %v3733_v1, %v3734_v40  ;;  %v3769_v1 = vshll.u32 %v9968_v8, 16 }
 0x331   : > { %v9877_v18 = vsel %vm422_vm1, %v3666_v37, %v3670_v41  ;;  %v3762_v41 = vshrl.u32 %v9871_v6, 16 }
 0x334   : > { %4629 = vmatmul.mubr.bf16.gmra.mrb[184].mxu0 %v9751_v36 }
 0x335   : > { %4636 = vmatprep.mubr.bf16.mxu0 %v9743_v62 }
 0x337   : > { %4468 = vmatmul.mubr.bf16.gmra.mrb[152].mxu1 %v9674_v4 }
 0x338   : > { %4475 = vmatprep.mubr.bf16.mxu1 %v9758_v22 }
 0x33c   : > { %4637 = vmatmul.mubr.bf16.gmra.mrb[188].mxu0 %v9766_v27 }
 0x33d   : > { %4644 = vmatprep.mubr.bf16.mxu0 %v9761_v63 }
 0x33f   : > { %4476 = vmatmul.mubr.bf16.gmra.mrb[156].mxu1 %v9715_v24 }
 0x340   : > { %4483 = vmatprep.mubr.bf16.mxu1 %v9773_v7 }
 0x344   : > { %4645 = vmatmul.mubr.bf16.gmra.mrb[192].mxu0 %v9781_v10 }
 0x345   : > { %4652 = vmatprep.mubr.bf16.mxu0 %v9776_v28 }
 0x347   : > { %4484 = vmatmul.mubr.bf16.gmra.mrb[160].mxu1 %v9743_v62 }
 0x348   : > { %4491 = vmatprep.mubr.bf16.mxu1 %v9788_v13 }
 0x34c   : > { %4653 = vmatmul.mubr.bf16.gmra.mrb[196].mxu0 %v9796_v43 }
 0x34d   : > { %4660 = vmatprep.mubr.bf16.mxu0 %v9791_v11 }
 0x34f   : > { %4492 = vmatmul.mubr.bf16.gmra.mrb[164].mxu1 %v9761_v63 }
 0x350   : > { %4499 = vmatprep.mubr.bf16.mxu1 %v9803_v21 }
 0x354   : > { %4661 = vmatmul.mubr.bf16.gmra.mrb[200].mxu0 %v9811_v38 }
 0x355   : > { %4668 = vmatprep.mubr.bf16.mxu0 %v9806_v23 }
 0x357   : > { %4500 = vmatmul.mubr.bf16.gmra.mrb[168].mxu1 %v9776_v28 }
 0x358   : > { %4507 = vmatprep.mubr.bf16.mxu1 %v9818_v39 }
 0x35c   : > { %4669 = vmatmul.mubr.bf16.gmra.mrb[204].mxu0 %v9826_v19 }
 0x35d   : > { %4676 = vmatprep.mubr.bf16.mxu0 %v9821_v20 }
 0x35f   : > { %4508 = vmatmul.mubr.bf16.gmra.mrb[172].mxu1 %v9791_v11 }
 0x360   : > { %4515 = vmatprep.mubr.bf16.mxu1 %v9833_v17 }
 0x364   : > { %4677 = vmatmul.mubr.bf16.gmra.mrb[208].mxu0 %v9841_v31 }
 0x365   : > { %4684 = vmatprep.mubr.bf16.mxu0 %v9836_v5 }
 0x367   : > { %4516 = vmatmul.mubr.bf16.gmra.mrb[176].mxu1 %v9806_v23 }
 0x368   : > { %4523 = vmatprep.mubr.bf16.mxu1 %v9848_v51 }
 0x36c   : > { %4685 = vmatmul.mubr.bf16.gmra.mrb[212].mxu0 %v9856_v56 }
 0x36d   : > { %4692 = vmatprep.mubr.bf16.mxu0 %v9851_v12 }
 0x36f   : > { %4524 = vmatmul.mubr.bf16.gmra.mrb[180].mxu1 %v9821_v20 }
 0x370   : > { %4531 = vmatprep.mubr.bf16.mxu1 %v9863_v55 }
 0x374   : > { %4693 = vmatmul.mubr.bf16.gmra.mrb[216].mxu0 %v9869_v46 }
 0x375   : > { %4700 = vmatprep.mubr.bf16.mxu0 %v9871_v6 }
 0x377   : > { %4532 = vmatmul.mubr.bf16.gmra.mrb[184].mxu1 %v9836_v5 }
 0x378   : > { %4539 = vmatprep.mubr.bf16.mxu1 %v9877_v18 }
 0x37c   : > { %4701 = vmatmul.mubr.bf16.gmra.mrb[220].mxu0 %v9882_v0 }
 0x37d   : > { %4902 = vmatprep.mubr.bf16.mxu0 %v9617_v26 }
 0x37f   : > { %4540 = vmatmul.mubr.bf16.gmra.mrb[188].mxu1 %v9851_v12 }
 0x380   : > { %4741 = vmatprep.mubr.bf16.mxu1 %v9601_v34  ;;  %v7303_v34 = vld [vmem:[%s10936_s5 + $0x230] sm:$0xff]  }
 0x384   : > { %4903 = vmatmul.mubr.bf16.vlgmr.msra.gmra.mrb[224].mxu0 %v9562_v15  ;;  %v7300_v15 = vld [vmem:[%s10936_s5 + $0x218] sm:$0xff]  }
 0x385   : > { %4910 = vmatprep.mubr.bf16.mxu0 %v9641_v30 }
 0x387   : > { %4742 = vmatmul.mubr.bf16.vlgmr.msra.gmra.mrb[192].mxu1 %v9587_v54  ;;  %v7301_v54 = vld [vmem:[%s10936_s5 + $0x220] sm:$0xff]  }
 0x388   : > { %4749 = vmatprep.mubr.bf16.mxu1 %v9628_v33  ;;  %7039 = vmatpush3.bf16.msra.mxu1 %v9705_v45 }
 0x389   : > { %7040 = vmatprep.subr.bf16.mxu1 %v7298_v53 }
 0x38c   : > { %4911 = vmatmul.mubr.bf16.gmra.mrb[228].mxu0 %v9590_v59  ;;  %7041 = vmatpush3.bf16.msra.mxu1 %v7298_v53  ;;  %v7302_v59 = vld [vmem:[%s10936_s5 + $0x228] sm:$0xff]  }
 0x38d   : > { %4918 = vmatprep.mubr.bf16.mxu0 %v9671_v57  ;;  %7042 = vmatprep.subr.bf16.mxu1 %v7299_v16 }
 0x38f   : > { %4750 = vmatmul.mubr.bf16.gmra.mrb[196].mxu1 %v9617_v26 }
 0x390   : > { %4757 = vmatprep.mubr.bf16.mxu1 %v9652_v48  ;;  %7043 = vmatpush3.bf16.msra.mxu1 %v7299_v16 }
 0x391   : > { %7044 = vmatprep.subr.bf16.mxu1 %v7300_v15 }
 0x394   : > { %4919 = vmatmul.mubr.bf16.gmra.mrb[232].mxu0 %v9613_v60  ;;  %7045 = vmatpush3.bf16.msra.mxu1 %v7300_v15  ;;  %v7307_v60 = vld [vmem:[%s10936_s5 + $0x238] sm:$0xff]   ;;  %v3790_v15 = vshll.u32 %v9973_v25, 16 }
 0x395   : > { %4926 = vmatprep.mubr.bf16.mxu0 %v9712_v61  ;;  %7046 = vmatprep.subr.bf16.mxu1 %v7301_v54 }
 0x397   : > { %4758 = vmatmul.mubr.bf16.gmra.mrb[200].mxu1 %v9641_v30 }
 0x398   : > { %4765 = vmatprep.mubr.bf16.mxu1 %v9688_v47  ;;  %7047 = vmatpush3.bf16.msra.mxu1 %v7301_v54 }
 0x399   : > { %7048 = vmatprep.subr.bf16.mxu1 %v7302_v59 }
 0x39c   : > { %4927 = vmatmul.mubr.bf16.gmra.mrb[236].mxu0 %v9644_v42  ;;  %7049 = vmatpush3.bf16.msra.mxu1 %v7302_v59 }
 0x39d   : > { %4934 = vmatprep.mubr.bf16.mxu0 %v9740_v52  ;;  %7050 = vmatprep.subr.bf16.mxu1 %v7303_v34 }
 0x39f   : > { %4766 = vmatmul.mubr.bf16.gmra.mrb[204].mxu1 %v9671_v57 }
 0x3a0   : > { %4773 = vmatprep.mubr.bf16.mxu1 %v9727_v2  ;;  %7051 = vmatpush3.bf16.msra.mxu1 %v7303_v34 }
 0x3a1   : > { %7052 = vmatprep.subr.bf16.mxu1 %v7307_v60 }
 0x3a4   : > { %4935 = vmatmul.mubr.bf16.gmra.mrb[240].mxu0 %v9674_v4  ;;  %7053 = vmatpush3.bf16.msra.mxu1 %v7307_v60 }
 0x3a5   : > { %4942 = vmatprep.mubr.bf16.mxu0 %v9758_v22 }
 0x3a7   : > { %4774 = vmatmul.mubr.bf16.gmra.mrb[208].mxu1 %v9712_v61 }
 0x3a8   : > { %4781 = vmatprep.mubr.bf16.mxu1 %v9751_v36 }
 0x3ac   : > { %4943 = vmatmul.mubr.bf16.gmra.mrb[244].mxu0 %v9715_v24  ;;  %v9957_v24 = vld [vmem:[%s10937_s6] ss:$0 sm:$0xff] }
 0x3ad   : > { %4950 = vmatprep.mubr.bf16.mxu0 %v9773_v7 }
 0x3af   : > { %4782 = vmatmul.mubr.bf16.gmra.mrb[212].mxu1 %v9740_v52 }
 0x3b0   : > { %4789 = vmatprep.mubr.bf16.mxu1 %v9766_v27 }
 0x3b4   : > { %4951 = vmatmul.mubr.bf16.gmra.mrb[248].mxu0 %v9743_v62 }
 0x3b5   : > { %4958 = vmatprep.mubr.bf16.mxu0 %v9788_v13 }
 0x3b7   : > { %4790 = vmatmul.mubr.bf16.gmra.mrb[216].mxu1 %v9758_v22 }
 0x3b8   : > { %4797 = vmatprep.mubr.bf16.mxu1 %v9781_v10 }
 0x3bc   : > { %4959 = vmatmul.mubr.bf16.gmra.mrb[252].mxu0 %v9761_v63 }
 0x3bd   : > { %4966 = vmatprep.mubr.bf16.mxu0 %v9803_v21 }
 0x3bf   : > { %4798 = vmatmul.mubr.bf16.gmra.mrb[220].mxu1 %v9773_v7 }
 0x3c0   : > { %4805 = vmatprep.mubr.bf16.mxu1 %v9796_v43 }
 0x3c4   : > { %4967 = vmatmul.mubr.bf16.gmra.mrb[0].mxu0 %v9776_v28 }
 0x3c5   : > { %4974 = vmatprep.mubr.bf16.mxu0 %v9818_v39 }
 0x3c7   : > { %4806 = vmatmul.mubr.bf16.gmra.mrb[224].mxu1 %v9788_v13 }
 0x3c8   : > { %4813 = vmatprep.mubr.bf16.mxu1 %v9811_v38 }
 0x3cc   : > { %4975 = vmatmul.mubr.bf16.gmra.mrb[4].mxu0 %v9791_v11 }
 0x3cd   : > { %4982 = vmatprep.mubr.bf16.mxu0 %v9833_v17 }
 0x3cf   : > { %4814 = vmatmul.mubr.bf16.gmra.mrb[228].mxu1 %v9803_v21 }
 0x3d0   : > { %4821 = vmatprep.mubr.bf16.mxu1 %v9826_v19 }
 0x3d4   : > { %4983 = vmatmul.mubr.bf16.gmra.mrb[8].mxu0 %v9806_v23  ;;  %v3764_v23 = vshll.u32 %v9871_v6, 16 }
 0x3d5   : > { %4990 = vmatprep.mubr.bf16.mxu0 %v9848_v51 }
 0x3d6   : > { %v3766_v3 = vrot.slane %v3764_v23, 1 }
 0x3d7   : > { %v6646_v26 = vpop.f32.mrb[160].mxu0  ;;  %4822 = vmatmul.mubr.bf16.gmra.mrb[232].mxu1 %v9818_v39 }
 0x3d8   : > { %v6647_v30 = vpop.f32.mrb[161].mxu0  ;;  %4829 = vmatprep.mubr.bf16.mxu1 %v9841_v31  ;;  %v3767_v16 = vor.u32 %v3766_v3, %v3762_v41 }
 0x3d9   : > { %v6648_v42 = vadd.f32 %v6647_v30, %v6646_v26  ;;  %v6649_v57 = vpop.f32.mrb[162].mxu0  ;;  %v3771_v30 = vrot.slane %v3769_v1, 1 }
 0x3da   : > { %v6650_v4 = vpop.f32.mrb[163].mxu0  ;;  %v6534_v45 = vpop.f32.mrb[128].mxu1 }
 0x3db   : > { %v6651_v61 = vadd.f32 %v6650_v4, %v6649_v57  ;;  %v6535_v52 = vpop.f32.mrb[129].mxu1 }
 0x3dc   : > { %4991 = vmatmul.mubr.bf16.gmra.mrb[12].mxu0 %v9821_v20  ;;  %v6536_v62 = vadd.f32 %v6535_v52, %v6534_v45  ;;  %v6537_v22 = vpop.f32.mrb[130].mxu1 }
 0x3dd   : > { %4998 = vmatprep.mubr.bf16.mxu0 %v9863_v55  ;;  %v6538_v63 = vpop.f32.mrb[131].mxu1 }
 0x3de   : > { %v4422_v7 = vadd.f32 %v6536_v62, %v9957_v24  ;;  %v6539_v28 = vadd.f32 %v6538_v63, %v6537_v22  ;;  %v3792_v62 = vrot.slane %v3790_v15, 1 }
 0x3df   : > { %v6652_v13 = vpop.f32.mrb[164].mxu0  ;;  %4830 = vmatmul.mubr.bf16.gmra.mrb[236].mxu1 %v9833_v17 }
 0x3e0   : > { %v4425_v11 = vadd.f32 %v6539_v28, %v9957_v24  ;;  %v6653_v21 = vpop.f32.mrb[165].mxu0  ;;  %4837 = vmatprep.mubr.bf16.mxu1 %v9856_v56  ;;  %v9966_v39 = vadd.f32 %v6648_v42, %v4422_v7  ;;  %v9985_v42 = vld [vmem:[#allocation2 + $0xd4] ss:$0 sps:$4 sm:$0x11]   ;;  %v3788_v28 = vshrl.u32 %v9973_v25, 16 }
 0x3e1   : > { %v6654_v20 = vadd.f32 %v6653_v21, %v6652_v13  ;;  %v6655_v32 = vpop.f32.mrb[166].mxu0  ;;  %v3795_v13 = vshll.u32 %v9985_v42, 16 }
 0x3e2   : > { %v6656_v9 = vpop.f32.mrb[167].mxu0  ;;  %v6540_v14 = vpop.f32.mrb[132].mxu1  ;;  %v9970_v35 = vadd.f32 %v6651_v61, %v4425_v11  ;;  %v3772_v61 = vsel %vm422_vm1, %v3767_v16, %v3771_v30  ;;  %v3793_v23 = vor.u32 %v3792_v62, %v3788_v28 }
 0x3e3   : > { %v6657_v50 = vadd.f32 %v6656_v9, %v6655_v32  ;;  %v6541_v29 = vpop.f32.mrb[133].mxu1 }
 0x3e4   : > { %4999 = vmatmul.mubr.bf16.gmra.mrb[16].mxu0 %v9836_v5  ;;  %v6542_v17 = vadd.f32 %v6541_v29, %v6540_v14  ;;  %v6543_v49 = vpop.f32.mrb[134].mxu1  ;;  %v3797_v29 = vrot.slane %v3795_v13, 1 }
 0x3e5   : > { %5006 = vmatprep.mubr.bf16.mxu0 %v9877_v18  ;;  %v6544_v58 = vpop.f32.mrb[135].mxu1 }
 0x3e6   : > { %v4430_v44 = vadd.f32 %v6542_v17, %v9957_v24  ;;  %v6545_v37 = vadd.f32 %v6544_v58, %v6543_v49  ;;  %v3774_v58 = vrot.slane %v9871_v6, 1 }
 0x3e7   : > { %v6658_v40 = vpop.f32.mrb[168].mxu0  ;;  %4838 = vmatmul.mubr.bf16.gmra.mrb[240].mxu1 %v9848_v51 }
 0x3e8   : > { %v4433_v5 = vadd.f32 %v6545_v37, %v9957_v24  ;;  %v6659_v53 = vpop.f32.mrb[169].mxu0  ;;  %4845 = vmatprep.mubr.bf16.mxu1 %v9869_v46  ;;  %v9983_v54 = vadd.f32 %v6654_v20, %v4430_v44  ;;  %v3798_v37 = vsel %vm422_vm1, %v3793_v23, %v3797_v29 }
 0x3e9   : > { %v6660_v59 = vadd.f32 %v6659_v53, %v6658_v40  ;;  %v6661_v34 = vpop.f32.mrb[170].mxu0 }
 0x3ea   : > { %v6662_v60 = vpop.f32.mrb[171].mxu0  ;;  %v6546_v26 = vpop.f32.mrb[136].mxu1  ;;  %v9987_v57 = vadd.f32 %v6657_v50, %v4433_v5 }
 0x3eb   : > { %v6663_v51 = vadd.f32 %v6662_v60, %v6661_v34  ;;  %v6547_v4 = vpop.f32.mrb[137].mxu1 }
 0x3ec   : > { %5007 = vmatmul.mubr.bf16.gmra.mrb[20].mxu0 %v9851_v12  ;;  %v6548_v45 = vadd.f32 %v6547_v4, %v6546_v26  ;;  %v6549_v52 = vpop.f32.mrb[138].mxu1 }
 0x3ed   : > { %5014 = vmatprep.mubr.bf16.mxu0 %v3772_v61  ;;  %v6550_v22 = vpop.f32.mrb[139].mxu1 }
 0x3ee   : > { %v4438_v63 = vadd.f32 %v6548_v45, %v9957_v24  ;;  %v6551_v7 = vadd.f32 %v6550_v22, %v6549_v52 }
 0x3ef   : > { %v6664_v11 = vpop.f32.mrb[172].mxu0  ;;  %4846 = vmatmul.mubr.bf16.gmra.mrb[244].mxu1 %v9863_v55  ;;  %v3775_v55 = vrot.slane %v9968_v8, 1 }
 0x3f0   : > { %v4441_v21 = vadd.f32 %v6551_v7, %v9957_v24  ;;  %v6665_v12 = vpop.f32.mrb[173].mxu0  ;;  %4853 = vmatprep.mubr.bf16.mxu1 %v9882_v0  ;;  %v9997_v20 = vadd.f32 %v6660_v59, %v4438_v63 }
 0x3f1   : > { %v6666_v32 = vadd.f32 %v6665_v12, %v6664_v11  ;;  %v6667_v9 = vpop.f32.mrb[174].mxu0  ;;  %v10008_v16 = vsel %vm663_vm0, %v3774_v58, %v3775_v55 }
 0x3f2   : > { %v6668_v14 = vpop.f32.mrb[175].mxu0  ;;  %v6552_v50 = vpop.f32.mrb[140].mxu1  ;;  %v9999_v17 = vadd.f32 %v6663_v51, %v4441_v21 }
 0x3f3   : > { %v6669_v49 = vadd.f32 %v6668_v14, %v6667_v9  ;;  %v6553_v3 = vpop.f32.mrb[141].mxu1 }
 0x3f4   : > { %5015 = vmatmul.mubr.bf16.gmra.mrb[24].mxu0 %v9871_v6  ;;  %v6554_v44 = vadd.f32 %v6553_v3, %v6552_v50  ;;  %v6555_v41 = vpop.f32.mrb[142].mxu1 }
 0x3f5   : > { %5022 = vmatprep.mubr.bf16.mxu0 %v3798_v37  ;;  %v6556_v1 = vpop.f32.mrb[143].mxu1 }
 0x3f6   : > { %v4446_v40 = vadd.f32 %v6554_v44, %v9957_v24  ;;  %v6557_v5 = vadd.f32 %v6556_v1, %v6555_v41 }
 0x3f7   : > { %v6670_v53 = vpop.f32.mrb[176].mxu0  ;;  %4854 = vmatmul.mubr.bf16.gmra.mrb[248].mxu1 %v9877_v18 }
 0x3f8   : > { %v4449_v15 = vadd.f32 %v6557_v5, %v9957_v24  ;;  %v6671_v8 = vpop.f32.mrb[177].mxu0  ;;  %4861 = vmatprep.mubr.bf16.mxu1 %v10008_v16  ;;  %v10012_v6 = vadd.f32 %v6666_v32, %v4446_v40 }
 0x3f9   : > { %v6672_v59 = vadd.f32 %v6671_v8, %v6670_v53  ;;  %v6673_v34 = vpop.f32.mrb[178].mxu0 }
 0x3fa   : > { %v6674_v60 = vpop.f32.mrb[179].mxu0  ;;  %v6558_v26 = vpop.f32.mrb[144].mxu1  ;;  %v10014_v30 = vadd.f32 %v6669_v49, %v4449_v15 }
 0x3fb   : > { %v6675_v51 = vadd.f32 %v6674_v60, %v6673_v34  ;;  %v6559_v4 = vpop.f32.mrb[145].mxu1 }
 0x3fc   : > { %5023 = vmatmul.mubr.bf16.gmra.mrb[28].mxu0 %v9973_v25  ;;  %v6560_v18 = vadd.f32 %v6559_v4, %v6558_v26  ;;  %v6561_v45 = vpop.f32.mrb[146].mxu1 }
 0x3fd   : > { %v6562_v52 = vpop.f32.mrb[147].mxu1 }
 0x3fe   : > { %v4454_v62 = vadd.f32 %v6560_v18, %v9957_v24  ;;  %v6563_v22 = vadd.f32 %v6562_v52, %v6561_v45 }
 0x3ff   : > { %v6676_v63 = vpop.f32.mrb[180].mxu0  ;;  %4862 = vmatmul.mubr.bf16.gmra.mrb[252].mxu1 %v3772_v61 }
 0x400   : > { %v4457_v7 = vadd.f32 %v6563_v22, %v9957_v24  ;;  %v6677_v28 = vpop.f32.mrb[181].mxu0  ;;  %7054 = vmatprep.mubr.bf16.mxu1 %v9628_v33  ;;  %v10020_v13 = vadd.f32 %v6672_v59, %v4454_v62 }
 0x401   : > { %v6678_v11 = vadd.f32 %v6677_v28, %v6676_v63  ;;  %v6679_v21 = vpop.f32.mrb[182].mxu0 }
 0x402   : > { %v6680_v12 = vpop.f32.mrb[183].mxu0  ;;  %v6564_v23 = vpop.f32.mrb[148].mxu1  ;;  %v10022_v32 = vadd.f32 %v6675_v51, %v4457_v7 }
 0x403   : > { %v6681_v9 = vadd.f32 %v6680_v12, %v6679_v21  ;;  %v6565_v14 = vpop.f32.mrb[149].mxu1 }
 0x404   : > { %v6566_v50 = vadd.f32 %v6565_v14, %v6564_v23  ;;  %v6567_v29 = vpop.f32.mrb[150].mxu1 }
 0x405   : > { %v6568_v49 = vpop.f32.mrb[151].mxu1 }
 0x406   : > { %v4462_v61 = vadd.f32 %v6566_v50, %v9957_v24  ;;  %v6569_v3 = vadd.f32 %v6568_v49, %v6567_v29 }
 0x407   : > { %v6682_v58 = vpop.f32.mrb[184].mxu0  ;;  %7055 = vmatmul.mubr.bf16.vlgmr.msra.gmra.mrb[0].mxu1 %v9652_v48 }
 0x408   : > { %v4465_v33 = vadd.f32 %v6569_v3, %v9957_v24  ;;  %v6683_v55 = vpop.f32.mrb[185].mxu0  ;;  %7058 = vmatprep.mubr.bf16.mxu1 %v9688_v47  ;;  %v10028_v44 = vadd.f32 %v6678_v11, %v4462_v61 }
 0x409   : > { %v6684_v37 = vadd.f32 %v6683_v55, %v6682_v58  ;;  %v6685_v41 = vpop.f32.mrb[186].mxu0 }
 0x40a   : > { %v6686_v1 = vpop.f32.mrb[187].mxu0  ;;  %v6570_v40 = vpop.f32.mrb[152].mxu1  ;;  %v10030_v5 = vadd.f32 %v6681_v9, %v4465_v33 }
 0x40b   : > { %v6687_v53 = vadd.f32 %v6686_v1, %v6685_v41  ;;  %v6571_v15 = vpop.f32.mrb[153].mxu1 }
 0x40c   : > { %v6572_v8 = vadd.f32 %v6571_v15, %v6570_v40  ;;  %v6573_v59 = vpop.f32.mrb[154].mxu1 }
 0x40d   : > { %v6574_v34 = vpop.f32.mrb[155].mxu1 }
 0x40e   : > { %v4470_v48 = vadd.f32 %v6572_v8, %v9957_v24  ;;  %v6575_v60 = vadd.f32 %v6574_v34, %v6573_v59 }
 0x40f   : > { %v6688_v26 = vpop.f32.mrb[188].mxu0  ;;  %7059 = vmatmul.mubr.bf16.gmra.mrb[4].mxu1 %v9727_v2 }
 0x410   : > { %v4473_v47 = vadd.f32 %v6575_v60, %v9957_v24  ;;  %v6689_v51 = vpop.f32.mrb[189].mxu0  ;;  %7062 = vmatprep.mubr.bf16.mxu1 %v9751_v36  ;;  %v10036_v4 = vadd.f32 %v6684_v37, %v4470_v48 }
 0x411   : > { %v6690_v18 = vadd.f32 %v6689_v51, %v6688_v26  ;;  %v6691_v45 = vpop.f32.mrb[190].mxu0 }
 0x412   : > { %v6692_v52 = vpop.f32.mrb[191].mxu0  ;;  %v6576_v62 = vpop.f32.mrb[156].mxu1  ;;  %v10038_v22 = vadd.f32 %v6687_v53, %v4473_v47 }
 0x413   : > { %v6693_v63 = vadd.f32 %v6692_v52, %v6691_v45  ;;  %v6577_v7 = vpop.f32.mrb[157].mxu1 }
 0x414   : > { %v6578_v28 = vadd.f32 %v6577_v7, %v6576_v62  ;;  %v6579_v11 = vpop.f32.mrb[158].mxu1 }
 0x415   : > { %v6580_v21 = vpop.f32.mrb[159].mxu1 }
 0x416   : > { %v4478_v2 = vadd.f32 %v6578_v28, %v9957_v24  ;;  %v6581_v12 = vadd.f32 %v6580_v21, %v6579_v11 }
 0x417   : > { %v6694_v23 = vpop.f32.mrb[192].mxu0  ;;  %7063 = vmatmul.mubr.bf16.gmra.mrb[8].mxu1 %v9766_v27 }
 0x418   : > { %v4481_v36 = vadd.f32 %v6581_v12, %v9957_v24  ;;  %v6695_v9 = vpop.f32.mrb[193].mxu0  ;;  %7066 = vmatprep.mubr.bf16.mxu1 %v9781_v10  ;;  %v10044_v14 = vadd.f32 %v6690_v18, %v4478_v2 }
 0x419   : > { %v6696_v50 = vadd.f32 %v6695_v9, %v6694_v23  ;;  %v6697_v29 = vpop.f32.mrb[194].mxu0 }
 0x41a   : > { %v6698_v49 = vpop.f32.mrb[195].mxu0  ;;  %v6582_v61 = vpop.f32.mrb[160].mxu1  ;;  %v10046_v3 = vadd.f32 %v6693_v63, %v4481_v36 }
 0x41b   : > { %v6699_v58 = vadd.f32 %v6698_v49, %v6697_v29  ;;  %v6583_v33 = vpop.f32.mrb[161].mxu1 }
 0x41c   : > { %v6584_v55 = vadd.f32 %v6583_v33, %v6582_v61  ;;  %v6585_v37 = vpop.f32.mrb[162].mxu1 }
 0x41d   : > { %v6586_v41 = vpop.f32.mrb[163].mxu1 }
 0x41e   : > { %v4486_v27 = vadd.f32 %v6584_v55, %v9957_v24  ;;  %v6587_v1 = vadd.f32 %v6586_v41, %v6585_v37 }
 0x41f   : > { %v6700_v40 = vpop.f32.mrb[196].mxu0  ;;  %7067 = vmatmul.mubr.bf16.gmra.mrb[12].mxu1 %v9796_v43 }
 0x420   : > { %v4489_v10 = vadd.f32 %v6587_v1, %v9957_v24  ;;  %v6701_v53 = vpop.f32.mrb[197].mxu0  ;;  %7070 = vmatprep.mubr.bf16.mxu1 %v9811_v38  ;;  %v10052_v15 = vadd.f32 %v6696_v50, %v4486_v27 }
 0x421   : > { %v6702_v8 = vadd.f32 %v6701_v53, %v6700_v40  ;;  %v6703_v59 = vpop.f32.mrb[198].mxu0 }
 0x422   : > { %v6704_v34 = vpop.f32.mrb[199].mxu0  ;;  %v6588_v48 = vpop.f32.mrb[164].mxu1  ;;  %v10054_v60 = vadd.f32 %v6699_v58, %v4489_v10 }
 0x423   : > { %v6705_v26 = vadd.f32 %v6704_v34, %v6703_v59  ;;  %v6589_v47 = vpop.f32.mrb[165].mxu1 }
 0x424   : > { %v6590_v51 = vadd.f32 %v6589_v47, %v6588_v48  ;;  %v6591_v18 = vpop.f32.mrb[166].mxu1 }
 0x425   : > { %v6592_v45 = vpop.f32.mrb[167].mxu1 }
 0x426   : > { %v4494_v43 = vadd.f32 %v6590_v51, %v9957_v24  ;;  %v6593_v52 = vadd.f32 %v6592_v45, %v6591_v18  ;;  %v3801_v45 = vrot.slane %v9985_v42, 1 }
 0x427   : > { %v6706_v62 = vpop.f32.mrb[200].mxu0  ;;  %7071 = vmatmul.mubr.bf16.gmra.mrb[16].mxu1 %v9826_v19 }
 0x428   : > { %v4497_v38 = vadd.f32 %v6593_v52, %v9957_v24  ;;  %v6707_v63 = vpop.f32.mrb[201].mxu0  ;;  %7074 = vmatprep.mubr.bf16.mxu1 %v9841_v31  ;;  %v10060_v7 = vadd.f32 %v6702_v8, %v4494_v43 }
 0x429   : > { %v6708_v28 = vadd.f32 %v6707_v63, %v6706_v62  ;;  %v6709_v11 = vpop.f32.mrb[202].mxu0  ;;  %v3800_v62 = vrot.slane %v9973_v25, 1 }
 0x42a   : > { %v6710_v21 = vpop.f32.mrb[203].mxu0  ;;  %v6594_v2 = vpop.f32.mrb[168].mxu1  ;;  %v10062_v12 = vadd.f32 %v6705_v26, %v4497_v38 }
 0x42b   : > { %v6711_v23 = vadd.f32 %v6710_v21, %v6709_v11  ;;  %v6595_v36 = vpop.f32.mrb[169].mxu1 }
 0x42c   : > { %v6596_v9 = vadd.f32 %v6595_v36, %v6594_v2  ;;  %v6597_v50 = vpop.f32.mrb[170].mxu1 }
 0x42d   : > { %v6598_v29 = vpop.f32.mrb[171].mxu1 }
 0x42e   : > { %v4502_v19 = vadd.f32 %v6596_v9, %v9957_v24  ;;  %v6599_v49 = vadd.f32 %v6598_v29, %v6597_v50 }
 0x42f   : > { %v6712_v61 = vpop.f32.mrb[204].mxu0  ;;  %7075 = vmatmul.mubr.bf16.gmra.mrb[20].mxu1 %v9856_v56 }
 0x430   : > { %v4505_v31 = vadd.f32 %v6599_v49, %v9957_v24  ;;  %v6713_v58 = vpop.f32.mrb[205].mxu0  ;;  %7078 = vmatprep.mubr.bf16.mxu1 %v9869_v46  ;;  %v10068_v33 = vadd.f32 %v6708_v28, %v4502_v19 }
 0x431   : > { %v6714_v55 = vadd.f32 %v6713_v58, %v6712_v61  ;;  %v6715_v37 = vpop.f32.mrb[206].mxu0 }
 0x432   : > { %v6716_v41 = vpop.f32.mrb[207].mxu0  ;;  %v6600_v27 = vpop.f32.mrb[172].mxu1  ;;  %v10070_v1 = vadd.f32 %v6711_v23, %v4505_v31  ;;  %v3802_v23 = vsel %vm663_vm0, %v3800_v62, %v3801_v45 }
 0x433   : > { %v6717_v40 = vadd.f32 %v6716_v41, %v6715_v37  ;;  %v6601_v10 = vpop.f32.mrb[173].mxu1 }
 0x434   : > { %v6602_v53 = vadd.f32 %v6601_v10, %v6600_v27  ;;  %v6603_v8 = vpop.f32.mrb[174].mxu1 }
 0x435   : > { %v6604_v59 = vpop.f32.mrb[175].mxu1 }
 0x436   : > { %v4510_v56 = vadd.f32 %v6602_v53, %v9957_v24  ;;  %v6605_v34 = vadd.f32 %v6604_v59, %v6603_v8 }
 0x437   : > { %v6718_v48 = vpop.f32.mrb[208].mxu0  ;;  %7079 = vmatmul.mubr.bf16.gmra.mrb[24].mxu1 %v9882_v0 }
 0x438   : > { %v4513_v46 = vadd.f32 %v6605_v34, %v9957_v24  ;;  %v6719_v26 = vpop.f32.mrb[209].mxu0  ;;  %7082 = vmatprep.mubr.bf16.mxu1 %v10008_v16  ;;  %v10076_v47 = vadd.f32 %v6714_v55, %v4510_v56 }
 0x439   : > { %v6720_v51 = vadd.f32 %v6719_v26, %v6718_v48  ;;  %v6721_v18 = vpop.f32.mrb[210].mxu0 }
 0x43a   : > { %v6722_v43 = vpop.f32.mrb[211].mxu0  ;;  %v6606_v52 = vpop.f32.mrb[176].mxu1  ;;  %v10080_v38 = vadd.f32 %v6717_v40, %v4513_v46 }
 0x43b   : > { %v6723_v63 = vadd.f32 %v6722_v43, %v6721_v18  ;;  %v6607_v28 = vpop.f32.mrb[177].mxu1 }
 0x43c   : > { %v6608_v0 = vadd.f32 %v6607_v28, %v6606_v52  ;;  %v6609_v11 = vpop.f32.mrb[178].mxu1 }
 0x43d   : > { %v6610_v21 = vpop.f32.mrb[179].mxu1 }
 0x43e   : > { %v4518_v2 = vadd.f32 %v6608_v0, %v9957_v24  ;;  %v6611_v16 = vadd.f32 %v6610_v21, %v6609_v11 }
 0x43f   : > { %v6724_v36 = vpop.f32.mrb[212].mxu0  ;;  %7083 = vmatmul.mubr.bf16.gmra.mrb[28].mxu1 %v3802_v23 }
 0x440   : > { %v4521_v42 = vadd.f32 %v6611_v16, %v9957_v24  ;;  %v6725_v9 = vpop.f32.mrb[213].mxu0  ;;  %v10085_v50 = vadd.f32 %v6720_v51, %v4518_v2 }
 0x441   : > { %v6726_v25 = vadd.f32 %v6725_v9, %v6724_v36  ;;  %v6727_v29 = vpop.f32.mrb[214].mxu0 }
 0x442   : > { %v6728_v19 = vpop.f32.mrb[215].mxu0  ;;  %v6612_v49 = vpop.f32.mrb[180].mxu1  ;;  %v10087_v61 = vadd.f32 %v6723_v63, %v4521_v42 }
 0x443   : > { %v6729_v31 = vadd.f32 %v6728_v19, %v6727_v29  ;;  %v6613_v58 = vpop.f32.mrb[181].mxu1 }
 0x444   : > { %v6614_v55 = vadd.f32 %v6613_v58, %v6612_v49  ;;  %v6615_v37 = vpop.f32.mrb[182].mxu1 }
 0x445   : > { %v6616_v41 = vpop.f32.mrb[183].mxu1 }
 0x446   : > { %v4526_v27 = vadd.f32 %v6614_v55, %v9957_v24  ;;  %v6617_v40 = vadd.f32 %v6616_v41, %v6615_v37 }
 0x447   : > { %v6730_v10 = vpop.f32.mrb[216].mxu0 }
 0x448   : > { %v4529_v53 = vadd.f32 %v6617_v40, %v9957_v24  ;;  %v6731_v8 = vpop.f32.mrb[217].mxu0  ;;  %v10091_v59 = vadd.f32 %v6726_v25, %v4526_v27 }
 0x449   : > { %v6732_v56 = vadd.f32 %v6731_v8, %v6730_v10  ;;  %v6733_v34 = vpop.f32.mrb[218].mxu0 }
 0x44a   : > { %v6734_v48 = vpop.f32.mrb[219].mxu0  ;;  %v6618_v46 = vpop.f32.mrb[184].mxu1  ;;  %v10093_v26 = vadd.f32 %v6729_v31, %v4529_v53  ;;  %v7312_v53 = vld [vmem:[%s7617_s23 + $0x18] sm:$0xff] }
 0x44b   : > { %v6735_v51 = vadd.f32 %v6734_v48, %v6733_v34  ;;  %v6619_v18 = vpop.f32.mrb[185].mxu1  ;;  %v5496_v8 = vrot.slane %v7312_v53, 1 }
 0x44c   : > { %v6620_v45 = vadd.f32 %v6619_v18, %v6618_v46  ;;  %v6621_v43 = vpop.f32.mrb[186].mxu1 }
 0x44d   : > { %v6622_v52 = vpop.f32.mrb[187].mxu1 }
 0x44e   : > { %v4534_v62 = vadd.f32 %v6620_v45, %v9957_v24  ;;  %v6623_v63 = vadd.f32 %v6622_v52, %v6621_v43 }
 0x44f   : > { %v6736_v28 = vpop.f32.mrb[220].mxu0 }
 0x450   : > { %v4537_v0 = vadd.f32 %v6623_v63, %v9957_v24  ;;  %v6737_v11 = vpop.f32.mrb[221].mxu0  ;;  %v10097_v21 = vadd.f32 %v6732_v56, %v4534_v62  ;;  %v7313_v56 = vld [vmem:[%s7617_s23 + $0x20] sm:$0xff] }
 0x451   : > { %v6738_v2 = vadd.f32 %v6737_v11, %v6736_v28  ;;  %v6739_v16 = vpop.f32.mrb[222].mxu0  ;;  %v5497_v34 = vrot.slane %v7313_v56, 1  ;;  %v7314_v11 = vld [vmem:[%s7617_s23 + $0x28] sm:$0x3] }
 0x452   : > { %v6740_v23 = vpop.f32.mrb[223].mxu0  ;;  %v6624_v36 = vpop.f32.mrb[188].mxu1  ;;  %v10099_v42 = vadd.f32 %v6735_v51, %v4537_v0 }
 0x453   : > { %v6741_v9 = vadd.f32 %v6740_v23, %v6739_v16  ;;  %v6625_v25 = vpop.f32.mrb[189].mxu1  ;;  %v10111_v28 = vsel %vm663_vm0, %v5496_v8, %v5497_v34 }
 0x454   : > { %v6626_v29 = vadd.f32 %v6625_v25, %v6624_v36  ;;  %v6627_v19 = vpop.f32.mrb[190].mxu1  ;;  %10989 = vst [vmem:[#allocation6_spill] sm:$0xff] %v10111_v28 }
 0x455   : > { %v6628_v49 = vpop.f32.mrb[191].mxu1 }
 0x456   : > { %v4542_v31 = vadd.f32 %v6626_v29, %v9957_v24  ;;  %v6629_v58 = vadd.f32 %v6628_v49, %v6627_v19 }
 0x457   : > { %v6870_v55 = vpop.f32.mrb[224].mxu0 }
 0x458   : > { %v4545_v37 = vadd.f32 %v6629_v58, %v9957_v24  ;;  %v6871_v41 = vpop.f32.mrb[225].mxu0  ;;  %v10103_v27 = vadd.f32 %v6738_v2, %v4542_v31  ;;  %v5499_v2 = vrot.slane %v7314_v11, 1 }
 0x459   : > { %v6872_v40 = vadd.f32 %v6871_v41, %v6870_v55  ;;  %v6873_v10 = vpop.f32.mrb[226].mxu0 }
 0x45a   : > { %v6874_v48 = vpop.f32.mrb[227].mxu0  ;;  %v6758_v46 = vpop.f32.mrb[192].mxu1  ;;  %v10107_v51 = vadd.f32 %v6741_v9, %v4545_v37  ;;  %v10120_v37 = vsel %vm663_vm0, %v5497_v34, %v5499_v2 }
 0x45b   : > { %v6875_v18 = vadd.f32 %v6874_v48, %v6873_v10  ;;  %v6759_v45 = vpop.f32.mrb[193].mxu1  ;;  %10990 = vst [vmem:[#allocation7_spill] sm:$0xff] %v10120_v37  ;;  %v7337_v37 = vld [vmem:[%s7617_s23 + $0x50] sm:$0xff] }
 0x45c   : > { %v6760_v43 = vadd.f32 %v6759_v45, %v6758_v46  ;;  %v6761_v52 = vpop.f32.mrb[194].mxu1  ;;  %v5507_v28 = vrot.slane %v7337_v37, 1 }
 0x45d   : > { %v6762_v62 = vpop.f32.mrb[195].mxu1 }
 0x45e   : > { %v4744_v24 = vadd.f32 %v6760_v43, %v9966_v39  ;;  %v6763_v63 = vadd.f32 %v6762_v62, %v6761_v52 }
 0x45f   : > { %v6876_v0 = vpop.f32.mrb[228].mxu0 }
 0x460   : > { %v4747_v16 = vadd.f32 %v6763_v63, %v9970_v35  ;;  %v6877_v23 = vpop.f32.mrb[229].mxu0  ;;  %v10115_v36 = vadd.f32 %v6872_v40, %v4744_v24 }
 0x461   : > { %v6878_v9 = vadd.f32 %v6877_v23, %v6876_v0  ;;  %v6879_v25 = vpop.f32.mrb[230].mxu0 }
 0x462   : > { %v6880_v29 = vpop.f32.mrb[231].mxu0  ;;  %v6764_v19 = vpop.f32.mrb[196].mxu1  ;;  %v10117_v49 = vadd.f32 %v6875_v18, %v4747_v16 }
 0x463   : > { %v6881_v31 = vadd.f32 %v6880_v29, %v6879_v25  ;;  %v6765_v39 = vpop.f32.mrb[197].mxu1 }
 0x464   : > { %v6766_v58 = vadd.f32 %v6765_v39, %v6764_v19  ;;  %v6767_v55 = vpop.f32.mrb[198].mxu1 }
 0x465   : > { %v6768_v41 = vpop.f32.mrb[199].mxu1 }
 0x466   : > { %v4752_v10 = vadd.f32 %v6766_v58, %v9983_v54  ;;  %v6769_v35 = vadd.f32 %v6768_v41, %v6767_v55 }
 0x467   : > { %v6882_v53 = vpop.f32.mrb[232].mxu0 }
 0x468   : > { %v4755_v40 = vadd.f32 %v6769_v35, %v9987_v57  ;;  %v6883_v8 = vpop.f32.mrb[233].mxu0  ;;  %v10124_v56 = vadd.f32 %v6878_v9, %v4752_v10 }
 0x469   : > { %v6884_v48 = vadd.f32 %v6883_v8, %v6882_v53  ;;  %v6885_v46 = vpop.f32.mrb[234].mxu0 }
 0x46a   : > { %v6886_v18 = vpop.f32.mrb[235].mxu0  ;;  %v6770_v45 = vpop.f32.mrb[200].mxu1  ;;  %v10126_v43 = vadd.f32 %v6881_v31, %v4755_v40 }
 0x46b   : > { %v6887_v52 = vadd.f32 %v6886_v18, %v6885_v46  ;;  %v6771_v62 = vpop.f32.mrb[201].mxu1 }
 0x46c   : > { %v6772_v34 = vadd.f32 %v6771_v62, %v6770_v45  ;;  %v6773_v24 = vpop.f32.mrb[202].mxu1 }
 0x46d   : > { %v6774_v63 = vpop.f32.mrb[203].mxu1 }
 0x46e   : > { %v4760_v54 = vadd.f32 %v6772_v34, %v9997_v20  ;;  %v6775_v0 = vadd.f32 %v6774_v63, %v6773_v24 }
 0x46f   : > { %v6888_v11 = vpop.f32.mrb[236].mxu0 }
 0x470   : > { %v4763_v57 = vadd.f32 %v6775_v0, %v9999_v17  ;;  %v6889_v2 = vpop.f32.mrb[237].mxu0  ;;  %v10130_v16 = vadd.f32 %v6884_v48, %v4760_v54 }
 0x471   : > { %v6890_v23 = vadd.f32 %v6889_v2, %v6888_v11  ;;  %v6891_v9 = vpop.f32.mrb[238].mxu0 }
 0x472   : > { %v6892_v25 = vpop.f32.mrb[239].mxu0  ;;  %v6776_v29 = vpop.f32.mrb[204].mxu1  ;;  %v10132_v19 = vadd.f32 %v6887_v52, %v4763_v57 }
 0x473   : > { %v6893_v31 = vadd.f32 %v6892_v25, %v6891_v9  ;;  %v6777_v39 = vpop.f32.mrb[205].mxu1 }
 0x474   : > { %v6778_v58 = vadd.f32 %v6777_v39, %v6776_v29  ;;  %v6779_v55 = vpop.f32.mrb[206].mxu1 }
 0x475   : > { %v6780_v41 = vpop.f32.mrb[207].mxu1 }
 0x476   : > { %v4768_v20 = vadd.f32 %v6778_v58, %v10012_v6  ;;  %v6781_v10 = vadd.f32 %v6780_v41, %v6779_v55 }
 0x477   : > { %v6894_v35 = vpop.f32.mrb[240].mxu0 }
 0x478   : > { %v4771_v17 = vadd.f32 %v6781_v10, %v10014_v30  ;;  %v6895_v53 = vpop.f32.mrb[241].mxu0  ;;  %v10136_v40 = vadd.f32 %v6890_v23, %v4768_v20 }
 0x479   : > { %v6896_v8 = vadd.f32 %v6895_v53, %v6894_v35  ;;  %v6897_v48 = vpop.f32.mrb[242].mxu0 }
 0x47a   : > { %v6898_v46 = vpop.f32.mrb[243].mxu0  ;;  %v6782_v18 = vpop.f32.mrb[208].mxu1  ;;  %v10138_v45 = vadd.f32 %v6893_v31, %v4771_v17 }
 0x47b   : > { %v6899_v52 = vadd.f32 %v6898_v46, %v6897_v48  ;;  %v6783_v62 = vpop.f32.mrb[209].mxu1 }
 0x47c   : > { %v6784_v34 = vadd.f32 %v6783_v62, %v6782_v18  ;;  %v6785_v24 = vpop.f32.mrb[210].mxu1 }
 0x47d   : > { %v6786_v63 = vpop.f32.mrb[211].mxu1 }
 0x47e   : > { %v4776_v6 = vadd.f32 %v6784_v34, %v10020_v13  ;;  %v6787_v54 = vadd.f32 %v6786_v63, %v6785_v24 }
 0x47f   : > { %v6900_v0 = vpop.f32.mrb[244].mxu0 }
 0x480   : > { %v4779_v30 = vadd.f32 %v6787_v54, %v10022_v32  ;;  %v6901_v11 = vpop.f32.mrb[245].mxu0  ;;  %v10142_v57 = vadd.f32 %v6896_v8, %v4776_v6 }
 0x481   : > { %v6902_v2 = vadd.f32 %v6901_v11, %v6900_v0  ;;  %v6903_v23 = vpop.f32.mrb[246].mxu0  ;;  %v7315_v11 = vld [vmem:[%s7617_s23 + $0x180] sm:$0xff] }
 0x482   : > { %v6904_v9 = vpop.f32.mrb[247].mxu0  ;;  %v6788_v25 = vpop.f32.mrb[212].mxu1  ;;  %v10144_v29 = vadd.f32 %v6899_v52, %v4779_v30 }
 0x483   : > { %v6905_v31 = vadd.f32 %v6904_v9, %v6903_v23  ;;  %v6789_v39 = vpop.f32.mrb[213].mxu1  ;;  %v7316_v23 = vld [vmem:[%s7617_s23 + $0x188] sm:$0xff] }
 0x484   : > { %v6790_v58 = vadd.f32 %v6789_v39, %v6788_v25  ;;  %v6791_v55 = vpop.f32.mrb[214].mxu1  ;;  %v5572_v9 = vrot.slane %v7316_v23, 1 }
 0x485   : > { %v6792_v41 = vpop.f32.mrb[215].mxu1 }
 0x486   : > { %v4784_v13 = vadd.f32 %v6790_v58, %v10028_v44  ;;  %v6793_v20 = vadd.f32 %v6792_v41, %v6791_v55 }
 0x487   : > { %v6906_v10 = vpop.f32.mrb[248].mxu0 }
 0x488   : > { %v4787_v32 = vadd.f32 %v6793_v20, %v10030_v5  ;;  %v6907_v35 = vpop.f32.mrb[249].mxu0  ;;  %v10148_v17 = vadd.f32 %v6902_v2, %v4784_v13  ;;  %v5571_v2 = vrot.slane %v7315_v11, 1 }
 0x489   : > { %v6908_v53 = vadd.f32 %v6907_v35, %v6906_v10  ;;  %v6909_v8 = vpop.f32.mrb[250].mxu0  ;;  %v7317_v10 = vld [vmem:[%s7617_s23 + $0x190] sm:$0x3] }
 0x48a   : > { %v6910_v48 = vpop.f32.mrb[251].mxu0  ;;  %v6794_v46 = vpop.f32.mrb[216].mxu1  ;;  %v10150_v18 = vadd.f32 %v6905_v31, %v4787_v32  ;;  %v10162_v35 = vsel %vm663_vm0, %v5571_v2, %v5572_v9 }
 0x48b   : > { %v6911_v52 = vadd.f32 %v6910_v48, %v6909_v8  ;;  %v6795_v62 = vpop.f32.mrb[217].mxu1  ;;  %10991 = vst [vmem:[#allocation8_spill] sm:$0xff] %v10162_v35 }
 0x48c   : > { %v6796_v34 = vadd.f32 %v6795_v62, %v6794_v46  ;;  %v6797_v24 = vpop.f32.mrb[218].mxu1 }
 0x48d   : > { %v6798_v44 = vpop.f32.mrb[219].mxu1 }
 0x48e   : > { %v4792_v63 = vadd.f32 %v6796_v34, %v10036_v4  ;;  %v6799_v6 = vadd.f32 %v6798_v44, %v6797_v24 }
 0x48f   : > { %v6912_v5 = vpop.f32.mrb[252].mxu0 }
 0x490   : > { %v4795_v54 = vadd.f32 %v6799_v6, %v10038_v22  ;;  %v6913_v0 = vpop.f32.mrb[253].mxu0  ;;  %v10154_v30 = vadd.f32 %v6908_v53, %v4792_v63  ;;  %v5574_v22 = vrot.slane %v7317_v10, 1 }
 0x491   : > { %v6914_v25 = vadd.f32 %v6913_v0, %v6912_v5  ;;  %v6915_v31 = vpop.f32.mrb[254].mxu0 }
 0x492   : > { %v6916_v39 = vpop.f32.mrb[255].mxu0  ;;  %v6800_v58 = vpop.f32.mrb[220].mxu1  ;;  %v10158_v55 = vadd.f32 %v6911_v52, %v4795_v54  ;;  %v10169_v44 = vsel %vm663_vm0, %v5572_v9, %v5574_v22 }
 0x493   : > { %v6917_v41 = vadd.f32 %v6916_v39, %v6915_v31  ;;  %v6801_v4 = vpop.f32.mrb[221].mxu1  ;;  %10992 = vst [vmem:[#allocation9_spill] sm:$0xff] %v10169_v44 }
 0x494   : > { %v6802_v13 = vadd.f32 %v6801_v4, %v6800_v58  ;;  %v6803_v20 = vpop.f32.mrb[222].mxu1 }
 0x495   : > { %v6804_v32 = vpop.f32.mrb[223].mxu1 }
 0x496   : > { %v4800_v53 = vadd.f32 %v6802_v13, %v10044_v14  ;;  %v6805_v8 = vadd.f32 %v6804_v32, %v6803_v20 }
 0x497   : > { %v6918_v48 = vpop.f32.mrb[0].mxu0 }
 0x498   : > { %v4803_v46 = vadd.f32 %v6805_v8, %v10046_v3  ;;  %v6919_v62 = vpop.f32.mrb[1].mxu0  ;;  %v10166_v34 = vadd.f32 %v6914_v25, %v4800_v53 }
 0x499   : > { %v6920_v52 = vadd.f32 %v6919_v62, %v6918_v48  ;;  %v6921_v24 = vpop.f32.mrb[2].mxu0 }
 0x49a   : > { %v6922_v63 = vpop.f32.mrb[3].mxu0  ;;  %v6806_v6 = vpop.f32.mrb[224].mxu1  ;;  %v10171_v5 = vadd.f32 %v6917_v41, %v4803_v46 }
 0x49b   : > { %v6923_v54 = vadd.f32 %v6922_v63, %v6921_v24  ;;  %v6807_v0 = vpop.f32.mrb[225].mxu1 }
 0x49c   : > { %v6808_v11 = vadd.f32 %v6807_v0, %v6806_v6  ;;  %v6809_v14 = vpop.f32.mrb[226].mxu1 }
 0x49d   : > { %v6810_v2 = vpop.f32.mrb[227].mxu1 }
 0x49e   : > { %v4808_v23 = vadd.f32 %v6808_v11, %v10052_v15  ;;  %v6811_v3 = vadd.f32 %v6810_v2, %v6809_v14 }
 0x49f   : > { %v6924_v31 = vpop.f32.mrb[4].mxu0 }
 0x4a0   : > { %v4811_v25 = vadd.f32 %v6811_v3, %v10054_v60  ;;  %v6925_v39 = vpop.f32.mrb[5].mxu0  ;;  %v10175_v58 = vadd.f32 %v6920_v52, %v4808_v23 }
 0x4a1   : > { %v6926_v9 = vadd.f32 %v6925_v39, %v6924_v31  ;;  %v6927_v4 = vpop.f32.mrb[6].mxu0 }
 0x4a2   : > { %v6928_v13 = vpop.f32.mrb[7].mxu0  ;;  %v6812_v20 = vpop.f32.mrb[228].mxu1  ;;  %v10177_v41 = vadd.f32 %v6923_v54, %v4811_v25 }
 0x4a3   : > { %v6929_v10 = vadd.f32 %v6928_v13, %v6927_v4  ;;  %v6813_v22 = vpop.f32.mrb[229].mxu1 }
 0x4a4   : > { %v6814_v32 = vadd.f32 %v6813_v22, %v6812_v20  ;;  %v6815_v53 = vpop.f32.mrb[230].mxu1 }
 0x4a5   : > { %v6816_v8 = vpop.f32.mrb[231].mxu1 }
 0x4a6   : > { %v4816_v15 = vadd.f32 %v6814_v32, %v10060_v7  ;;  %v6817_v48 = vadd.f32 %v6816_v8, %v6815_v53 }
 0x4a7   : > { %v6930_v46 = vpop.f32.mrb[8].mxu0 }
 0x4a8   : > { %v4819_v60 = vadd.f32 %v6817_v48, %v10062_v12  ;;  %v6931_v62 = vpop.f32.mrb[9].mxu0  ;;  %v10181_v52 = vadd.f32 %v6926_v9, %v4816_v15 }
 0x4a9   : > { %v6932_v24 = vadd.f32 %v6931_v62, %v6930_v46  ;;  %v6933_v63 = vpop.f32.mrb[10].mxu0 }
 0x4aa   : > { %v6934_v6 = vpop.f32.mrb[11].mxu0  ;;  %v6818_v0 = vpop.f32.mrb[232].mxu1  ;;  %v10183_v54 = vadd.f32 %v6929_v10, %v4819_v60 }
 0x4ab   : > { %v6935_v11 = vadd.f32 %v6934_v6, %v6933_v63  ;;  %v6819_v14 = vpop.f32.mrb[233].mxu1 }
 0x4ac   : > { %v6820_v2 = vadd.f32 %v6819_v14, %v6818_v0  ;;  %v6821_v23 = vpop.f32.mrb[234].mxu1 }
 0x4ad   : > { %v6822_v3 = vpop.f32.mrb[235].mxu1 }
 0x4ae   : > { %v4824_v7 = vadd.f32 %v6820_v2, %v10068_v33  ;;  %v6823_v31 = vadd.f32 %v6822_v3, %v6821_v23 }
 0x4af   : > { %v6936_v25 = vpop.f32.mrb[12].mxu0 }
 0x4b0   : > { %v4827_v12 = vadd.f32 %v6823_v31, %v10070_v1  ;;  %v6937_v39 = vpop.f32.mrb[13].mxu0  ;;  %v10187_v9 = vadd.f32 %v6932_v24, %v4824_v7 }
 0x4b1   : > { %v6938_v4 = vadd.f32 %v6937_v39, %v6936_v25  ;;  %v6939_v13 = vpop.f32.mrb[14].mxu0 }
 0x4b2   : > { %v6940_v20 = vpop.f32.mrb[15].mxu0  ;;  %v6824_v22 = vpop.f32.mrb[236].mxu1  ;;  %v10189_v10 = vadd.f32 %v6935_v11, %v4827_v12 }
 0x4b3   : > { %v6941_v32 = vadd.f32 %v6940_v20, %v6939_v13  ;;  %v6825_v53 = vpop.f32.mrb[237].mxu1 }
 0x4b4   : > { %v6826_v8 = vadd.f32 %v6825_v53, %v6824_v22  ;;  %v6827_v15 = vpop.f32.mrb[238].mxu1 }
 0x4b5   : > { %v6828_v48 = vpop.f32.mrb[239].mxu1 }
 0x4b6   : > { %v4832_v33 = vadd.f32 %v6826_v8, %v10076_v47  ;;  %v6829_v46 = vadd.f32 %v6828_v48, %v6827_v15 }
 0x4b7   : > { %v6942_v60 = vpop.f32.mrb[16].mxu0 }
 0x4b8   : > { %v4835_v1 = vadd.f32 %v6829_v46, %v10080_v38  ;;  %v6943_v62 = vpop.f32.mrb[17].mxu0  ;;  %v10193_v24 = vadd.f32 %v6938_v4, %v4832_v33 }
 0x4b9   : > { %v6944_v63 = vadd.f32 %v6943_v62, %v6942_v60  ;;  %v6945_v6 = vpop.f32.mrb[18].mxu0 }
 0x4ba   : > { %v6946_v0 = vpop.f32.mrb[19].mxu0  ;;  %v6830_v14 = vpop.f32.mrb[240].mxu1  ;;  %v10195_v11 = vadd.f32 %v6941_v32, %v4835_v1 }
 0x4bb   : > { %v6947_v2 = vadd.f32 %v6946_v0, %v6945_v6  ;;  %v6831_v23 = vpop.f32.mrb[241].mxu1 }
 0x4bc   : > { %v6832_v3 = vadd.f32 %v6831_v23, %v6830_v14  ;;  %v6833_v7 = vpop.f32.mrb[242].mxu1 }
 0x4bd   : > { %v6834_v31 = vpop.f32.mrb[243].mxu1 }
 0x4be   : > { %v4840_v47 = vadd.f32 %v6832_v3, %v10085_v50  ;;  %v6835_v25 = vadd.f32 %v6834_v31, %v6833_v7 }
 0x4bf   : > { %v6948_v12 = vpop.f32.mrb[20].mxu0 }
 0x4c0   : > { %v4843_v38 = vadd.f32 %v6835_v25, %v10087_v61  ;;  %v6949_v39 = vpop.f32.mrb[21].mxu0  ;;  %v10199_v4 = vadd.f32 %v6944_v63, %v4840_v47 }
 0x4c1   : > { %v6950_v13 = vadd.f32 %v6949_v39, %v6948_v12  ;;  %v6951_v20 = vpop.f32.mrb[22].mxu0 }
 0x4c2   : > { %v6952_v22 = vpop.f32.mrb[23].mxu0  ;;  %v6836_v53 = vpop.f32.mrb[244].mxu1  ;;  %v10201_v32 = vadd.f32 %v6947_v2, %v4843_v38 }
 0x4c3   : > { %v6953_v8 = vadd.f32 %v6952_v22, %v6951_v20  ;;  %v6837_v15 = vpop.f32.mrb[245].mxu1 }
 0x4c4   : > { %v6838_v48 = vadd.f32 %v6837_v15, %v6836_v53  ;;  %v6839_v33 = vpop.f32.mrb[246].mxu1 }
 0x4c5   : > { %v6840_v46 = vpop.f32.mrb[247].mxu1 }
 0x4c6   : > { %v4848_v50 = vadd.f32 %v6838_v48, %v10091_v59  ;;  %v6841_v60 = vadd.f32 %v6840_v46, %v6839_v33 }
 0x4c7   : > { %v6954_v1 = vpop.f32.mrb[24].mxu0 }
 0x4c8   : > { %v4851_v61 = vadd.f32 %v6841_v60, %v10093_v26  ;;  %v6955_v62 = vpop.f32.mrb[25].mxu0  ;;  %v10205_v63 = vadd.f32 %v6950_v13, %v4848_v50 }
 0x4c9   : > { %v6956_v6 = vadd.f32 %v6955_v62, %v6954_v1  ;;  %v6957_v0 = vpop.f32.mrb[26].mxu0 }
 0x4ca   : > { %v6958_v14 = vpop.f32.mrb[27].mxu0  ;;  %v6842_v23 = vpop.f32.mrb[248].mxu1  ;;  %v10207_v2 = vadd.f32 %v6953_v8, %v4851_v61 }
 0x4cb   : > { %v6959_v3 = vadd.f32 %v6958_v14, %v6957_v0  ;;  %v6843_v7 = vpop.f32.mrb[249].mxu1 }
 0x4cc   : > { %v6844_v31 = vadd.f32 %v6843_v7, %v6842_v23  ;;  %v6845_v47 = vpop.f32.mrb[250].mxu1 }
 0x4cd   : > { %v6846_v25 = vpop.f32.mrb[251].mxu1 }
 0x4ce   : > { %v4856_v59 = vadd.f32 %v6844_v31, %v10097_v21  ;;  %v6847_v12 = vadd.f32 %v6846_v25, %v6845_v47 }
 0x4cf   : > { %v6960_v38 = vpop.f32.mrb[28].mxu0 }
 0x4d0   : > { %v4859_v26 = vadd.f32 %v6847_v12, %v10099_v42  ;;  %v6961_v39 = vpop.f32.mrb[29].mxu0  ;;  %v10211_v13 = vadd.f32 %v6956_v6, %v4856_v59 }
 0x4d1   : > { %v6962_v20 = vadd.f32 %v6961_v39, %v6960_v38  ;;  %v6963_v22 = vpop.f32.mrb[30].mxu0 }
 0x4d2   : > { %v6964_v53 = vpop.f32.mrb[31].mxu0  ;;  %v6848_v15 = vpop.f32.mrb[252].mxu1  ;;  %v10213_v8 = vadd.f32 %v6959_v3, %v4859_v26 }
 0x4d3   : > { %v6965_v48 = vadd.f32 %v6964_v53, %v6963_v22  ;;  %v6849_v33 = vpop.f32.mrb[253].mxu1 }
 0x4d4   : > { %v6850_v46 = vadd.f32 %v6849_v33, %v6848_v15  ;;  %v6851_v50 = vpop.f32.mrb[254].mxu1 }
 0x4d5   : > { %v6852_v60 = vpop.f32.mrb[255].mxu1 }
 0x4d6   : > { %v4864_v21 = vadd.f32 %v6850_v46, %v10103_v27  ;;  %v6853_v1 = vadd.f32 %v6852_v60, %v6851_v50 }
 0x4d8   : > { %v4867_v61 = vadd.f32 %v6853_v1, %v10107_v51  ;;  %v10217_v42 = vadd.f32 %v6962_v20, %v4864_v21 }
 0x4da   : > { %v7056_v62 = vpop.f32.mrb[0].mxu1  ;;  %v10219_v6 = vadd.f32 %v6965_v48, %v4867_v61 }
 0x4db   : > { %v10222_v0 = vadd.f32 %v7056_v62, %v10124_v56  ;;  %v5065_v14 = vpop.f32.mrb[1].mxu1 }
 0x4dc   : > { %v10225_v23 = vadd.f32 %v5065_v14, %v10115_v36  ;;  %v7057_v3 = vpop.f32.mrb[2].mxu1 }
 0x4dd   : > { %10993 = vst [vmem:[#allocation10_spill] sm:$0xff] %v10222_v0  ;;  %v10228_v7 = vadd.f32 %v7057_v3, %v10126_v43  ;;  %v5068_v27 = vpop.f32.mrb[3].mxu1  ;;  %v5234_v36 = vmul.f32 %v10222_v0, %v10222_v0 }
 0x4de   : > { %v10231_v31 = vadd.f32 %v5068_v27, %v10117_v49  ;;  %v5232_v51 = vmul.f32 %v10225_v23, %v10225_v23 }
 0x4df   : > { %10994 = vst [vmem:[#allocation11_spill] sm:$0xff] %v10228_v7  ;;  %v5235_v38 = vmul.f32 %v10228_v7, %v10228_v7 }
 0x4e0   : > { %v5194_v47 = vadd.f32 %v10231_v31, %v10225_v23  ;;  %v5233_v56 = vmul.f32 %v10231_v31, %v10231_v31 }
 0x4e2   : > { %v5195_v25 = vadd.f32 %v5194_v47, %v10222_v0  ;;  %v5264_v43 = vadd.f32 %v5233_v56, %v5232_v51  ;;  %v7060_v59 = vpop.f32.mrb[4].mxu1 }
 0x4e3   : > { %v10243_v12 = vadd.f32 %v7060_v59, %v10136_v40  ;;  %v5081_v49 = vpop.f32.mrb[5].mxu1 }
 0x4e4   : > { %v5265_v26 = vadd.f32 %v5264_v43, %v5234_v36  ;;  %v10248_v39 = vadd.f32 %v5081_v49, %v10130_v16  ;;  %v5196_v20 = vadd.f32 %v5195_v25, %v10228_v7  ;;  %v7061_v22 = vpop.f32.mrb[6].mxu1  ;;  %v7343_v7 = vld [vmem:[%s7617_s23 + $0xc8] sm:$0xff] }
 0x4e5   : > { %10995 = vst [vmem:[#allocation12_spill] sm:$0xff] %v10243_v12  ;;  %v10252_v53 = vadd.f32 %v7061_v22, %v10138_v45  ;;  %v5084_v15 = vpop.f32.mrb[7].mxu1  ;;  %v5238_v45 = vmul.f32 %v10243_v12, %v10243_v12  ;;  %v5532_v0 = vrot.slane %v7343_v7, 1 }
 0x4e6   : > { %10996 = vst [vmem:[#allocation13_spill] sm:$0xff] %v10248_v39  ;;  %v5197_v48 = vadd.f32 %v5196_v20, %v10248_v39  ;;  %v5236_v40 = vmul.f32 %v10248_v39, %v10248_v39  ;;  %v5266_v33 = vadd.f32 %v5265_v26, %v5235_v38  ;;  %v10258_v46 = vadd.f32 %v5084_v15, %v10132_v19  ;;  %v7342_v39 = vld [vmem:[%s7617_s23 + $0xc0] sm:$0xff] }
 0x4e7   : > { %10997 = vst [vmem:[#allocation14_spill] sm:$0xff] %v10252_v53  ;;  %v5239_v19 = vmul.f32 %v10252_v53, %v10252_v53 }
 0x4e8   : > { %10998 = vst [vmem:[#allocation15_spill] sm:$0xff] %v10258_v46  ;;  %v5267_v50 = vadd.f32 %v5266_v33, %v5236_v40  ;;  %v5198_v16 = vadd.f32 %v5197_v48, %v10258_v46  ;;  %v5237_v60 = vmul.f32 %v10258_v46, %v10258_v46 }
 0x4ea   : > { %v5199_v21 = vadd.f32 %v5198_v16, %v10243_v12  ;;  %v5268_v1 = vadd.f32 %v5267_v50, %v5237_v60  ;;  %v7064_v61 = vpop.f32.mrb[8].mxu1  ;;  %v7340_v12 = vld [vmem:[%s7617_s23 + $0x78] sm:$0xff] }
 0x4eb   : > { %v10267_v62 = vadd.f32 %v7064_v61, %v10148_v17  ;;  %v5097_v14 = vpop.f32.mrb[9].mxu1  ;;  %v5516_v46 = vrot.slane %v7340_v12, 1 }
 0x4ec   : > { %v5269_v3 = vadd.f32 %v5268_v1, %v5238_v45  ;;  %v10272_v27 = vadd.f32 %v5097_v14, %v10142_v57  ;;  %v5200_v51 = vadd.f32 %v5199_v21, %v10252_v53  ;;  %v7065_v47 = vpop.f32.mrb[10].mxu1 }
 0x4ed   : > { %10999 = vst [vmem:[#allocation16_spill] sm:$0xff] %v10267_v62  ;;  %v10276_v56 = vadd.f32 %v7065_v47, %v10150_v18  ;;  %v5100_v36 = vpop.f32.mrb[11].mxu1  ;;  %v5242_v18 = vmul.f32 %v10267_v62, %v10267_v62 }
 0x4ee   : > { %11000 = vst [vmem:[#allocation17_spill] sm:$0xff] %v10272_v27  ;;  %v5201_v25 = vadd.f32 %v5200_v51, %v10272_v27  ;;  %v5240_v17 = vmul.f32 %v10272_v27, %v10272_v27  ;;  %v5270_v43 = vadd.f32 %v5269_v3, %v5239_v19  ;;  %v10282_v59 = vadd.f32 %v5100_v36, %v10144_v29  ;;  %v7339_v27 = vld [vmem:[%s7617_s23 + $0x98] sm:$0xff] }
 0x4ef   : > { %v5243_v29 = vmul.f32 %v10276_v56, %v10276_v56 }
 0x4f0   : > { %v5271_v49 = vadd.f32 %v5270_v43, %v5240_v17  ;;  %v5202_v57 = vadd.f32 %v5201_v25, %v10282_v59  ;;  %v5241_v38 = vmul.f32 %v10282_v59, %v10282_v59 }
 0x4f2   : > { %v5203_v26 = vadd.f32 %v5202_v57, %v10267_v62  ;;  %v5272_v20 = vadd.f32 %v5271_v49, %v5241_v38  ;;  %v7068_v22 = vpop.f32.mrb[12].mxu1 }
 0x4f3   : > { %v10291_v15 = vadd.f32 %v7068_v22, %v10166_v34  ;;  %v5113_v48 = vpop.f32.mrb[13].mxu1 }
 0x4f4   : > { %v5273_v40 = vadd.f32 %v5272_v20, %v5242_v18  ;;  %v10296_v33 = vadd.f32 %v5113_v48, %v10154_v30  ;;  %v5204_v50 = vadd.f32 %v5203_v26, %v10276_v56  ;;  %v7069_v16 = vpop.f32.mrb[14].mxu1 }
 0x4f5   : > { %v10300_v60 = vadd.f32 %v7069_v16, %v10171_v5  ;;  %v5116_v45 = vpop.f32.mrb[15].mxu1  ;;  %v5246_v5 = vmul.f32 %v10291_v15, %v10291_v15 }
 0x4f6   : > { %v5205_v21 = vadd.f32 %v5204_v50, %v10296_v33  ;;  %v5244_v34 = vmul.f32 %v10296_v33, %v10296_v33  ;;  %v5274_v1 = vadd.f32 %v5273_v40, %v5243_v29  ;;  %v10306_v61 = vadd.f32 %v5116_v45, %v10158_v55 }
 0x4f7   : > { %v5247_v55 = vmul.f32 %v10300_v60, %v10300_v60 }
 0x4f8   : > { %v5275_v14 = vadd.f32 %v5274_v1, %v5244_v34  ;;  %v5206_v30 = vadd.f32 %v5205_v21, %v10306_v61  ;;  %v5245_v19 = vmul.f32 %v10306_v61, %v10306_v61 }
 0x4fa   : > { %v5207_v3 = vadd.f32 %v5206_v30, %v10291_v15  ;;  %v5276_v51 = vadd.f32 %v5275_v14, %v5245_v19  ;;  %v7072_v47 = vpop.f32.mrb[16].mxu1 }
 0x4fb   : > { %v10315_v36 = vadd.f32 %v7072_v47, %v10181_v52  ;;  %v5129_v25 = vpop.f32.mrb[17].mxu1 }
 0x4fc   : > { %v5277_v17 = vadd.f32 %v5276_v51, %v5246_v5  ;;  %v10320_v43 = vadd.f32 %v5129_v25, %v10175_v58  ;;  %v5208_v49 = vadd.f32 %v5207_v3, %v10300_v60  ;;  %v7073_v57 = vpop.f32.mrb[18].mxu1 }
 0x4fd   : > { %v10324_v38 = vadd.f32 %v7073_v57, %v10183_v54  ;;  %v5132_v18 = vpop.f32.mrb[19].mxu1  ;;  %v5250_v54 = vmul.f32 %v10315_v36, %v10315_v36 }
 0x4fe   : > { %v5209_v26 = vadd.f32 %v5208_v49, %v10320_v43  ;;  %v5248_v52 = vmul.f32 %v10320_v43, %v10320_v43  ;;  %v5278_v20 = vadd.f32 %v5277_v17, %v5247_v55  ;;  %v10330_v22 = vadd.f32 %v5132_v18, %v10177_v41 }
 0x4ff   : > { %v5251_v41 = vmul.f32 %v10324_v38, %v10324_v38 }
 0x500   : > { %v5279_v48 = vadd.f32 %v5278_v20, %v5248_v52  ;;  %v5210_v58 = vadd.f32 %v5209_v26, %v10330_v22  ;;  %v5249_v29 = vmul.f32 %v10330_v22, %v10330_v22 }
 0x502   : > { %v5211_v40 = vadd.f32 %v5210_v58, %v10315_v36  ;;  %v5280_v50 = vadd.f32 %v5279_v48, %v5249_v29  ;;  %v7076_v16 = vpop.f32.mrb[20].mxu1 }
 0x503   : > { %v10339_v45 = vadd.f32 %v7076_v16, %v10193_v24  ;;  %v5145_v21 = vpop.f32.mrb[21].mxu1 }
 0x504   : > { %v5281_v34 = vadd.f32 %v5280_v50, %v5250_v54  ;;  %v10344_v1 = vadd.f32 %v5145_v21, %v10187_v9  ;;  %v5212_v14 = vadd.f32 %v5211_v40, %v10324_v38  ;;  %v7077_v30 = vpop.f32.mrb[22].mxu1 }
 0x505   : > { %v10348_v19 = vadd.f32 %v7077_v30, %v10195_v11  ;;  %v5148_v5 = vpop.f32.mrb[23].mxu1  ;;  %v5254_v11 = vmul.f32 %v10339_v45, %v10339_v45 }
 0x506   : > { %v5213_v3 = vadd.f32 %v5212_v14, %v10344_v1  ;;  %v5252_v24 = vmul.f32 %v10344_v1, %v10344_v1  ;;  %v5282_v51 = vadd.f32 %v5281_v34, %v5251_v41  ;;  %v10354_v47 = vadd.f32 %v5148_v5, %v10189_v10 }
 0x507   : > { %v5255_v10 = vmul.f32 %v10348_v19, %v10348_v19 }
 0x508   : > { %v5283_v25 = vadd.f32 %v5282_v51, %v5252_v24  ;;  %v5214_v9 = vadd.f32 %v5213_v3, %v10354_v47  ;;  %v5253_v55 = vmul.f32 %v10354_v47, %v10354_v47 }
 0x50a   : > { %v5215_v17 = vadd.f32 %v5214_v9, %v10339_v45  ;;  %v5284_v49 = vadd.f32 %v5283_v25, %v5253_v55  ;;  %v7080_v57 = vpop.f32.mrb[24].mxu1 }
 0x50b   : > { %v10363_v18 = vadd.f32 %v7080_v57, %v10205_v63  ;;  %v5161_v26 = vpop.f32.mrb[25].mxu1 }
 0x50c   : > { %v5285_v52 = vadd.f32 %v5284_v49, %v5254_v11  ;;  %v10368_v20 = vadd.f32 %v5161_v26, %v10199_v4  ;;  %v5216_v48 = vadd.f32 %v5215_v17, %v10348_v19  ;;  %v7081_v58 = vpop.f32.mrb[26].mxu1 }
 0x50d   : > { %v10372_v29 = vadd.f32 %v7081_v58, %v10207_v2  ;;  %v5164_v54 = vpop.f32.mrb[27].mxu1  ;;  %v5258_v2 = vmul.f32 %v10363_v18, %v10363_v18 }
 0x50e   : > { %v5217_v40 = vadd.f32 %v5216_v48, %v10368_v20  ;;  %v5256_v63 = vmul.f32 %v10368_v20, %v10368_v20  ;;  %v5286_v50 = vadd.f32 %v5285_v52, %v5255_v10  ;;  %v10378_v16 = vadd.f32 %v5164_v54, %v10201_v32 }
 0x50f   : > { %v5259_v32 = vmul.f32 %v10372_v29, %v10372_v29 }
 0x510   : > { %v5287_v21 = vadd.f32 %v5286_v50, %v5256_v63  ;;  %v5218_v4 = vadd.f32 %v5217_v40, %v10378_v16  ;;  %v5257_v41 = vmul.f32 %v10378_v16, %v10378_v16 }
 0x512   : > { %v5219_v34 = vadd.f32 %v5218_v4, %v10363_v18  ;;  %v5288_v14 = vadd.f32 %v5287_v21, %v5257_v41  ;;  %v7084_v30 = vpop.f32.mrb[28].mxu1  ;;  %v10414_v4 = vld [vmem:[%s7617_s23 + $0x40] sm:$0x3] }
 0x513   : > { %v10387_v5 = vadd.f32 %v7084_v30, %v10217_v42  ;;  %v5177_v3 = vpop.f32.mrb[29].mxu1  ;;  %v5504_v41 = vrot.slane %v10414_v4, 1 }
 0x514   : > { %v5289_v24 = vadd.f32 %v5288_v14, %v5258_v2  ;;  %v10392_v51 = vadd.f32 %v5177_v3, %v10211_v13  ;;  %v5220_v25 = vadd.f32 %v5219_v34, %v10372_v29  ;;  %v7085_v9 = vpop.f32.mrb[30].mxu1  ;;  %v10418_v2 = vld [vmem:[%s7617_s23 + $0x58] sm:$0x3]  ;;  %v10422_v14 = vld [vmem:[%s7617_s23 + $0x70] sm:$0x3]  ;;  %v7335_v34 = vld [vmem:[%s7617_s23 + $0x68] sm:$0xff] }
 0x515   : > { %v10396_v55 = vadd.f32 %v7085_v9, %v10219_v6  ;;  %v5180_v11 = vpop.f32.mrb[31].mxu1  ;;  %v5262_v10 = vmul.f32 %v10387_v5, %v10387_v5  ;;  %v5514_v30 = vrot.slane %v10422_v14, 1  ;;  %v10426_v3 = vld [vmem:[%s7617_s23 + $0x88] sm:$0x3]  ;;  %v10430_v9 = vld [vmem:[%s7617_s23 + $0xa0] sm:$0x3] }
 0x516   : > { %v5221_v17 = vadd.f32 %v5220_v25, %v10392_v51  ;;  %v5260_v42 = vmul.f32 %v10392_v51, %v10392_v51  ;;  %v5290_v49 = vadd.f32 %v5289_v24, %v5259_v32  ;;  %v10402_v57 = vadd.f32 %v5180_v11, %v10213_v8  ;;  %v10462_v14 = vld [vmem:[%s7617_s23 + $0x160] sm:$0x3] }
 0x517   : > { %v5263_v58 = vmul.f32 %v10396_v55, %v10396_v55  ;;  %v7334_v11 = vld [vmem:[%s7617_s23 + $0x60] sm:$0xff]  ;;  %v5512_v44 = vrot.slane %v7335_v34, 1  ;;  %v11001_v7 = vrot.slane %v10418_v2, 1  ;;  %v11004_v2 = vrot.slane %v10430_v9, 1 }
 0x518   : > { %v5291_v13 = vadd.f32 %v5290_v49, %v5260_v42  ;;  %v5222_v26 = vadd.f32 %v5221_v17, %v10402_v57  ;;  %v5261_v6 = vmul.f32 %v10402_v57, %v10402_v57  ;;  %v10434_v17 = vld [vmem:[%s7617_s23 + $0xb8] sm:$0x3]  ;;  %v10438_v49 = vld [vmem:[%s7617_s23 + $0xd0] sm:$0x3]  ;;  %v5511_v4 = vrot.slane %v7334_v11, 1 }
 0x519   : > { %v7333_v42 = vld [vmem:[%s7617_s23 + $0x38] sm:$0xff]  ;;  %v5531_v11 = vrot.slane %v7342_v39, 1  ;;  %v10496_v39 = vsel %vm663_vm0, %v5512_v44, %v5514_v30 }
 0x51a   : > { %v5223_v52 = vadd.f32 %v5222_v26, %v10387_v5  ;;  %v5292_v48 = vadd.f32 %v5291_v13, %v5261_v6  ;;  %v10442_v26 = vld [vmem:[%s7617_s23 + $0xe8] sm:$0x3] }
 0x51b   : > { %v7336_v6 = vld [vmem:[%s7617_s23 + $0x48] sm:$0xff] }
 0x51c   : > { %v5224_v8 = vadd.f32 %v5223_v52, %v10396_v55  ;;  %v5293_v54 = vadd.f32 %v5292_v48, %v5262_v10  ;;  %v10446_v10 = vld [vmem:[%s7617_s23 + $0x100] sm:$0x3]  ;;  %v10450_v48 = vld [vmem:[%s7617_s23 + $0x118] sm:$0x3]  ;;  %v5506_v35 = vrot.slane %v7336_v6, 1 }
 0x51d   : > { %v10466_v52 = vld [vmem:[%s7617_s23 + $0x178] sm:$0x3] }
 0x51e   : > { %v5225_v40 = vrot.slane %v5224_v8, 4  ;;  %v5294_v63 = vadd.f32 %v5293_v54, %v5263_v58  ;;  %v10493_v12 = vsel %vm663_vm0, %v5506_v35, %v5507_v28 }
 0x520   : > { %v5226_v50 = vadd.f32 %v5225_v40, %v5224_v8  ;;  %v5295_v21 = vrot.slane %v5294_v63, 4  ;;  %v10454_v40 = vld [vmem:[%s7617_s23 + $0x130] sm:$0x3] }
 0x522   : > { %v5227_v24 = vrot.slane %v5226_v50, 2  ;;  %v5296_v25 = vadd.f32 %v5295_v21, %v5294_v63  ;;  %v10458_v21 = vld [vmem:[%s7617_s23 + $0x148] sm:$0x3]  ;;  %v5502_v63 = vrot.slane %v7333_v42, 1 }
 0x524   : > { %v5228_v8 = vadd.f32 %v5227_v24, %v5226_v50  ;;  %v5297_v54 = vrot.slane %v5296_v25, 2  ;;  %v7332_v24 = vld [vmem:[%s7617_s23 + $0x30] sm:$0xff]  ;;  %v10485_v37 = vsel %vm663_vm0, %v5502_v63, %v5504_v41 }
 0x525   : > { %v5501_v58 = vrot.slane %v7332_v24, 1  ;;  %v7338_v50 = vld [vmem:[%s7617_s23 + $0x90] sm:$0xff]  ;;  %v5522_v24 = vrot.slane %v7339_v27, 1 }
 0x526   : > { %v5229_v13 = vrot.slane %v5228_v8, 1  ;;  %v5298_v32 = vadd.f32 %v5297_v54, %v5296_v25  ;;  %v5521_v62 = vrot.slane %v7338_v50, 1  ;;  %v7341_v25 = vld [vmem:[%s7617_s23 + $0x80] sm:$0xff]  ;;  %v7345_v50 = vld [vmem:[%s7617_s23 + $0xb0] sm:$0xff] }
 0x527   : > { %v5517_v54 = vrot.slane %v7341_v25, 1  ;;  %v10482_v34 = vsel %vm663_vm0, %v5501_v58, %v5502_v63  ;;  %v10501_v58 = vsel %vm663_vm0, %v5507_v28, %v11001_v7  ;;  %v10516_v30 = vsel %vm663_vm0, %v5522_v24, %v11004_v2  ;;  %v7344_v63 = vld [vmem:[%s7617_s23 + $0xa8] sm:$0xff]  ;;  %v7347_v7 = vld [vmem:[%s7617_s23 + $0xf8] sm:$0xff] }
 0x528   : > { %v5230_v53 = vadd.f32 %v5229_v13, %v5228_v8  ;;  %v5299_v42 = vrot.slane %v5298_v32, 1  ;;  %v10490_v13 = vsel %vm663_vm0, %v5511_v4, %v5512_v44  ;;  %11005 = vst [vmem:[#allocation20_spill] sm:$0xff] %v10516_v30  ;;  %v11006_v28 = vrot.slane %v10426_v3, 1  ;;  %v7357_v30 = vld [vmem:[%s7617_s23 + $0x140] sm:$0xff] }
 0x529   : > { %v10511_v44 = vsel %vm663_vm0, %v5516_v46, %v5517_v54  ;;  %v10524_v8 = vsel %vm663_vm0, %v5531_v11, %v5532_v0  ;;  %v5526_v4 = vrot.slane %v7344_v63, 1  ;;  %v11009_v46 = vrot.slane %v10438_v49, 1  ;;  %v7348_v63 = vld [vmem:[%s7617_s23 + $0xd8] sm:$0xff]  ;;  %v7353_v11 = vld [vmem:[%s7617_s23 + $0x110] sm:$0xff] }
 0x52a   : > { %v10487_v6 = vmul.f32 0.00390625, %v5230_v53  ;;  %v5300_v27 = vadd.f32 %v5299_v42, %v5298_v32  ;;  %v10504_v53 = vsel %vm663_vm0, %v5521_v62, %v5522_v24  ;;  %11003 = vst [vmem:[#allocation19_spill] sm:$0xff] %v10511_v44  ;;  %v10521_v62 = vsel %vm663_vm0, %v5517_v54, %v11006_v28  ;;  %11008 = vst [vmem:[#allocation22_spill] sm:$0xff] %v10524_v8  ;;  %v7346_v24 = vld [vmem:[%s7617_s23 + $0xf0] sm:$0xff]  ;;  %v7352_v28 = vld [vmem:[%s7617_s23 + $0x108] sm:$0xff] }
 0x52b   : > { %11002 = vst [vmem:[#allocation18_spill] sm:$0xff] %v10504_v53  ;;  %11007 = vst [vmem:[#allocation21_spill] sm:$0xff] %v10521_v62  ;;  %v5527_v42 = vrot.slane %v7345_v50, 1  ;;  %v10531_v25 = vsel %vm663_vm0, %v5532_v0, %v11009_v46  ;;  %v5542_v3 = vrot.slane %v7347_v7, 1  ;;  %v5536_v50 = vrot.slane %v7348_v63, 1  ;;  %v7351_v7 = vld [vmem:[%s7617_s23 + $0x128] sm:$0xff] }
 0x52c   : > { %v5301_v41 = vmul.f32 0.00390625, %v5300_v27  ;;  %v5302_v32 = vmul.f32 %v10487_v6, %v10487_v6  ;;  %11010 = vst [vmem:[#allocation23_spill] sm:$0xff] %v10531_v25  ;;  %v5541_v27 = vrot.slane %v7346_v24, 1  ;;  %v5552_v49 = vrot.slane %v7351_v7, 1  ;;  %v7354_v54 = vld [vmem:[%s7617_s23 + $0x150] sm:$0xff]  ;;  %v7356_v8 = vld [vmem:[%s7617_s23 + $0x138] sm:$0xff] }
 0x52d   : > { %v5547_v63 = vrot.slane %v7353_v11, 1  ;;  %v5561_v35 = vrot.slane %v7354_v54, 1  ;;  %v5557_v53 = vrot.slane %v7357_v30, 1  ;;  %v10588_v24 = vsel %vm663_vm0, %v5526_v4, %v5527_v42  ;;  %v7358_v62 = vld [vmem:[%s7617_s23 + $0x168] sm:$0xff]  ;;  %v7359_v44 = vld [vmem:[%s7617_s23 + $0x170] sm:$0xff] }
 0x52e   : > { %v5303_v9 = vsub.f32 %v5301_v41, %v5302_v32  ;;  %v5546_v32 = vrot.slane %v7352_v28, 1  ;;  %v5566_v28 = vrot.slane %v7358_v62, 1  ;;  %v5567_v11 = vrot.slane %v7359_v44, 1 }
 0x52f   : > { %v10598_v54 = vsel %vm663_vm0, %v5541_v27, %v5542_v3  ;;  %v11012_v30 = vrot.slane %v10446_v10, 1  ;;  %v11016_v10 = vrot.slane %v10450_v48, 1 }
 0x530   : > { %v5304_v2 = vmax.f32 %v5303_v9, 0.0  ;;  %v7350_v9 = vld [vmem:[%s7617_s23 + $0x120] sm:$0xff]  ;;  %v10617_v44 = vsel %vm663_vm0, %v5546_v32, %v5547_v63  ;;  %v10646_v48 = vsel %vm663_vm0, %v5566_v28, %v5567_v11 }
 0x531   : > { %v5551_v0 = vrot.slane %v7350_v9, 1  ;;  %v11011_v9 = vrot.slane %v10434_v17, 1  ;;  %v11013_v17 = vrot.slane %v10442_v26, 1  ;;  %11023 = vst [vmem:[#allocation29_spill] sm:$0xff] %v10646_v48 }
 0x532   : > { %v5337_v46 = vadd.f32 1e-09, %v5304_v2  ;;  %v7349_v2 = vld [vmem:[%s7617_s23 + $0xe0] sm:$0xff] }
 0x533   : > { %v5537_v41 = vrot.slane %v7349_v2, 1  ;;  %v7355_v2 = vld [vmem:[%s7617_s23 + $0x158] sm:$0xff]  ;;  %v10593_v7 = vsel %vm663_vm0, %v5527_v42, %v11011_v9  ;;  %v10614_v62 = vsel %vm663_vm0, %v5551_v0, %v5552_v49  ;;  %v11014_v42 = vrot.slane %v10454_v40, 1  ;;  %v11027_v9 = vld [vmem:[#allocation13_spill] sm:$0xff]  ;;  %s323_s23 = sand.u32 1, %s7414_s10  }
 0x534   : > { %7310 = vrsqrt.f32 %v5337_v46  ;;  %v5562_v25 = vrot.slane %v7355_v2, 1  ;;  %v5556_v46 = vrot.slane %v7356_v8, 1  ;;  %v10606_v8 = vsel %vm663_vm0, %v5542_v3, %v11012_v30  ;;  %v11028_v30 = vld [vmem:[#allocation15_spill] sm:$0xff]  ;;  %s5752_s25 = sshll.u32 %s323_s23, 8  ;;  %s10890_s16 = scalar_lea.sflag [#allocation4], %s323_s23 }
 0x535   : > { %v10601_v2 = vsel %vm663_vm0, %v5536_v50, %v5537_v41  ;;  %v10611_v4 = vsel %vm663_vm0, %v5537_v41, %v11013_v17  ;;  %v10622_v27 = vsel %vm663_vm0, %v5552_v49, %v11014_v42  ;;  %v10627_v3 = vsel %vm663_vm0, %v5547_v63, %v11016_v10  ;;  %v11030_v42 = vld [vmem:[#allocation14_spill] sm:$0xff]  ;;  %s10743_s26 = scalar_lea.vmem [#allocation3], %s5752_s25 }
 0x536   : > { %11015 = vst [vmem:[#allocation24_spill] sm:$0xff] %v10622_v27  ;;  %v10630_v26 = vsel %vm663_vm0, %v5561_v35, %v5562_v25  ;;  %v10633_v0 = vsel %vm663_vm0, %v5556_v46, %v5557_v53  ;;  %v11019_v41 = vrot.slane %v10462_v14, 1  ;;  %v11021_v40 = vrot.slane %v10458_v21, 1  ;;  %v11026_v21 = vld [vmem:[#allocation11_spill] sm:$0xff]  ;;  %s5686_s29 = sshll.u32 %s10743_s26, 4  ;;  %s10870_s29 = int_to_ptr.vmem [resolvable:$true] %s5686_s29 }
 0x537   : > { %11017 = vst [vmem:[#allocation25_spill] sm:$0xff] %v10630_v26  ;;  %11018 = vst [vmem:[#allocation26_spill] sm:$0xff] %v10633_v0  ;;  %v11024_v50 = vrot.slane %v10466_v52, 1  ;;  %v5305_v46 = vsub.f32 %v10225_v23, %v10487_v6  ;;  %v5306_v14 = vsub.f32 %v10231_v31, %v10487_v6  ;;  %v5309_v28 = vsub.f32 %v11027_v9, %v10487_v6  ;;  %v10667_v23 = vld [vmem:[%s10938_s7] ss:$0 sm:$0xff]  ;;  %v11029_v31 = vld [vmem:[#allocation12_spill] sm:$0xff]  ;;  %p7367_p0 = scmp.lt.s32.totalorder %s10870_s29, %s7365_s27 }
 0x538   : > { %v10638_v32 = vsel %vm663_vm0, %v5562_v25, %v11019_v41  ;;  %v10643_v49 = vsel %vm663_vm0, %v5557_v53, %v11021_v40  ;;  %v11025_v25 = vld [vmem:[#allocation10_spill] sm:$0xff]  ;;  %v5308_v53 = vsub.f32 %v11026_v21, %v10487_v6  ;;  %v5310_v52 = vsub.f32 %v11028_v30, %v10487_v6  ;;  %v11031_v41 = vld [vmem:[#allocation17_spill] sm:$0xff]  ;;  %s7360_s17 = scalar_lea.vmem %s10870_s29, 4096 }
 0x539   : > { %11020 = vst [vmem:[#allocation27_spill] sm:$0xff] %v10638_v32  ;;  %11022 = vst [vmem:[#allocation28_spill] sm:$0xff] %v10643_v49  ;;  %v5570_v35 = vsel %vm663_vm0, %v5567_v11, %v11024_v50  ;;  %v5307_v63 = vsub.f32 %v11025_v25, %v10487_v6  ;;  %v5311_v11 = vsub.f32 %v11029_v31, %v10487_v6  ;;  %v11032_v50 = vld [vmem:[#allocation16_spill] sm:$0xff]  ;;  %v10683_v31 = vld [vmem:[%s10939_s8] ss:$0 sm:$0xff]  ;;  %p7361_p11 = scmp.ne.s32.totalorder %s10870_s29, %s7360_s17  ;;  %p7368_p1 = scmp.lt.s32.totalorder %s7366_s22, %s7360_s17 }
 0x53a   : > { %v5312_v10 = vsub.f32 %v11030_v42, %v10487_v6  ;;  %v5313_v40 = vsub.f32 %v11031_v41, %v10487_v6  ;;  %v5315_v25 = vsub.f32 %v11032_v50, %v10487_v6  ;;  %v11033_v21 = vsub.f32 %v10402_v57, %v10487_v6 }
 0x53b   : > { %v11034_v57 = vsub.f32 %v10282_v59, %v10487_v6  ;;  %p7362_p12 = pnand %p7361_p11, %p7515_p5  ;;  %p7369_p2 = por %p7368_p1, %p7367_p0 }
 0x53d   : > { %p7363_p13 = pneg %p7362_p12 }
 0x53e   : > { %v7311_v17 = vpop.eup %7310 }
 0x53f   : > { %v5368_v9 = vmul.f32 %v7311_v17, %v11033_v21  ;;  %v5339_v30 = vmul.f32 %v7311_v17, %v5305_v46  ;;  %v5340_v48 = vmul.f32 %v7311_v17, %v5306_v14  ;;  %v5341_v32 = vmul.f32 %v7311_v17, %v5307_v63  ;;  %p7370_p3 = pnand %p7369_p2, %p7363_p13 }
 0x540   : > { %v5342_v26 = vmul.f32 %v7311_v17, %v5308_v53  ;;  %v5343_v42 = vmul.f32 %v7311_v17, %v5309_v28  ;;  %v5344_v49 = vmul.f32 %v7311_v17, %v5310_v52  ;;  %v5345_v0 = vmul.f32 %v7311_v17, %v5311_v11 }
 0x541   : > { %v5406_v41 = vmul.f32 %v10667_v23, %v5368_v9  ;;  %v5346_v50 = vmul.f32 %v7311_v17, %v5312_v10  ;;  %v5347_v27 = vmul.f32 %v7311_v17, %v5313_v40  ;;  %v5348_v46 = vmul.f32 %v7311_v17, %v11034_v57 }
 0x542   : > { %v5349_v14 = vmul.f32 %v7311_v17, %v5315_v25  ;;  %v11035_v63 = vsub.f32 %v10276_v56, %v10487_v6  ;;  %v11036_v53 = vsub.f32 %v10296_v33, %v10487_v6  ;;  %v11037_v52 = vsub.f32 %v10306_v61, %v10487_v6 }
 0x543   : > { %v5444_v10 = vadd.f32 %v10683_v31, %v5406_v41  ;;  %v11038_v40 = vsub.f32 %v10291_v15, %v10487_v6  ;;  %v11039_v25 = vsub.f32 %v10300_v60, %v10487_v6  ;;  %v11040_v56 = vsub.f32 %v10320_v43, %v10487_v6 }
 0x544   : > { %v5350_v21 = vmul.f32 %v7311_v17, %v11035_v63  ;;  %v5351_v28 = vmul.f32 %v7311_v17, %v11036_v53  ;;  %v5352_v11 = vmul.f32 %v7311_v17, %v11037_v52  ;;  %v11041_v33 = vsub.f32 %v10330_v22, %v10487_v6 }
 0x545   : > { %v5353_v59 = vmul.f32 %v7311_v17, %v11038_v40  ;;  %v5354_v9 = vmul.f32 %v7311_v17, %v11039_v25  ;;  %v5355_v57 = vmul.f32 %v7311_v17, %v11040_v56  ;;  %v11042_v61 = vsub.f32 %v10315_v36, %v10487_v6 }
 0x546   : > { %v5356_v63 = vmul.f32 %v7311_v17, %v11041_v33  ;;  %v11043_v15 = vsub.f32 %v10324_v38, %v10487_v6  ;;  %v11044_v60 = vsub.f32 %v10344_v1, %v10487_v6  ;;  %v5637_v40 = vadd.f32 %v5570_v35, %v5444_v10 }
 0x547   : > { %v5357_v41 = vmul.f32 %v7311_v17, %v11042_v61  ;;  %v11045_v43 = vsub.f32 %v10354_v47, %v10487_v6  ;;  %v11046_v22 = vsub.f32 %v10339_v45, %v10487_v6  ;;  %v11047_v36 = vsub.f32 %v10348_v19, %v10487_v6 }
 0x548   : > { %v5358_v53 = vmul.f32 %v7311_v17, %v11043_v15  ;;  %v5359_v52 = vmul.f32 %v7311_v17, %v11044_v60  ;;  %v11048_v38 = vsub.f32 %v10368_v20, %v10487_v6  ;;  %v11049_v1 = vsub.f32 %v10378_v16, %v10487_v6  ;;  %5669 = vst [vmem:[%s10743_s26 + $0xe8] sm:$0xff] %v5637_v40 }
 0x549   : > { %v5360_v25 = vmul.f32 %v7311_v17, %v11045_v43  ;;  %v5361_v56 = vmul.f32 %v7311_v17, %v11046_v22  ;;  %v5362_v33 = vmul.f32 %v7311_v17, %v11047_v36  ;;  %v11050_v47 = vsub.f32 %v10363_v18, %v10487_v6 }
 0x54a   : > { %v5363_v61 = vmul.f32 %v7311_v17, %v11048_v38  ;;  %v5364_v35 = vmul.f32 %v7311_v17, %v11049_v1  ;;  %v11051_v45 = vsub.f32 %v10372_v29, %v10487_v6  ;;  %v11052_v19 = vsub.f32 %v10392_v51, %v10487_v6 }
 0x54b   : > { %v5365_v10 = vmul.f32 %v7311_v17, %v11050_v47  ;;  %v11053_v16 = vsub.f32 %v10387_v5, %v10487_v6  ;;  %v11054_v18 = vsub.f32 %v10396_v55, %v10487_v6  ;;  %v5377_v22 = vmul.f32 %v10667_v23, %v5339_v30 }
 0x54c   : > { %v5366_v15 = vmul.f32 %v7311_v17, %v11051_v45  ;;  %v5367_v20 = vmul.f32 %v7311_v17, %v11052_v19  ;;  %v5378_v29 = vmul.f32 %v10667_v23, %v5340_v48  ;;  %v5379_v36 = vmul.f32 %v10667_v23, %v5341_v32 }
 0x54d   : > { %v5369_v60 = vmul.f32 %v7311_v17, %v11053_v16  ;;  %v5370_v43 = vmul.f32 %v7311_v17, %v11054_v18  ;;  %v5380_v40 = vmul.f32 %v10667_v23, %v5342_v26  ;;  %v5381_v38 = vmul.f32 %v10667_v23, %v5343_v42 }
 0x54e   : > { %v5382_v51 = vmul.f32 %v10667_v23, %v5344_v49  ;;  %v5383_v1 = vmul.f32 %v10667_v23, %v5345_v0  ;;  %v5384_v5 = vmul.f32 %v10667_v23, %v5346_v50  ;;  %v5385_v47 = vmul.f32 %v10667_v23, %v5347_v27 }
 0x54f   : > { %v5386_v55 = vmul.f32 %v10667_v23, %v5348_v46  ;;  %v5387_v6 = vmul.f32 %v10667_v23, %v5349_v14  ;;  %v5388_v48 = vmul.f32 %v10667_v23, %v5350_v21  ;;  %v5389_v32 = vmul.f32 %v10667_v23, %v5351_v28 }
 0x550   : > { %v5390_v26 = vmul.f32 %v10667_v23, %v5352_v11  ;;  %v5391_v17 = vmul.f32 %v10667_v23, %v5353_v59  ;;  %v5392_v49 = vmul.f32 %v10667_v23, %v5354_v9  ;;  %v5393_v0 = vmul.f32 %v10667_v23, %v5355_v57 }
 0x551   : > { %v5394_v30 = vmul.f32 %v10667_v23, %v5356_v63  ;;  %v5395_v27 = vmul.f32 %v10667_v23, %v5357_v41  ;;  %v5396_v42 = vmul.f32 %v10667_v23, %v5358_v53  ;;  %v5397_v50 = vmul.f32 %v10667_v23, %v5359_v52 }
 0x552   : > { %v5398_v46 = vmul.f32 %v10667_v23, %v5360_v25  ;;  %v5399_v14 = vmul.f32 %v10667_v23, %v5361_v56  ;;  %v5400_v21 = vmul.f32 %v10667_v23, %v5362_v33  ;;  %v5401_v28 = vmul.f32 %v10667_v23, %v5363_v61 }
 0x553   : > { %v5402_v11 = vmul.f32 %v10667_v23, %v5364_v35  ;;  %v5403_v59 = vmul.f32 %v10667_v23, %v5365_v10  ;;  %v5404_v9 = vmul.f32 %v10667_v23, %v5366_v15  ;;  %v5405_v57 = vmul.f32 %v10667_v23, %v5367_v20 }
 0x554   : > { %v5407_v63 = vmul.f32 %v10667_v23, %v5369_v60  ;;  %v5408_v41 = vmul.f32 %v10667_v23, %v5370_v43  ;;  %v5415_v53 = vadd.f32 %v10683_v31, %v5377_v22  ;;  %v5416_v52 = vadd.f32 %v10683_v31, %v5378_v29 }
 0x555   : > { %v5417_v25 = vadd.f32 %v10683_v31, %v5379_v36  ;;  %v5418_v56 = vadd.f32 %v10683_v31, %v5380_v40  ;;  %v5419_v33 = vadd.f32 %v10683_v31, %v5381_v38  ;;  %v5420_v61 = vadd.f32 %v10683_v31, %v5382_v51 }
 0x556   : > { %v5421_v35 = vadd.f32 %v10683_v31, %v5383_v1  ;;  %v5422_v10 = vadd.f32 %v10683_v31, %v5384_v5  ;;  %v5423_v45 = vadd.f32 %v10683_v31, %v5385_v47  ;;  %v5424_v23 = vadd.f32 %v10683_v31, %v5386_v55 }
 0x557   : > { %v5425_v15 = vadd.f32 %v10683_v31, %v5387_v6  ;;  %v5426_v19 = vadd.f32 %v10683_v31, %v5388_v48  ;;  %v5427_v20 = vadd.f32 %v10683_v31, %v5389_v32  ;;  %v5428_v16 = vadd.f32 %v10683_v31, %v5390_v26 }
 0x558   : > { %v5429_v60 = vadd.f32 %v10683_v31, %v5391_v17  ;;  %v5430_v18 = vadd.f32 %v10683_v31, %v5392_v49  ;;  %v5431_v43 = vadd.f32 %v10683_v31, %v5393_v0  ;;  %v5432_v22 = vadd.f32 %v10683_v31, %v5394_v30  ;;  %v11055_v17 = vld [vmem:[#allocation6_spill] sm:$0xff]  ;;  %v11056_v0 = vld [vmem:[#allocation7_spill] sm:$0xff] }
 0x559   : > { %v5433_v29 = vadd.f32 %v10683_v31, %v5395_v27  ;;  %v5434_v36 = vadd.f32 %v10683_v31, %v5396_v42  ;;  %v5435_v40 = vadd.f32 %v10683_v31, %v5397_v50  ;;  %v5436_v38 = vadd.f32 %v10683_v31, %v5398_v46 }
 0x55a   : > { %v5437_v51 = vadd.f32 %v10683_v31, %v5399_v14  ;;  %v5438_v1 = vadd.f32 %v10683_v31, %v5400_v21  ;;  %v5439_v5 = vadd.f32 %v10683_v31, %v5401_v28  ;;  %v5440_v47 = vadd.f32 %v10683_v31, %v5402_v11  ;;  %v11057_v21 = vld [vmem:[#allocation19_spill] sm:$0xff]  ;;  %v11058_v11 = vld [vmem:[#allocation21_spill] sm:$0xff] }
 0x55b   : > { %v5441_v55 = vadd.f32 %v10683_v31, %v5403_v59  ;;  %v5442_v6 = vadd.f32 %v10683_v31, %v5404_v9  ;;  %v5443_v48 = vadd.f32 %v10683_v31, %v5405_v57  ;;  %v5445_v32 = vadd.f32 %v10683_v31, %v5407_v63  ;;  %v11059_v59 = vld [vmem:[#allocation18_spill] sm:$0xff]  ;;  %v11062_v63 = vld [vmem:[#allocation23_spill] sm:$0xff] }
 0x55c   : > { %v5446_v26 = vadd.f32 %v10683_v31, %v5408_v41  ;;  %v5608_v49 = vadd.f32 %v11055_v17, %v5415_v53  ;;  %v5609_v30 = vadd.f32 %v11056_v0, %v5416_v52  ;;  %v5610_v27 = vadd.f32 %v10482_v34, %v5417_v25 }
 0x55d   : > { %v5611_v42 = vadd.f32 %v10485_v37, %v5418_v56  ;;  %v5612_v50 = vadd.f32 %v10493_v12, %v5419_v33  ;;  %v5613_v46 = vadd.f32 %v10501_v58, %v5420_v61  ;;  %v5614_v14 = vadd.f32 %v10490_v13, %v5421_v35  ;;  %v11060_v37 = vld [vmem:[#allocation20_spill] sm:$0xff]  ;;  %v11061_v58 = vld [vmem:[#allocation22_spill] sm:$0xff] }
 0x55e   : > { %v5615_v31 = vadd.f32 %v10496_v39, %v5422_v10  ;;  %v5616_v28 = vadd.f32 %v11057_v21, %v5423_v45  ;;  %v5617_v34 = vadd.f32 %v11058_v11, %v5424_v23  ;;  %v5618_v9 = vadd.f32 %v11059_v59, %v5425_v15  ;;  %5640 = vst [vmem:[%s10743_s26] sm:$0xff] %v5608_v49  ;;  %v11064_v33 = vld [vmem:[#allocation26_spill] sm:$0xff]  ;;  %v11065_v35 = vld [vmem:[#allocation28_spill] sm:$0xff]  ;;  %v11066_v10 = vld [vmem:[#allocation25_spill] sm:$0xff] }
 0x55f   : > { %5641 = vst [vmem:[%s10743_s26 + $0x8] sm:$0xff] %v5609_v30  ;;  %5642 = vst [vmem:[%s10743_s26 + $0x10] sm:$0xff] %v5610_v27  ;;  %v5619_v12 = vadd.f32 %v11060_v37, %v5426_v19  ;;  %v5620_v13 = vadd.f32 %v10588_v24, %v5427_v20  ;;  %v5621_v39 = vadd.f32 %v10593_v7, %v5428_v16  ;;  %v11068_v45 = vld [vmem:[#allocation29_spill] sm:$0xff]  ;;  %v11069_v15 = vld [vmem:[#allocation8_spill] sm:$0xff] }
 0x560   : > { %v5622_v57 = vadd.f32 %v11061_v58, %v5429_v60  ;;  %5643 = vst [vmem:[%s10743_s26 + $0x18] sm:$0xff] %v5611_v42  ;;  %5644 = vst [vmem:[%s10743_s26 + $0x20] sm:$0xff] %v5612_v50  ;;  %v5623_v41 = vadd.f32 %v11062_v63, %v5430_v18  ;;  %v5624_v53 = vadd.f32 %v10601_v2, %v5431_v43  ;;  %v11070_v20 = vld [vmem:[#allocation9_spill] sm:$0xff] }
 0x561   : > { %5645 = vst [vmem:[%s10743_s26 + $0x28] sm:$0xff] %v5613_v46  ;;  %5646 = vst [vmem:[%s10743_s26 + $0x30] sm:$0xff] %v5614_v14  ;;  %v5625_v24 = vadd.f32 %v10611_v4, %v5432_v22  ;;  %v5626_v7 = vadd.f32 %v10598_v54, %v5433_v29  ;;  %v5627_v52 = vadd.f32 %v10606_v8, %v5434_v36  ;;  %v11063_v54 = vld [vmem:[#allocation24_spill] sm:$0xff] }
 0x562   : > { %5647 = vst [vmem:[%s10743_s26 + $0x38] sm:$0xff] %v5615_v31  ;;  %5648 = vst [vmem:[%s10743_s26 + $0x40] sm:$0xff] %v5616_v28  ;;  %v5628_v25 = vadd.f32 %v10617_v44, %v5435_v40  ;;  %v5629_v56 = vadd.f32 %v10627_v3, %v5436_v38  ;;  %v5630_v2 = vadd.f32 %v10614_v62, %v5437_v51  ;;  %v11067_v62 = vld [vmem:[#allocation27_spill] sm:$0xff] }
 0x563   : > { %5649 = vst [vmem:[%s10743_s26 + $0x48] sm:$0xff] %v5617_v34  ;;  %5650 = vst [vmem:[%s10743_s26 + $0x50] sm:$0xff] %v5618_v9  ;;  %v5631_v4 = vadd.f32 %v11063_v54, %v5438_v1  ;;  %v5632_v61 = vadd.f32 %v11064_v33, %v5439_v5  ;;  %v5633_v8 = vadd.f32 %v11065_v35, %v5440_v47 }
 0x564   : > { %5651 = vst [vmem:[%s10743_s26 + $0x58] sm:$0xff] %v5619_v12  ;;  %5652 = vst [vmem:[%s10743_s26 + $0x60] sm:$0xff] %v5620_v13  ;;  %v5634_v44 = vadd.f32 %v11066_v10, %v5441_v55  ;;  %v5635_v3 = vadd.f32 %v11067_v62, %v5442_v6  ;;  %v5636_v23 = vadd.f32 %v11068_v45, %v5443_v48 }
 0x565   : > { %5653 = vst [vmem:[%s10743_s26 + $0x68] sm:$0xff] %v5621_v39  ;;  %5654 = vst [vmem:[%s10743_s26 + $0x70] sm:$0xff] %v5622_v57  ;;  %v5638_v19 = vadd.f32 %v11069_v15, %v5445_v32  ;;  %v5639_v16 = vadd.f32 %v11070_v20, %v5446_v26 }
 0x566   : > { %5655 = vst [vmem:[%s10743_s26 + $0x78] sm:$0xff] %v5623_v41  ;;  %5656 = vst [vmem:[%s10743_s26 + $0x80] sm:$0xff] %v5624_v53 }
 0x567   : > { %5657 = vst [vmem:[%s10743_s26 + $0x88] sm:$0xff] %v5625_v24  ;;  %5658 = vst [vmem:[%s10743_s26 + $0x90] sm:$0xff] %v5626_v7 }
 0x568   : > { %5659 = vst [vmem:[%s10743_s26 + $0x98] sm:$0xff] %v5627_v52  ;;  %5660 = vst [vmem:[%s10743_s26 + $0xa0] sm:$0xff] %v5628_v25 }
 0x569   : > { %5661 = vst [vmem:[%s10743_s26 + $0xa8] sm:$0xff] %v5629_v56  ;;  %5662 = vst [vmem:[%s10743_s26 + $0xb0] sm:$0xff] %v5630_v2 }
 0x56a   : > { %5663 = vst [vmem:[%s10743_s26 + $0xb8] sm:$0xff] %v5631_v4  ;;  %5664 = vst [vmem:[%s10743_s26 + $0xc0] sm:$0xff] %v5632_v61 }
 0x56b   : > { %5665 = vst [vmem:[%s10743_s26 + $0xc8] sm:$0xff] %v5633_v8  ;;  %5666 = vst [vmem:[%s10743_s26 + $0xd0] sm:$0xff] %v5634_v44 }
 0x56c   : > { %5667 = vst [vmem:[%s10743_s26 + $0xd8] sm:$0xff] %v5635_v3  ;;  %5668 = vst [vmem:[%s10743_s26 + $0xe0] sm:$0xff] %v5636_v23 }
 0x56d   : > { %5670 = vst [vmem:[%s10743_s26 + $0xf0] sm:$0xff] %v5638_v19  ;;  %5671 = vst [vmem:[%s10743_s26 + $0xf8] sm:$0xff] %v5639_v16 }
 0x56e   : > { %7373 = shalt.err (!%p7370_p3)
}
 0x56f   : > { %s7374_s23 = scalar_lea.hbm %s10868_s14, 4096  ;;  %s7378_s28 = scalar_lea.hbm %s10940_s9, 8192 }
 0x570   : > { %p7375_p4 = scmp.ne.s32.totalorder %s10868_s14, %s7374_s23  ;;  %p7379_p9 = scmp.lt.u32.totalorder %s10868_s14, %s10940_s9 }
 0x571   : > { %p7380_p10 = scmp.lt.u32.totalorder %s7378_s28, %s7374_s23  ;;  %p7382_p12 = scmp.lt.u32.totalorder %s7374_s23, %s10868_s14 }
 0x572   : > { %p7376_p7 = pnand %p7375_p4, %p7515_p5 }
 0x573   : > { %p7381_p11 = por %p7380_p10, %p7379_p9 }
 0x574   : > { %p7377_p8 = pneg %p7376_p7 }
 0x575   : > { %p7383_p13 = por %p7382_p12, %p7381_p11 }
 0x577   : > { %p7384_p0 = pnand %p7383_p13, %p7377_p8 }
 0x579   : > { %7387 = shalt.err (!%p7384_p0)
}
 0x57a   : > { %s7425_s17 = smov 128   ;;  %s7426_s21 = smov 8  }
 0x57b   : > { %7087 = dma.vmem_to_hbm [thread:$0]  (%p7515_p5), %s10870_s29, 4096, %s10868_s14, %s10890_s16, %s7425_s17, %s7425_s17, %s7426_s21  }
 0x57c PF: > { %p7093_p1 = scmp.ge.s32.totalorder %s7422_s12, 2  ;;  %s5701_s27 = sand.u32 1, %s7410_s30  }
 0x57d   : > { %s5702_s22 = scalar_lea.sflag [#allocation4], %s5701_s27 }
 0x57e   : > { %p7090_p2 = pnand %p7093_p1, %p7519_p6 }
 0x580   : > { %7405 = dma.done.wait (!%p7090_p2), %s5702_s22, 4096  }
 0x581   : > { %7407 = vsyncadd (!%p7090_p2), %s5702_s22, 4294963200  ;;  %p19_p3 = scmp.ge.s32.totalorder %s7502_s15, 4   ;;  %s11071_s30 = smov %s7414_s10 }
 0x582   : > { %s11072_s10 = smov %s7418_s11  ;;  %s11073_s11 = smov %s7513_s18 }
 0x583   : > { %s11074_s12 = smov %s7502_s15  ;;  %21 = sbr.rel (!%p19_p3) target bundleno = 3 (0x3), region = 93 }
 0x58a   :  { %5707 = vsyncpa [#allocation4], 1 }
 0x58b   :  { %5709 = vsyncpa [#allocation4 + $0x1], 1 }

</bundles_post_ra>
